<compile_context>
chip_gen: v7x
topology: tpu7x:2x2x1
jax: 0.10.0
libtpu: 0.0.40
codegen_flags: <defaults>
</compile_context>

<pallas_src>
import math

import jax
import jax.numpy as jnp
from jax.experimental import pallas as pl
from jax.experimental.pallas import tpu as pltpu

# ----------------------------- config (small) -------------------------------
BATCH = 2
SEQ = 8
HIDDEN = 32
N_HEADS = 4
HEAD_DIM = HIDDEN // N_HEADS
INTERMEDIATE = 4 * HIDDEN
N_LAYERS = 2
VOCAB = 128
MAX_POS = 16
FEATURES = 3            # feature_count of the classifier head
OUT_PAD = 128           # lane-dense padded classifier output width
LN_EPS = 1e-12
DTYPE = jnp.bfloat16

BS = BATCH * SEQ
assert SEQ & (SEQ - 1) == 0, "SEQ must be a power of two (in-kernel batch ids)"
LOG2_SEQ = SEQ.bit_length() - 1

SCALE = 1.0 / math.sqrt(HEAD_DIM)
GELU_C = math.sqrt(2.0 / math.pi)

_VMEM = pl.BlockSpec(memory_space=pltpu.MemorySpace.VMEM)

# ------------------ packed parameter-slab row layouts ------------------------
# bias / LayerNorm vector slab: (N_VEC, 1, 128) bf16, H-wide rows use lanes [0:H)
VEC_EMB_G = 0
VEC_EMB_B = 1
VEC_PER_LAYER = 7        # bo, ln1_g, ln1_b, bi(128-wide), bf, ln2_g, ln2_b


def _vec_base(layer):
    return 2 + layer * VEC_PER_LAYER


VEC_PRE_B = 2 + N_LAYERS * VEC_PER_LAYER
VEC_CLS_B = VEC_PRE_B + 1
N_VEC = VEC_CLS_B + 1

# weight-matrix slab: (N_WROWS, 128) bf16, rows stacked (all offsets are
# multiples of the bf16 sublane tile of 16)
_ROWS_PER_LAYER = HIDDEN + INTERMEDIATE


def _wi_row(layer):
    return layer * _ROWS_PER_LAYER


def _wf_row(layer):
    return layer * _ROWS_PER_LAYER + HIDDEN


ROW_CLS = N_LAYERS * _ROWS_PER_LAYER
ROW_PRE = ROW_CLS + HIDDEN
N_WROWS = ROW_PRE + HIDDEN


# ------------------------------ fused kernel --------------------------------
def _layernorm_f32(x, g, b):
    """x: (M, H) f32; g/b: (1, H) f32 -> (M, H) f32."""
    mu = jnp.mean(x, axis=-1, keepdims=True)
    xc = x - mu
    var = jnp.mean(xc * xc, axis=-1, keepdims=True)
    return xc * jax.lax.rsqrt(var + LN_EPS) * g + b


def _vec(vec_ref, idx, width=HIDDEN):
    """Read one packed bias/LN vector row as (1, width) f32."""
    return vec_ref[idx, :, :width].astype(jnp.float32)


def _bert_fused_kernel(emb_ref, amask_ref, wqkv_ref, bqkv_ref, wo_ref,
                       wm_ref, vec_ref, out_ref):
    # ---- loop-invariant additive attention mask, built in-kernel -----------
    row_b = jnp.right_shift(
        jax.lax.broadcasted_iota(jnp.int32, (BS, BS), 0), LOG2_SEQ)
    col_b = jnp.right_shift(
        jax.lax.broadcasted_iota(jnp.int32, (BS, BS), 1), LOG2_SEQ)
    key_valid = amask_ref[...] > 0.5                 # (1, BS), bcast over rows
    mask2d = jnp.where((row_b == col_b) & key_valid, 0.0, -1e9
                       ).astype(jnp.float32)         # (BS, BS) f32

    # ---- embedding LayerNorm; residual stream carried in f32 ---------------
    h = _layernorm_f32(emb_ref[...].astype(jnp.float32),
                       _vec(vec_ref, VEC_EMB_G), _vec(vec_ref, VEC_EMB_B))

    # static unroll: tiny footprint, everything stays in vregs (no spills at
    # this config — h/attn/inter are a handful of vregs out of 64).
    for l in range(N_LAYERS):
        base = _vec_base(l)
        x_bf = h.astype(DTYPE)                       # matmul operand only

        # --- attention: per-head weights, output projection folded in -------
        attn = jnp.zeros((BS, HIDDEN), jnp.float32)
        for hd in range(N_HEADS):
            # softmax scale is pre-folded into wq / bq (host-side)
            qh = (jnp.dot(x_bf, wqkv_ref[l, 0, hd],
                          preferred_element_type=jnp.float32)
                  + bqkv_ref[l, 0, hd].astype(jnp.float32)).astype(DTYPE)
            kh = (jnp.dot(x_bf, wqkv_ref[l, 1, hd],
                          preferred_element_type=jnp.float32)
                  + bqkv_ref[l, 1, hd].astype(jnp.float32)).astype(DTYPE)
            vh = (jnp.dot(x_bf, wqkv_ref[l, 2, hd],
                          preferred_element_type=jnp.float32)
                  + bqkv_ref[l, 2, hd].astype(jnp.float32)).astype(DTYPE)

            # q @ k^T without an explicit transpose (NT dot)
            s = jax.lax.dot_general(qh, kh, (((1,), (1,)), ((), ())),
                                    preferred_element_type=jnp.float32)
            s = s + mask2d                           # (BS, BS) f32
            m = jnp.max(s, axis=-1, keepdims=True)
            e = jnp.exp(s - m)
            p = e * pl.reciprocal(jnp.sum(e, axis=-1, keepdims=True),
                                  approx=True)
            ctx = jnp.dot(p.astype(DTYPE), vh,
                          preferred_element_type=jnp.float32)     # (BS, Dh)
            attn = attn + jnp.dot(ctx.astype(DTYPE), wo_ref[l, hd],
                                  preferred_element_type=jnp.float32)

        # --- residual + LayerNorm (f32 residual stream) ---------------------
        attn = attn + _vec(vec_ref, base + 0) + h                  # +bo, +x
        h1 = _layernorm_f32(attn, _vec(vec_ref, base + 1),
                            _vec(vec_ref, base + 2))

        # --- FFN pair fused; intermediate never leaves vregs ----------------
        wi = wm_ref[_wi_row(l):_wi_row(l) + HIDDEN, :]             # (H, 4H)
        inter = jnp.dot(h1.astype(DTYPE), wi,
                        preferred_element_type=jnp.float32)
        inter = inter + _vec(vec_ref, base + 3, INTERMEDIATE)
        # TODO(synk): HF BERT uses exact erf-GELU; tanh approximation kept for
        # a guaranteed Mosaic (EUP tanh) lowering.
        inter = 0.5 * inter * (1.0 + jnp.tanh(
            GELU_C * (inter + 0.044715 * inter * inter * inter)))
        wf = wm_ref[_wf_row(l):_wf_row(l) + INTERMEDIATE, :HIDDEN]  # (4H, H)
        ffn = jnp.dot(inter.astype(DTYPE), wf,
                      preferred_element_type=jnp.float32)
        ffn = ffn + _vec(vec_ref, base + 4) + h1                   # +bf, +h1
        h = _layernorm_f32(ffn, _vec(vec_ref, base + 5),
                           _vec(vec_ref, base + 6))

    # --- pooler (pre_classifier + ReLU) + classifier over ALL rows: this is
    #     intentional — it keeps the single output store a dense (BS, 128)
    #     bf16 slab (one vreg); the wrapper keeps only the CLS rows.
    pre_w = wm_ref[ROW_PRE:ROW_PRE + HIDDEN, :HIDDEN]              # (H, H)
    pooled = jnp.dot(h.astype(DTYPE), pre_w,
                     preferred_element_type=jnp.float32)
    pooled = jnp.maximum(pooled + _vec(vec_ref, VEC_PRE_B), 0.0)
    # dropout: identity in eval mode
    cls_w = wm_ref[ROW_CLS:ROW_CLS + HIDDEN, :]                    # (H, 128)
    logits = jnp.dot(pooled.astype(DTYPE), cls_w,
                     preferred_element_type=jnp.float32)
    logits = logits + _vec(vec_ref, VEC_CLS_B, OUT_PAD)
    out_ref[...] = logits.astype(out_ref.dtype)                    # (BS, 128)


# ------------------------------ parameters ----------------------------------
def init_params(key):
    """Builds kernel-ready parameter layouts (per-head weights, packed slabs)."""
    def nrm(k, shape, scale=0.02):
        return scale * jax.random.normal(k, shape, jnp.float32)

    ks = jax.random.split(key, 11)
    word_emb = nrm(ks[0], (VOCAB, HIDDEN)).astype(DTYPE)
    pos_emb = nrm(ks[1], (MAX_POS, HIDDEN)).astype(DTYPE)
    type_emb = nrm(ks[2], (2, HIDDEN)).astype(DTYPE)

    # attention projections ("natural" (L, H_in, H_out) layout)
    wq = nrm(ks[3], (N_LAYERS, HIDDEN, HIDDEN))
    wk = nrm(ks[4], (N_LAYERS, HIDDEN, HIDDEN))
    wv = nrm(ks[5], (N_LAYERS, HIDDEN, HIDDEN))
    bq = jnp.zeros((N_LAYERS, HIDDEN), jnp.float32)
    bk = jnp.zeros((N_LAYERS, HIDDEN), jnp.float32)
    bv = jnp.zeros((N_LAYERS, HIDDEN), jnp.float32)
    # fold the 1/sqrt(head_dim) softmax scale into Q weight & bias (host-free)
    wq = wq * SCALE
    bq = bq * SCALE

    def to_heads_w(w):   # (L, H, H) -> (L, NH, H, Dh): column-block per head
        return w.reshape(N_LAYERS, HIDDEN, N_HEADS, HEAD_DIM).transpose(0, 2, 1, 3)

    def to_heads_b(b):   # (L, H) -> (L, NH, 1, Dh)
        return b.reshape(N_LAYERS, N_HEADS, 1, HEAD_DIM)

    wqkv_h = jnp.stack([to_heads_w(wq), to_heads_w(wk), to_heads_w(wv)],
                       axis=1).astype(DTYPE)          # (L, 3, NH, H, Dh)
    bqkv_h = jnp.stack([to_heads_b(bq), to_heads_b(bk), to_heads_b(bv)],
                       axis=1).astype(DTYPE)          # (L, 3, NH, 1, Dh)

    # attention output projection, row-block per head: (L, NH, Dh, H)
    wo = nrm(ks[6], (N_LAYERS, HIDDEN, HIDDEN))
    wo_h = wo.reshape(N_LAYERS, N_HEADS, HEAD_DIM, HIDDEN).astype(DTYPE)
    bo = jnp.zeros((N_LAYERS, HIDDEN), jnp.float32)

    wi = nrm(ks[7], (N_LAYERS, HIDDEN, INTERMEDIATE))
    bi = jnp.zeros((N_LAYERS, INTERMEDIATE), jnp.float32)
    wf = nrm(ks[8], (N_LAYERS, INTERMEDIATE, HIDDEN))
    bf = jnp.zeros((N_LAYERS, HIDDEN), jnp.float32)

    pre_w = nrm(ks[9], (HIDDEN, HIDDEN))
    pre_b = jnp.zeros((HIDDEN,), jnp.float32)
    # classifier: xavier_normal_ -> std = sqrt(2/(fan_in+fan_out))
    cls_w = (math.sqrt(2.0 / (HIDDEN + FEATURES))
             * jax.random.normal(ks[10], (HIDDEN, FEATURES), jnp.float32))
    cls_b = jnp.zeros((FEATURES,), jnp.float32)

    # ---- packed weight-matrix slab (N_WROWS, 128) bf16 ----
    wm = jnp.zeros((N_WROWS, OUT_PAD), jnp.float32)
    for l in range(N_LAYERS):
        wm = wm.at[_wi_row(l):_wi_row(l) + HIDDEN, :INTERMEDIATE].set(wi[l])
        wm = wm.at[_wf_row(l):_wf_row(l) + INTERMEDIATE, :HIDDEN].set(wf[l])
    wm = wm.at[ROW_CLS:ROW_CLS + HIDDEN, :FEATURES].set(cls_w)
    wm = wm.at[ROW_PRE:ROW_PRE + HIDDEN, :HIDDEN].set(pre_w)

    # ---- packed bias / LayerNorm vector slab (N_VEC, 1, 128) bf16 ----
    vec = jnp.zeros((N_VEC, 1, OUT_PAD), jnp.float32)
    vec = vec.at[VEC_EMB_G, 0, :HIDDEN].set(1.0)      # emb LN gamma (beta = 0)
    for l in range(N_LAYERS):
        b0 = _vec_base(l)
        vec = vec.at[b0 + 0, 0, :HIDDEN].set(bo[l])
        vec = vec.at[b0 + 1, 0, :HIDDEN].set(1.0)     # ln1 gamma (beta = 0)
        vec = vec.at[b0 + 3, 0, :INTERMEDIATE].set(bi[l])
        vec = vec.at[b0 + 4, 0, :HIDDEN].set(bf[l])
        vec = vec.at[b0 + 5, 0, :HIDDEN].set(1.0)     # ln2 gamma (beta = 0)
    vec = vec.at[VEC_PRE_B, 0, :HIDDEN].set(pre_b)
    vec = vec.at[VEC_CLS_B, 0, :FEATURES].set(cls_b)

    return {
        "word_emb": word_emb, "pos_emb": pos_emb, "type_emb": type_emb,
        "wqkv_h": wqkv_h, "bqkv_h": bqkv_h, "wo_h": wo_h,
        "wmats": wm.astype(DTYPE), "vecs": vec.astype(DTYPE),
    }


# ------------------------------ forward pass ---------------------------------
@jax.jit
def bert_module_bf16_forward(params, input_ids, attention_mask):
    B, S = input_ids.shape
    # --- embeddings (gather is plain-JAX glue) ---
    we = params["word_emb"][input_ids].astype(jnp.float32)          # (B, S, H)
    pe = params["pos_emb"][jnp.arange(S)][None, :, :].astype(jnp.float32)
    te = params["type_emb"][0][None, None, :].astype(jnp.float32)
    # TODO(synk): token_type_ids hard-coded to 0 (matches default BERT usage).
    emb = (we + pe + te).astype(DTYPE).reshape(B * S, HIDDEN)

    amask = attention_mask.reshape(1, B * S).astype(jnp.float32)    # (1, BS)

    out = pl.pallas_call(
        _bert_fused_kernel,
        out_shape=jax.ShapeDtypeStruct((B * S, OUT_PAD), DTYPE),
        in_specs=[_VMEM] * 7,
        out_specs=_VMEM,
    )(emb, amask,
      params["wqkv_h"], params["bqkv_h"], params["wo_h"],
      params["wmats"], params["vecs"])

    # CLS token rows (row b*S of the flattened slab), first FEATURES lanes.
    logits = out.reshape(B, S, OUT_PAD)[:, 0, :FEATURES]
    return logits                                                   # (B, FEATURES)


# ---------------------------------- main -------------------------------------
if __name__ == "__main__":
    root = jax.random.PRNGKey(0)
    k_param, k_ids = jax.random.split(root)
    params = init_params(k_param)

    input_ids = jax.random.randint(k_ids, (BATCH, SEQ), 0, VOCAB, dtype=jnp.int32)
    attention_mask = jnp.ones((BATCH, SEQ), dtype=jnp.int32)
    attention_mask = attention_mask.at[1, SEQ - 2:].set(0)          # some padding

    logits = bert_module_bf16_forward(params, input_ids, attention_mask)
    jax.block_until_ready(logits)
    assert logits.shape == (BATCH, FEATURES) and logits.dtype == jnp.bfloat16
    print("KERNEL_OK")
</pallas_src>

<mosaic_0001>
module attributes {stable_mosaic.version = 11 : i64} {
  func.func @_bert_fused_kernel(%arg0: memref<16x32xbf16, #tpu.memory_space<vmem>>, %arg1: memref<1x16xf32, #tpu.memory_space<vmem>>, %arg2: memref<2x3x4x32x8xbf16, #tpu.memory_space<vmem>>, %arg3: memref<2x3x4x1x8xbf16, #tpu.memory_space<vmem>>, %arg4: memref<2x4x8x32xbf16, #tpu.memory_space<vmem>>, %arg5: memref<384x128xbf16, #tpu.memory_space<vmem>>, %arg6: memref<18x1x128xbf16, #tpu.memory_space<vmem>>, %arg7: memref<16x128xbf16, #tpu.memory_space<vmem>>) attributes {dimension_semantics = [], scalar_prefetch = 0 : i64, scratch_operands = 0 : i64, tpu.core_type = #tpu.core_type<tc>} {
    %0 = tpu.iota {dimensions = array<i32: 0>} : vector<16x16xi32>
    %c3_i32 = arith.constant 3 : i32
    %1 = vector.broadcast %c3_i32 : i32 to vector<16x16xi32>
    %2 = arith.shrsi %0, %1 : vector<16x16xi32>
    %3 = tpu.iota {dimensions = array<i32: 1>} : vector<16x16xi32>
    %c3_i32_0 = arith.constant 3 : i32
    %4 = vector.broadcast %c3_i32_0 : i32 to vector<16x16xi32>
    %5 = arith.shrsi %3, %4 : vector<16x16xi32>
    %c0 = arith.constant 0 : index
    %c0_1 = arith.constant 0 : index
    %6 = vector.load %arg1[%c0, %c0_1] : memref<1x16xf32, #tpu.memory_space<vmem>>, vector<1x16xf32>
    %cst = arith.constant 5.000000e-01 : f32
    %7 = vector.broadcast %cst : f32 to vector<1x16xf32>
    %8 = arith.cmpf ogt, %6, %7 : vector<1x16xf32>
    %9 = arith.cmpi eq, %2, %5 : vector<16x16xi32>
    %10 = vector.broadcast %8 : vector<1x16xi1> to vector<16x16xi1>
    %11 = arith.andi %9, %10 : vector<16x16xi1>
    %cst_2 = arith.constant 0.000000e+00 : f32
    %cst_3 = arith.constant -1.000000e+09 : f32
    %12 = vector.broadcast %cst_2 : f32 to vector<16x16xf32>
    %13 = vector.broadcast %cst_3 : f32 to vector<16x16xf32>
    %14 = arith.select %11, %12, %13 : vector<16x16xi1>, vector<16x16xf32>
    %c0_4 = arith.constant 0 : index
    %c0_5 = arith.constant 0 : index
    %15 = vector.load %arg0[%c0_4, %c0_5] : memref<16x32xbf16, #tpu.memory_space<vmem>>, vector<16x32xbf16>
    %16 = arith.extf %15 : vector<16x32xbf16> to vector<16x32xf32>
    %c0_6 = arith.constant 0 : index
    %c0_7 = arith.constant 0 : index
    %c0_8 = arith.constant 0 : index
    %17 = vector.load %arg6[%c0_6, %c0_7, %c0_8] : memref<18x1x128xbf16, #tpu.memory_space<vmem>>, vector<1x1x32xbf16>
    %18 = vector.shape_cast %17 : vector<1x1x32xbf16> to vector<1x32xbf16>
    %19 = arith.extf %18 : vector<1x32xbf16> to vector<1x32xf32>
    %c1 = arith.constant 1 : index
    %c0_9 = arith.constant 0 : index
    %c0_10 = arith.constant 0 : index
    %20 = vector.load %arg6[%c1, %c0_9, %c0_10] : memref<18x1x128xbf16, #tpu.memory_space<vmem>>, vector<1x1x32xbf16>
    %21 = vector.shape_cast %20 : vector<1x1x32xbf16> to vector<1x32xbf16>
    %22 = arith.extf %21 : vector<1x32xbf16> to vector<1x32xf32>
    %cst_11 = arith.constant dense<0.000000e+00> : vector<16xf32>
    %23 = vector.multi_reduction <add>, %16, %cst_11 [1] : vector<16x32xf32> to vector<16xf32>
    %24 = vector.shape_cast %23 : vector<16xf32> to vector<16x1xf32>
    %cst_12 = arith.constant 3.200000e+01 : f32
    %25 = vector.broadcast %cst_12 : f32 to vector<16x1xf32>
    %26 = arith.divf %24, %25 : vector<16x1xf32>
    %27 = vector.broadcast %26 : vector<16x1xf32> to vector<16x32xf32>
    %28 = arith.subf %16, %27 : vector<16x32xf32>
    %29 = arith.mulf %28, %28 : vector<16x32xf32>
    %cst_13 = arith.constant dense<0.000000e+00> : vector<16xf32>
    %30 = vector.multi_reduction <add>, %29, %cst_13 [1] : vector<16x32xf32> to vector<16xf32>
    %31 = vector.shape_cast %30 : vector<16xf32> to vector<16x1xf32>
    %cst_14 = arith.constant 3.200000e+01 : f32
    %32 = vector.broadcast %cst_14 : f32 to vector<16x1xf32>
    %33 = arith.divf %31, %32 : vector<16x1xf32>
    %cst_15 = arith.constant 9.99999996E-13 : f32
    %34 = vector.broadcast %cst_15 : f32 to vector<16x1xf32>
    %35 = arith.addf %33, %34 : vector<16x1xf32>
    %36 = math.rsqrt %35 : vector<16x1xf32>
    %37 = vector.broadcast %36 : vector<16x1xf32> to vector<16x32xf32>
    %38 = arith.mulf %28, %37 : vector<16x32xf32>
    %39 = vector.broadcast %19 : vector<1x32xf32> to vector<16x32xf32>
    %40 = arith.mulf %38, %39 : vector<16x32xf32>
    %41 = vector.broadcast %22 : vector<1x32xf32> to vector<16x32xf32>
    %42 = arith.addf %40, %41 : vector<16x32xf32>
    %43 = arith.truncf %42 : vector<16x32xf32> to vector<16x32xbf16>
    %cst_16 = arith.constant 0.000000e+00 : f32
    %44 = vector.broadcast %cst_16 : f32 to vector<16x32xf32>
    %c0_17 = arith.constant 0 : index
    %c0_18 = arith.constant 0 : index
    %c0_19 = arith.constant 0 : index
    %c0_20 = arith.constant 0 : index
    %c0_21 = arith.constant 0 : index
    %45 = vector.load %arg2[%c0_17, %c0_18, %c0_19, %c0_20, %c0_21] : memref<2x3x4x32x8xbf16, #tpu.memory_space<vmem>>, vector<1x1x1x32x8xbf16>
    %46 = vector.shape_cast %45 : vector<1x1x1x32x8xbf16> to vector<32x8xbf16>
    %cst_22 = arith.constant dense<0.000000e+00> : vector<16x8xf32>
    %47 = tpu.matmul %43, %46, %cst_22 {dimension_numbers = #tpu.dot_dimension_numbers<[1], [0], [0], [1], [0, 0, 1, 1], [], []>} : vector<16x32xbf16>, vector<32x8xbf16>, vector<16x8xf32> -> vector<16x8xf32>
    %c0_23 = arith.constant 0 : index
    %c0_24 = arith.constant 0 : index
    %c0_25 = arith.constant 0 : index
    %c0_26 = arith.constant 0 : index
    %c0_27 = arith.constant 0 : index
    %48 = vector.load %arg3[%c0_23, %c0_24, %c0_25, %c0_26, %c0_27] : memref<2x3x4x1x8xbf16, #tpu.memory_space<vmem>>, vector<1x1x1x1x8xbf16>
    %49 = vector.shape_cast %48 : vector<1x1x1x1x8xbf16> to vector<1x8xbf16>
    %50 = arith.extf %49 : vector<1x8xbf16> to vector<1x8xf32>
    %51 = vector.broadcast %50 : vector<1x8xf32> to vector<16x8xf32>
    %52 = arith.addf %47, %51 : vector<16x8xf32>
    %53 = arith.truncf %52 : vector<16x8xf32> to vector<16x8xbf16>
    %c0_28 = arith.constant 0 : index
    %c1_29 = arith.constant 1 : index
    %c0_30 = arith.constant 0 : index
    %c0_31 = arith.constant 0 : index
    %c0_32 = arith.constant 0 : index
    %54 = vector.load %arg2[%c0_28, %c1_29, %c0_30, %c0_31, %c0_32] : memref<2x3x4x32x8xbf16, #tpu.memory_space<vmem>>, vector<1x1x1x32x8xbf16>
    %55 = vector.shape_cast %54 : vector<1x1x1x32x8xbf16> to vector<32x8xbf16>
    %cst_33 = arith.constant dense<0.000000e+00> : vector<16x8xf32>
    %56 = tpu.matmul %43, %55, %cst_33 {dimension_numbers = #tpu.dot_dimension_numbers<[1], [0], [0], [1], [0, 0, 1, 1], [], []>} : vector<16x32xbf16>, vector<32x8xbf16>, vector<16x8xf32> -> vector<16x8xf32>
    %c0_34 = arith.constant 0 : index
    %c1_35 = arith.constant 1 : index
    %c0_36 = arith.constant 0 : index
    %c0_37 = arith.constant 0 : index
    %c0_38 = arith.constant 0 : index
    %57 = vector.load %arg3[%c0_34, %c1_35, %c0_36, %c0_37, %c0_38] : memref<2x3x4x1x8xbf16, #tpu.memory_space<vmem>>, vector<1x1x1x1x8xbf16>
    %58 = vector.shape_cast %57 : vector<1x1x1x1x8xbf16> to vector<1x8xbf16>
    %59 = arith.extf %58 : vector<1x8xbf16> to vector<1x8xf32>
    %60 = vector.broadcast %59 : vector<1x8xf32> to vector<16x8xf32>
    %61 = arith.addf %56, %60 : vector<16x8xf32>
    %62 = arith.truncf %61 : vector<16x8xf32> to vector<16x8xbf16>
    %c0_39 = arith.constant 0 : index
    %c2 = arith.constant 2 : index
    %c0_40 = arith.constant 0 : index
    %c0_41 = arith.constant 0 : index
    %c0_42 = arith.constant 0 : index
    %63 = vector.load %arg2[%c0_39, %c2, %c0_40, %c0_41, %c0_42] : memref<2x3x4x32x8xbf16, #tpu.memory_space<vmem>>, vector<1x1x1x32x8xbf16>
    %64 = vector.shape_cast %63 : vector<1x1x1x32x8xbf16> to vector<32x8xbf16>
    %cst_43 = arith.constant dense<0.000000e+00> : vector<16x8xf32>
    %65 = tpu.matmul %43, %64, %cst_43 {dimension_numbers = #tpu.dot_dimension_numbers<[1], [0], [0], [1], [0, 0, 1, 1], [], []>} : vector<16x32xbf16>, vector<32x8xbf16>, vector<16x8xf32> -> vector<16x8xf32>
    %c0_44 = arith.constant 0 : index
    %c2_45 = arith.constant 2 : index
    %c0_46 = arith.constant 0 : index
    %c0_47 = arith.constant 0 : index
    %c0_48 = arith.constant 0 : index
    %66 = vector.load %arg3[%c0_44, %c2_45, %c0_46, %c0_47, %c0_48] : memref<2x3x4x1x8xbf16, #tpu.memory_space<vmem>>, vector<1x1x1x1x8xbf16>
    %67 = vector.shape_cast %66 : vector<1x1x1x1x8xbf16> to vector<1x8xbf16>
    %68 = arith.extf %67 : vector<1x8xbf16> to vector<1x8xf32>
    %69 = vector.broadcast %68 : vector<1x8xf32> to vector<16x8xf32>
    %70 = arith.addf %65, %69 : vector<16x8xf32>
    %71 = arith.truncf %70 : vector<16x8xf32> to vector<16x8xbf16>
    %cst_49 = arith.constant dense<0.000000e+00> : vector<16x16xf32>
    %72 = tpu.matmul %53, %62, %cst_49 {dimension_numbers = #tpu.dot_dimension_numbers<[1], [1], [0], [0], [0, 0, 1, 0], [], []>} : vector<16x8xbf16>, vector<16x8xbf16>, vector<16x16xf32> -> vector<16x16xf32>
    %73 = arith.addf %72, %14 : vector<16x16xf32>
    %cst_50 = arith.constant dense<0xFF800000> : vector<16xf32>
    %74 = vector.multi_reduction <maximumf>, %73, %cst_50 [1] : vector<16x16xf32> to vector<16xf32>
    %75 = vector.shape_cast %74 : vector<16xf32> to vector<16x1xf32>
    %76 = vector.broadcast %75 : vector<16x1xf32> to vector<16x16xf32>
    %77 = arith.subf %73, %76 : vector<16x16xf32>
    %78 = math.exp %77 : vector<16x16xf32>
    %cst_51 = arith.constant dense<0.000000e+00> : vector<16xf32>
    %79 = vector.multi_reduction <add>, %78, %cst_51 [1] : vector<16x16xf32> to vector<16xf32>
    %80 = vector.shape_cast %79 : vector<16xf32> to vector<16x1xf32>
    %81 = tpu.reciprocal %80 {approx = true} : vector<16x1xf32> -> vector<16x1xf32>
    %82 = vector.broadcast %81 : vector<16x1xf32> to vector<16x16xf32>
    %83 = arith.mulf %78, %82 : vector<16x16xf32>
    %84 = arith.truncf %83 : vector<16x16xf32> to vector<16x16xbf16>
    %cst_52 = arith.constant dense<0.000000e+00> : vector<16x8xf32>
    %85 = tpu.matmul %84, %71, %cst_52 {dimension_numbers = #tpu.dot_dimension_numbers<[1], [0], [0], [1], [0, 0, 1, 1], [], []>} : vector<16x16xbf16>, vector<16x8xbf16>, vector<16x8xf32> -> vector<16x8xf32>
    %86 = arith.truncf %85 : vector<16x8xf32> to vector<16x8xbf16>
    %c0_53 = arith.constant 0 : index
    %c0_54 = arith.constant 0 : index
    %c0_55 = arith.constant 0 : index
    %c0_56 = arith.constant 0 : index
    %87 = vector.load %arg4[%c0_53, %c0_54, %c0_55, %c0_56] : memref<2x4x8x32xbf16, #tpu.memory_space<vmem>>, vector<1x1x8x32xbf16>
    %88 = vector.shape_cast %87 : vector<1x1x8x32xbf16> to vector<8x32xbf16>
    %cst_57 = arith.constant dense<0.000000e+00> : vector<16x32xf32>
    %89 = tpu.matmul %86, %88, %cst_57 {dimension_numbers = #tpu.dot_dimension_numbers<[1], [0], [0], [1], [0, 0, 1, 1], [], []>} : vector<16x8xbf16>, vector<8x32xbf16>, vector<16x32xf32> -> vector<16x32xf32>
    %90 = arith.addf %44, %89 : vector<16x32xf32>
    %c0_58 = arith.constant 0 : index
    %c0_59 = arith.constant 0 : index
    %c1_60 = arith.constant 1 : index
    %c0_61 = arith.constant 0 : index
    %c0_62 = arith.constant 0 : index
    %91 = vector.load %arg2[%c0_58, %c0_59, %c1_60, %c0_61, %c0_62] : memref<2x3x4x32x8xbf16, #tpu.memory_space<vmem>>, vector<1x1x1x32x8xbf16>
    %92 = vector.shape_cast %91 : vector<1x1x1x32x8xbf16> to vector<32x8xbf16>
    %cst_63 = arith.constant dense<0.000000e+00> : vector<16x8xf32>
    %93 = tpu.matmul %43, %92, %cst_63 {dimension_numbers = #tpu.dot_dimension_numbers<[1], [0], [0], [1], [0, 0, 1, 1], [], []>} : vector<16x32xbf16>, vector<32x8xbf16>, vector<16x8xf32> -> vector<16x8xf32>
    %c0_64 = arith.constant 0 : index
    %c0_65 = arith.constant 0 : index
    %c1_66 = arith.constant 1 : index
    %c0_67 = arith.constant 0 : index
    %c0_68 = arith.constant 0 : index
    %94 = vector.load %arg3[%c0_64, %c0_65, %c1_66, %c0_67, %c0_68] : memref<2x3x4x1x8xbf16, #tpu.memory_space<vmem>>, vector<1x1x1x1x8xbf16>
    %95 = vector.shape_cast %94 : vector<1x1x1x1x8xbf16> to vector<1x8xbf16>
    %96 = arith.extf %95 : vector<1x8xbf16> to vector<1x8xf32>
    %97 = vector.broadcast %96 : vector<1x8xf32> to vector<16x8xf32>
    %98 = arith.addf %93, %97 : vector<16x8xf32>
    %99 = arith.truncf %98 : vector<16x8xf32> to vector<16x8xbf16>
    %c0_69 = arith.constant 0 : index
    %c1_70 = arith.constant 1 : index
    %c1_71 = arith.constant 1 : index
    %c0_72 = arith.constant 0 : index
    %c0_73 = arith.constant 0 : index
    %100 = vector.load %arg2[%c0_69, %c1_70, %c1_71, %c0_72, %c0_73] : memref<2x3x4x32x8xbf16, #tpu.memory_space<vmem>>, vector<1x1x1x32x8xbf16>
    %101 = vector.shape_cast %100 : vector<1x1x1x32x8xbf16> to vector<32x8xbf16>
    %cst_74 = arith.constant dense<0.000000e+00> : vector<16x8xf32>
    %102 = tpu.matmul %43, %101, %cst_74 {dimension_numbers = #tpu.dot_dimension_numbers<[1], [0], [0], [1], [0, 0, 1, 1], [], []>} : vector<16x32xbf16>, vector<32x8xbf16>, vector<16x8xf32> -> vector<16x8xf32>
    %c0_75 = arith.constant 0 : index
    %c1_76 = arith.constant 1 : index
    %c1_77 = arith.constant 1 : index
    %c0_78 = arith.constant 0 : index
    %c0_79 = arith.constant 0 : index
    %103 = vector.load %arg3[%c0_75, %c1_76, %c1_77, %c0_78, %c0_79] : memref<2x3x4x1x8xbf16, #tpu.memory_space<vmem>>, vector<1x1x1x1x8xbf16>
    %104 = vector.shape_cast %103 : vector<1x1x1x1x8xbf16> to vector<1x8xbf16>
    %105 = arith.extf %104 : vector<1x8xbf16> to vector<1x8xf32>
    %106 = vector.broadcast %105 : vector<1x8xf32> to vector<16x8xf32>
    %107 = arith.addf %102, %106 : vector<16x8xf32>
    %108 = arith.truncf %107 : vector<16x8xf32> to vector<16x8xbf16>
    %c0_80 = arith.constant 0 : index
    %c2_81 = arith.constant 2 : index
    %c1_82 = arith.constant 1 : index
    %c0_83 = arith.constant 0 : index
    %c0_84 = arith.constant 0 : index
    %109 = vector.load %arg2[%c0_80, %c2_81, %c1_82, %c0_83, %c0_84] : memref<2x3x4x32x8xbf16, #tpu.memory_space<vmem>>, vector<1x1x1x32x8xbf16>
    %110 = vector.shape_cast %109 : vector<1x1x1x32x8xbf16> to vector<32x8xbf16>
    %cst_85 = arith.constant dense<0.000000e+00> : vector<16x8xf32>
    %111 = tpu.matmul %43, %110, %cst_85 {dimension_numbers = #tpu.dot_dimension_numbers<[1], [0], [0], [1], [0, 0, 1, 1], [], []>} : vector<16x32xbf16>, vector<32x8xbf16>, vector<16x8xf32> -> vector<16x8xf32>
    %c0_86 = arith.constant 0 : index
    %c2_87 = arith.constant 2 : index
    %c1_88 = arith.constant 1 : index
    %c0_89 = arith.constant 0 : index
    %c0_90 = arith.constant 0 : index
    %112 = vector.load %arg3[%c0_86, %c2_87, %c1_88, %c0_89, %c0_90] : memref<2x3x4x1x8xbf16, #tpu.memory_space<vmem>>, vector<1x1x1x1x8xbf16>
    %113 = vector.shape_cast %112 : vector<1x1x1x1x8xbf16> to vector<1x8xbf16>
    %114 = arith.extf %113 : vector<1x8xbf16> to vector<1x8xf32>
    %115 = vector.broadcast %114 : vector<1x8xf32> to vector<16x8xf32>
    %116 = arith.addf %111, %115 : vector<16x8xf32>
    %117 = arith.truncf %116 : vector<16x8xf32> to vector<16x8xbf16>
    %cst_91 = arith.constant dense<0.000000e+00> : vector<16x16xf32>
    %118 = tpu.matmul %99, %108, %cst_91 {dimension_numbers = #tpu.dot_dimension_numbers<[1], [1], [0], [0], [0, 0, 1, 0], [], []>} : vector<16x8xbf16>, vector<16x8xbf16>, vector<16x16xf32> -> vector<16x16xf32>
    %119 = arith.addf %118, %14 : vector<16x16xf32>
    %cst_92 = arith.constant dense<0xFF800000> : vector<16xf32>
    %120 = vector.multi_reduction <maximumf>, %119, %cst_92 [1] : vector<16x16xf32> to vector<16xf32>
    %121 = vector.shape_cast %120 : vector<16xf32> to vector<16x1xf32>
    %122 = vector.broadcast %121 : vector<16x1xf32> to vector<16x16xf32>
    %123 = arith.subf %119, %122 : vector<16x16xf32>
    %124 = math.exp %123 : vector<16x16xf32>
    %cst_93 = arith.constant dense<0.000000e+00> : vector<16xf32>
    %125 = vector.multi_reduction <add>, %124, %cst_93 [1] : vector<16x16xf32> to vector<16xf32>
    %126 = vector.shape_cast %125 : vector<16xf32> to vector<16x1xf32>
    %127 = tpu.reciprocal %126 {approx = true} : vector<16x1xf32> -> vector<16x1xf32>
    %128 = vector.broadcast %127 : vector<16x1xf32> to vector<16x16xf32>
    %129 = arith.mulf %124, %128 : vector<16x16xf32>
    %130 = arith.truncf %129 : vector<16x16xf32> to vector<16x16xbf16>
    %cst_94 = arith.constant dense<0.000000e+00> : vector<16x8xf32>
    %131 = tpu.matmul %130, %117, %cst_94 {dimension_numbers = #tpu.dot_dimension_numbers<[1], [0], [0], [1], [0, 0, 1, 1], [], []>} : vector<16x16xbf16>, vector<16x8xbf16>, vector<16x8xf32> -> vector<16x8xf32>
    %132 = arith.truncf %131 : vector<16x8xf32> to vector<16x8xbf16>
    %c0_95 = arith.constant 0 : index
    %c1_96 = arith.constant 1 : index
    %c0_97 = arith.constant 0 : index
    %c0_98 = arith.constant 0 : index
    %133 = vector.load %arg4[%c0_95, %c1_96, %c0_97, %c0_98] : memref<2x4x8x32xbf16, #tpu.memory_space<vmem>>, vector<1x1x8x32xbf16>
    %134 = vector.shape_cast %133 : vector<1x1x8x32xbf16> to vector<8x32xbf16>
    %cst_99 = arith.constant dense<0.000000e+00> : vector<16x32xf32>
    %135 = tpu.matmul %132, %134, %cst_99 {dimension_numbers = #tpu.dot_dimension_numbers<[1], [0], [0], [1], [0, 0, 1, 1], [], []>} : vector<16x8xbf16>, vector<8x32xbf16>, vector<16x32xf32> -> vector<16x32xf32>
    %136 = arith.addf %90, %135 : vector<16x32xf32>
    %c0_100 = arith.constant 0 : index
    %c0_101 = arith.constant 0 : index
    %c2_102 = arith.constant 2 : index
    %c0_103 = arith.constant 0 : index
    %c0_104 = arith.constant 0 : index
    %137 = vector.load %arg2[%c0_100, %c0_101, %c2_102, %c0_103, %c0_104] : memref<2x3x4x32x8xbf16, #tpu.memory_space<vmem>>, vector<1x1x1x32x8xbf16>
    %138 = vector.shape_cast %137 : vector<1x1x1x32x8xbf16> to vector<32x8xbf16>
    %cst_105 = arith.constant dense<0.000000e+00> : vector<16x8xf32>
    %139 = tpu.matmul %43, %138, %cst_105 {dimension_numbers = #tpu.dot_dimension_numbers<[1], [0], [0], [1], [0, 0, 1, 1], [], []>} : vector<16x32xbf16>, vector<32x8xbf16>, vector<16x8xf32> -> vector<16x8xf32>
    %c0_106 = arith.constant 0 : index
    %c0_107 = arith.constant 0 : index
    %c2_108 = arith.constant 2 : index
    %c0_109 = arith.constant 0 : index
    %c0_110 = arith.constant 0 : index
    %140 = vector.load %arg3[%c0_106, %c0_107, %c2_108, %c0_109, %c0_110] : memref<2x3x4x1x8xbf16, #tpu.memory_space<vmem>>, vector<1x1x1x1x8xbf16>
    %141 = vector.shape_cast %140 : vector<1x1x1x1x8xbf16> to vector<1x8xbf16>
    %142 = arith.extf %141 : vector<1x8xbf16> to vector<1x8xf32>
    %143 = vector.broadcast %142 : vector<1x8xf32> to vector<16x8xf32>
    %144 = arith.addf %139, %143 : vector<16x8xf32>
    %145 = arith.truncf %144 : vector<16x8xf32> to vector<16x8xbf16>
    %c0_111 = arith.constant 0 : index
    %c1_112 = arith.constant 1 : index
    %c2_113 = arith.constant 2 : index
    %c0_114 = arith.constant 0 : index
    %c0_115 = arith.constant 0 : index
    %146 = vector.load %arg2[%c0_111, %c1_112, %c2_113, %c0_114, %c0_115] : memref<2x3x4x32x8xbf16, #tpu.memory_space<vmem>>, vector<1x1x1x32x8xbf16>
    %147 = vector.shape_cast %146 : vector<1x1x1x32x8xbf16> to vector<32x8xbf16>
    %cst_116 = arith.constant dense<0.000000e+00> : vector<16x8xf32>
    %148 = tpu.matmul %43, %147, %cst_116 {dimension_numbers = #tpu.dot_dimension_numbers<[1], [0], [0], [1], [0, 0, 1, 1], [], []>} : vector<16x32xbf16>, vector<32x8xbf16>, vector<16x8xf32> -> vector<16x8xf32>
    %c0_117 = arith.constant 0 : index
    %c1_118 = arith.constant 1 : index
    %c2_119 = arith.constant 2 : index
    %c0_120 = arith.constant 0 : index
    %c0_121 = arith.constant 0 : index
    %149 = vector.load %arg3[%c0_117, %c1_118, %c2_119, %c0_120, %c0_121] : memref<2x3x4x1x8xbf16, #tpu.memory_space<vmem>>, vector<1x1x1x1x8xbf16>
    %150 = vector.shape_cast %149 : vector<1x1x1x1x8xbf16> to vector<1x8xbf16>
    %151 = arith.extf %150 : vector<1x8xbf16> to vector<1x8xf32>
    %152 = vector.broadcast %151 : vector<1x8xf32> to vector<16x8xf32>
    %153 = arith.addf %148, %152 : vector<16x8xf32>
    %154 = arith.truncf %153 : vector<16x8xf32> to vector<16x8xbf16>
    %c0_122 = arith.constant 0 : index
    %c2_123 = arith.constant 2 : index
    %c2_124 = arith.constant 2 : index
    %c0_125 = arith.constant 0 : index
    %c0_126 = arith.constant 0 : index
    %155 = vector.load %arg2[%c0_122, %c2_123, %c2_124, %c0_125, %c0_126] : memref<2x3x4x32x8xbf16, #tpu.memory_space<vmem>>, vector<1x1x1x32x8xbf16>
    %156 = vector.shape_cast %155 : vector<1x1x1x32x8xbf16> to vector<32x8xbf16>
    %cst_127 = arith.constant dense<0.000000e+00> : vector<16x8xf32>
    %157 = tpu.matmul %43, %156, %cst_127 {dimension_numbers = #tpu.dot_dimension_numbers<[1], [0], [0], [1], [0, 0, 1, 1], [], []>} : vector<16x32xbf16>, vector<32x8xbf16>, vector<16x8xf32> -> vector<16x8xf32>
    %c0_128 = arith.constant 0 : index
    %c2_129 = arith.constant 2 : index
    %c2_130 = arith.constant 2 : index
    %c0_131 = arith.constant 0 : index
    %c0_132 = arith.constant 0 : index
    %158 = vector.load %arg3[%c0_128, %c2_129, %c2_130, %c0_131, %c0_132] : memref<2x3x4x1x8xbf16, #tpu.memory_space<vmem>>, vector<1x1x1x1x8xbf16>
    %159 = vector.shape_cast %158 : vector<1x1x1x1x8xbf16> to vector<1x8xbf16>
    %160 = arith.extf %159 : vector<1x8xbf16> to vector<1x8xf32>
    %161 = vector.broadcast %160 : vector<1x8xf32> to vector<16x8xf32>
    %162 = arith.addf %157, %161 : vector<16x8xf32>
    %163 = arith.truncf %162 : vector<16x8xf32> to vector<16x8xbf16>
    %cst_133 = arith.constant dense<0.000000e+00> : vector<16x16xf32>
    %164 = tpu.matmul %145, %154, %cst_133 {dimension_numbers = #tpu.dot_dimension_numbers<[1], [1], [0], [0], [0, 0, 1, 0], [], []>} : vector<16x8xbf16>, vector<16x8xbf16>, vector<16x16xf32> -> vector<16x16xf32>
    %165 = arith.addf %164, %14 : vector<16x16xf32>
    %cst_134 = arith.constant dense<0xFF800000> : vector<16xf32>
    %166 = vector.multi_reduction <maximumf>, %165, %cst_134 [1] : vector<16x16xf32> to vector<16xf32>
    %167 = vector.shape_cast %166 : vector<16xf32> to vector<16x1xf32>
    %168 = vector.broadcast %167 : vector<16x1xf32> to vector<16x16xf32>
    %169 = arith.subf %165, %168 : vector<16x16xf32>
    %170 = math.exp %169 : vector<16x16xf32>
    %cst_135 = arith.constant dense<0.000000e+00> : vector<16xf32>
    %171 = vector.multi_reduction <add>, %170, %cst_135 [1] : vector<16x16xf32> to vector<16xf32>
    %172 = vector.shape_cast %171 : vector<16xf32> to vector<16x1xf32>
    %173 = tpu.reciprocal %172 {approx = true} : vector<16x1xf32> -> vector<16x1xf32>
    %174 = vector.broadcast %173 : vector<16x1xf32> to vector<16x16xf32>
    %175 = arith.mulf %170, %174 : vector<16x16xf32>
    %176 = arith.truncf %175 : vector<16x16xf32> to vector<16x16xbf16>
    %cst_136 = arith.constant dense<0.000000e+00> : vector<16x8xf32>
    %177 = tpu.matmul %176, %163, %cst_136 {dimension_numbers = #tpu.dot_dimension_numbers<[1], [0], [0], [1], [0, 0, 1, 1], [], []>} : vector<16x16xbf16>, vector<16x8xbf16>, vector<16x8xf32> -> vector<16x8xf32>
    %178 = arith.truncf %177 : vector<16x8xf32> to vector<16x8xbf16>
    %c0_137 = arith.constant 0 : index
    %c2_138 = arith.constant 2 : index
    %c0_139 = arith.constant 0 : index
    %c0_140 = arith.constant 0 : index
    %179 = vector.load %arg4[%c0_137, %c2_138, %c0_139, %c0_140] : memref<2x4x8x32xbf16, #tpu.memory_space<vmem>>, vector<1x1x8x32xbf16>
    %180 = vector.shape_cast %179 : vector<1x1x8x32xbf16> to vector<8x32xbf16>
    %cst_141 = arith.constant dense<0.000000e+00> : vector<16x32xf32>
    %181 = tpu.matmul %178, %180, %cst_141 {dimension_numbers = #tpu.dot_dimension_numbers<[1], [0], [0], [1], [0, 0, 1, 1], [], []>} : vector<16x8xbf16>, vector<8x32xbf16>, vector<16x32xf32> -> vector<16x32xf32>
    %182 = arith.addf %136, %181 : vector<16x32xf32>
    %c0_142 = arith.constant 0 : index
    %c0_143 = arith.constant 0 : index
    %c3 = arith.constant 3 : index
    %c0_144 = arith.constant 0 : index
    %c0_145 = arith.constant 0 : index
    %183 = vector.load %arg2[%c0_142, %c0_143, %c3, %c0_144, %c0_145] : memref<2x3x4x32x8xbf16, #tpu.memory_space<vmem>>, vector<1x1x1x32x8xbf16>
    %184 = vector.shape_cast %183 : vector<1x1x1x32x8xbf16> to vector<32x8xbf16>
    %cst_146 = arith.constant dense<0.000000e+00> : vector<16x8xf32>
    %185 = tpu.matmul %43, %184, %cst_146 {dimension_numbers = #tpu.dot_dimension_numbers<[1], [0], [0], [1], [0, 0, 1, 1], [], []>} : vector<16x32xbf16>, vector<32x8xbf16>, vector<16x8xf32> -> vector<16x8xf32>
    %c0_147 = arith.constant 0 : index
    %c0_148 = arith.constant 0 : index
    %c3_149 = arith.constant 3 : index
    %c0_150 = arith.constant 0 : index
    %c0_151 = arith.constant 0 : index
    %186 = vector.load %arg3[%c0_147, %c0_148, %c3_149, %c0_150, %c0_151] : memref<2x3x4x1x8xbf16, #tpu.memory_space<vmem>>, vector<1x1x1x1x8xbf16>
    %187 = vector.shape_cast %186 : vector<1x1x1x1x8xbf16> to vector<1x8xbf16>
    %188 = arith.extf %187 : vector<1x8xbf16> to vector<1x8xf32>
    %189 = vector.broadcast %188 : vector<1x8xf32> to vector<16x8xf32>
    %190 = arith.addf %185, %189 : vector<16x8xf32>
    %191 = arith.truncf %190 : vector<16x8xf32> to vector<16x8xbf16>
    %c0_152 = arith.constant 0 : index
    %c1_153 = arith.constant 1 : index
    %c3_154 = arith.constant 3 : index
    %c0_155 = arith.constant 0 : index
    %c0_156 = arith.constant 0 : index
    %192 = vector.load %arg2[%c0_152, %c1_153, %c3_154, %c0_155, %c0_156] : memref<2x3x4x32x8xbf16, #tpu.memory_space<vmem>>, vector<1x1x1x32x8xbf16>
    %193 = vector.shape_cast %192 : vector<1x1x1x32x8xbf16> to vector<32x8xbf16>
    %cst_157 = arith.constant dense<0.000000e+00> : vector<16x8xf32>
    %194 = tpu.matmul %43, %193, %cst_157 {dimension_numbers = #tpu.dot_dimension_numbers<[1], [0], [0], [1], [0, 0, 1, 1], [], []>} : vector<16x32xbf16>, vector<32x8xbf16>, vector<16x8xf32> -> vector<16x8xf32>
    %c0_158 = arith.constant 0 : index
    %c1_159 = arith.constant 1 : index
    %c3_160 = arith.constant 3 : index
    %c0_161 = arith.constant 0 : index
    %c0_162 = arith.constant 0 : index
    %195 = vector.load %arg3[%c0_158, %c1_159, %c3_160, %c0_161, %c0_162] : memref<2x3x4x1x8xbf16, #tpu.memory_space<vmem>>, vector<1x1x1x1x8xbf16>
    %196 = vector.shape_cast %195 : vector<1x1x1x1x8xbf16> to vector<1x8xbf16>
    %197 = arith.extf %196 : vector<1x8xbf16> to vector<1x8xf32>
    %198 = vector.broadcast %197 : vector<1x8xf32> to vector<16x8xf32>
    %199 = arith.addf %194, %198 : vector<16x8xf32>
    %200 = arith.truncf %199 : vector<16x8xf32> to vector<16x8xbf16>
    %c0_163 = arith.constant 0 : index
    %c2_164 = arith.constant 2 : index
    %c3_165 = arith.constant 3 : index
    %c0_166 = arith.constant 0 : index
    %c0_167 = arith.constant 0 : index
    %201 = vector.load %arg2[%c0_163, %c2_164, %c3_165, %c0_166, %c0_167] : memref<2x3x4x32x8xbf16, #tpu.memory_space<vmem>>, vector<1x1x1x32x8xbf16>
    %202 = vector.shape_cast %201 : vector<1x1x1x32x8xbf16> to vector<32x8xbf16>
    %cst_168 = arith.constant dense<0.000000e+00> : vector<16x8xf32>
    %203 = tpu.matmul %43, %202, %cst_168 {dimension_numbers = #tpu.dot_dimension_numbers<[1], [0], [0], [1], [0, 0, 1, 1], [], []>} : vector<16x32xbf16>, vector<32x8xbf16>, vector<16x8xf32> -> vector<16x8xf32>
    %c0_169 = arith.constant 0 : index
    %c2_170 = arith.constant 2 : index
    %c3_171 = arith.constant 3 : index
    %c0_172 = arith.constant 0 : index
    %c0_173 = arith.constant 0 : index
    %204 = vector.load %arg3[%c0_169, %c2_170, %c3_171, %c0_172, %c0_173] : memref<2x3x4x1x8xbf16, #tpu.memory_space<vmem>>, vector<1x1x1x1x8xbf16>
    %205 = vector.shape_cast %204 : vector<1x1x1x1x8xbf16> to vector<1x8xbf16>
    %206 = arith.extf %205 : vector<1x8xbf16> to vector<1x8xf32>
    %207 = vector.broadcast %206 : vector<1x8xf32> to vector<16x8xf32>
    %208 = arith.addf %203, %207 : vector<16x8xf32>
    %209 = arith.truncf %208 : vector<16x8xf32> to vector<16x8xbf16>
    %cst_174 = arith.constant dense<0.000000e+00> : vector<16x16xf32>
    %210 = tpu.matmul %191, %200, %cst_174 {dimension_numbers = #tpu.dot_dimension_numbers<[1], [1], [0], [0], [0, 0, 1, 0], [], []>} : vector<16x8xbf16>, vector<16x8xbf16>, vector<16x16xf32> -> vector<16x16xf32>
    %211 = arith.addf %210, %14 : vector<16x16xf32>
    %cst_175 = arith.constant dense<0xFF800000> : vector<16xf32>
    %212 = vector.multi_reduction <maximumf>, %211, %cst_175 [1] : vector<16x16xf32> to vector<16xf32>
    %213 = vector.shape_cast %212 : vector<16xf32> to vector<16x1xf32>
    %214 = vector.broadcast %213 : vector<16x1xf32> to vector<16x16xf32>
    %215 = arith.subf %211, %214 : vector<16x16xf32>
    %216 = math.exp %215 : vector<16x16xf32>
    %cst_176 = arith.constant dense<0.000000e+00> : vector<16xf32>
    %217 = vector.multi_reduction <add>, %216, %cst_176 [1] : vector<16x16xf32> to vector<16xf32>
    %218 = vector.shape_cast %217 : vector<16xf32> to vector<16x1xf32>
    %219 = tpu.reciprocal %218 {approx = true} : vector<16x1xf32> -> vector<16x1xf32>
    %220 = vector.broadcast %219 : vector<16x1xf32> to vector<16x16xf32>
    %221 = arith.mulf %216, %220 : vector<16x16xf32>
    %222 = arith.truncf %221 : vector<16x16xf32> to vector<16x16xbf16>
    %cst_177 = arith.constant dense<0.000000e+00> : vector<16x8xf32>
    %223 = tpu.matmul %222, %209, %cst_177 {dimension_numbers = #tpu.dot_dimension_numbers<[1], [0], [0], [1], [0, 0, 1, 1], [], []>} : vector<16x16xbf16>, vector<16x8xbf16>, vector<16x8xf32> -> vector<16x8xf32>
    %224 = arith.truncf %223 : vector<16x8xf32> to vector<16x8xbf16>
    %c0_178 = arith.constant 0 : index
    %c3_179 = arith.constant 3 : index
    %c0_180 = arith.constant 0 : index
    %c0_181 = arith.constant 0 : index
    %225 = vector.load %arg4[%c0_178, %c3_179, %c0_180, %c0_181] : memref<2x4x8x32xbf16, #tpu.memory_space<vmem>>, vector<1x1x8x32xbf16>
    %226 = vector.shape_cast %225 : vector<1x1x8x32xbf16> to vector<8x32xbf16>
    %cst_182 = arith.constant dense<0.000000e+00> : vector<16x32xf32>
    %227 = tpu.matmul %224, %226, %cst_182 {dimension_numbers = #tpu.dot_dimension_numbers<[1], [0], [0], [1], [0, 0, 1, 1], [], []>} : vector<16x8xbf16>, vector<8x32xbf16>, vector<16x32xf32> -> vector<16x32xf32>
    %228 = arith.addf %182, %227 : vector<16x32xf32>
    %c2_183 = arith.constant 2 : index
    %c0_184 = arith.constant 0 : index
    %c0_185 = arith.constant 0 : index
    %229 = vector.load %arg6[%c2_183, %c0_184, %c0_185] : memref<18x1x128xbf16, #tpu.memory_space<vmem>>, vector<1x1x32xbf16>
    %230 = vector.shape_cast %229 : vector<1x1x32xbf16> to vector<1x32xbf16>
    %231 = arith.extf %230 : vector<1x32xbf16> to vector<1x32xf32>
    %232 = vector.broadcast %231 : vector<1x32xf32> to vector<16x32xf32>
    %233 = arith.addf %228, %232 : vector<16x32xf32>
    %234 = arith.addf %233, %42 : vector<16x32xf32>
    %c3_186 = arith.constant 3 : index
    %c0_187 = arith.constant 0 : index
    %c0_188 = arith.constant 0 : index
    %235 = vector.load %arg6[%c3_186, %c0_187, %c0_188] : memref<18x1x128xbf16, #tpu.memory_space<vmem>>, vector<1x1x32xbf16>
    %236 = vector.shape_cast %235 : vector<1x1x32xbf16> to vector<1x32xbf16>
    %237 = arith.extf %236 : vector<1x32xbf16> to vector<1x32xf32>
    %c4 = arith.constant 4 : index
    %c0_189 = arith.constant 0 : index
    %c0_190 = arith.constant 0 : index
    %238 = vector.load %arg6[%c4, %c0_189, %c0_190] : memref<18x1x128xbf16, #tpu.memory_space<vmem>>, vector<1x1x32xbf16>
    %239 = vector.shape_cast %238 : vector<1x1x32xbf16> to vector<1x32xbf16>
    %240 = arith.extf %239 : vector<1x32xbf16> to vector<1x32xf32>
    %cst_191 = arith.constant dense<0.000000e+00> : vector<16xf32>
    %241 = vector.multi_reduction <add>, %234, %cst_191 [1] : vector<16x32xf32> to vector<16xf32>
    %242 = vector.shape_cast %241 : vector<16xf32> to vector<16x1xf32>
    %cst_192 = arith.constant 3.200000e+01 : f32
    %243 = vector.broadcast %cst_192 : f32 to vector<16x1xf32>
    %244 = arith.divf %242, %243 : vector<16x1xf32>
    %245 = vector.broadcast %244 : vector<16x1xf32> to vector<16x32xf32>
    %246 = arith.subf %234, %245 : vector<16x32xf32>
    %247 = arith.mulf %246, %246 : vector<16x32xf32>
    %cst_193 = arith.constant dense<0.000000e+00> : vector<16xf32>
    %248 = vector.multi_reduction <add>, %247, %cst_193 [1] : vector<16x32xf32> to vector<16xf32>
    %249 = vector.shape_cast %248 : vector<16xf32> to vector<16x1xf32>
    %cst_194 = arith.constant 3.200000e+01 : f32
    %250 = vector.broadcast %cst_194 : f32 to vector<16x1xf32>
    %251 = arith.divf %249, %250 : vector<16x1xf32>
    %cst_195 = arith.constant 9.99999996E-13 : f32
    %252 = vector.broadcast %cst_195 : f32 to vector<16x1xf32>
    %253 = arith.addf %251, %252 : vector<16x1xf32>
    %254 = math.rsqrt %253 : vector<16x1xf32>
    %255 = vector.broadcast %254 : vector<16x1xf32> to vector<16x32xf32>
    %256 = arith.mulf %246, %255 : vector<16x32xf32>
    %257 = vector.broadcast %237 : vector<1x32xf32> to vector<16x32xf32>
    %258 = arith.mulf %256, %257 : vector<16x32xf32>
    %259 = vector.broadcast %240 : vector<1x32xf32> to vector<16x32xf32>
    %260 = arith.addf %258, %259 : vector<16x32xf32>
    %c0_196 = arith.constant 0 : index
    %c0_197 = arith.constant 0 : index
    %261 = vector.load %arg5[%c0_196, %c0_197] : memref<384x128xbf16, #tpu.memory_space<vmem>>, vector<32x128xbf16>
    %262 = arith.truncf %260 : vector<16x32xf32> to vector<16x32xbf16>
    %cst_198 = arith.constant dense<0.000000e+00> : vector<16x128xf32>
    %263 = tpu.matmul %262, %261, %cst_198 {dimension_numbers = #tpu.dot_dimension_numbers<[1], [0], [0], [1], [0, 0, 1, 1], [], []>} : vector<16x32xbf16>, vector<32x128xbf16>, vector<16x128xf32> -> vector<16x128xf32>
    %c5 = arith.constant 5 : index
    %c0_199 = arith.constant 0 : index
    %c0_200 = arith.constant 0 : index
    %264 = vector.load %arg6[%c5, %c0_199, %c0_200] : memref<18x1x128xbf16, #tpu.memory_space<vmem>>, vector<1x1x128xbf16>
    %265 = vector.shape_cast %264 : vector<1x1x128xbf16> to vector<1x128xbf16>
    %266 = arith.extf %265 : vector<1x128xbf16> to vector<1x128xf32>
    %267 = vector.broadcast %266 : vector<1x128xf32> to vector<16x128xf32>
    %268 = arith.addf %263, %267 : vector<16x128xf32>
    %cst_201 = arith.constant 5.000000e-01 : f32
    %269 = vector.broadcast %cst_201 : f32 to vector<16x128xf32>
    %270 = arith.mulf %269, %268 : vector<16x128xf32>
    %cst_202 = arith.constant 4.471500e-02 : f32
    %271 = vector.broadcast %cst_202 : f32 to vector<16x128xf32>
    %272 = arith.mulf %271, %268 : vector<16x128xf32>
    %273 = arith.mulf %272, %268 : vector<16x128xf32>
    %274 = arith.mulf %273, %268 : vector<16x128xf32>
    %275 = arith.addf %268, %274 : vector<16x128xf32>
    %cst_203 = arith.constant 0.797884583 : f32
    %276 = vector.broadcast %cst_203 : f32 to vector<16x128xf32>
    %277 = arith.mulf %276, %275 : vector<16x128xf32>
    %278 = math.tanh %277 : vector<16x128xf32>
    %cst_204 = arith.constant 1.000000e+00 : f32
    %279 = vector.broadcast %cst_204 : f32 to vector<16x128xf32>
    %280 = arith.addf %279, %278 : vector<16x128xf32>
    %281 = arith.mulf %270, %280 : vector<16x128xf32>
    %c32 = arith.constant 32 : index
    %c0_205 = arith.constant 0 : index
    %282 = vector.load %arg5[%c32, %c0_205] : memref<384x128xbf16, #tpu.memory_space<vmem>>, vector<128x32xbf16>
    %283 = arith.truncf %281 : vector<16x128xf32> to vector<16x128xbf16>
    %cst_206 = arith.constant dense<0.000000e+00> : vector<16x32xf32>
    %284 = tpu.matmul %283, %282, %cst_206 {dimension_numbers = #tpu.dot_dimension_numbers<[1], [0], [0], [1], [0, 0, 1, 1], [], []>} : vector<16x128xbf16>, vector<128x32xbf16>, vector<16x32xf32> -> vector<16x32xf32>
    %c6 = arith.constant 6 : index
    %c0_207 = arith.constant 0 : index
    %c0_208 = arith.constant 0 : index
    %285 = vector.load %arg6[%c6, %c0_207, %c0_208] : memref<18x1x128xbf16, #tpu.memory_space<vmem>>, vector<1x1x32xbf16>
    %286 = vector.shape_cast %285 : vector<1x1x32xbf16> to vector<1x32xbf16>
    %287 = arith.extf %286 : vector<1x32xbf16> to vector<1x32xf32>
    %288 = vector.broadcast %287 : vector<1x32xf32> to vector<16x32xf32>
    %289 = arith.addf %284, %288 : vector<16x32xf32>
    %290 = arith.addf %289, %260 : vector<16x32xf32>
    %c7 = arith.constant 7 : index
    %c0_209 = arith.constant 0 : index
    %c0_210 = arith.constant 0 : index
    %291 = vector.load %arg6[%c7, %c0_209, %c0_210] : memref<18x1x128xbf16, #tpu.memory_space<vmem>>, vector<1x1x32xbf16>
    %292 = vector.shape_cast %291 : vector<1x1x32xbf16> to vector<1x32xbf16>
    %293 = arith.extf %292 : vector<1x32xbf16> to vector<1x32xf32>
    %c8 = arith.constant 8 : index
    %c0_211 = arith.constant 0 : index
    %c0_212 = arith.constant 0 : index
    %294 = vector.load %arg6[%c8, %c0_211, %c0_212] : memref<18x1x128xbf16, #tpu.memory_space<vmem>>, vector<1x1x32xbf16>
    %295 = vector.shape_cast %294 : vector<1x1x32xbf16> to vector<1x32xbf16>
    %296 = arith.extf %295 : vector<1x32xbf16> to vector<1x32xf32>
    %cst_213 = arith.constant dense<0.000000e+00> : vector<16xf32>
    %297 = vector.multi_reduction <add>, %290, %cst_213 [1] : vector<16x32xf32> to vector<16xf32>
    %298 = vector.shape_cast %297 : vector<16xf32> to vector<16x1xf32>
    %cst_214 = arith.constant 3.200000e+01 : f32
    %299 = vector.broadcast %cst_214 : f32 to vector<16x1xf32>
    %300 = arith.divf %298, %299 : vector<16x1xf32>
    %301 = vector.broadcast %300 : vector<16x1xf32> to vector<16x32xf32>
    %302 = arith.subf %290, %301 : vector<16x32xf32>
    %303 = arith.mulf %302, %302 : vector<16x32xf32>
    %cst_215 = arith.constant dense<0.000000e+00> : vector<16xf32>
    %304 = vector.multi_reduction <add>, %303, %cst_215 [1] : vector<16x32xf32> to vector<16xf32>
    %305 = vector.shape_cast %304 : vector<16xf32> to vector<16x1xf32>
    %cst_216 = arith.constant 3.200000e+01 : f32
    %306 = vector.broadcast %cst_216 : f32 to vector<16x1xf32>
    %307 = arith.divf %305, %306 : vector<16x1xf32>
    %cst_217 = arith.constant 9.99999996E-13 : f32
    %308 = vector.broadcast %cst_217 : f32 to vector<16x1xf32>
    %309 = arith.addf %307, %308 : vector<16x1xf32>
    %310 = math.rsqrt %309 : vector<16x1xf32>
    %311 = vector.broadcast %310 : vector<16x1xf32> to vector<16x32xf32>
    %312 = arith.mulf %302, %311 : vector<16x32xf32>
    %313 = vector.broadcast %293 : vector<1x32xf32> to vector<16x32xf32>
    %314 = arith.mulf %312, %313 : vector<16x32xf32>
    %315 = vector.broadcast %296 : vector<1x32xf32> to vector<16x32xf32>
    %316 = arith.addf %314, %315 : vector<16x32xf32>
    %317 = arith.truncf %316 : vector<16x32xf32> to vector<16x32xbf16>
    %cst_218 = arith.constant 0.000000e+00 : f32
    %318 = vector.broadcast %cst_218 : f32 to vector<16x32xf32>
    %c1_219 = arith.constant 1 : index
    %c0_220 = arith.constant 0 : index
    %c0_221 = arith.constant 0 : index
    %c0_222 = arith.constant 0 : index
    %c0_223 = arith.constant 0 : index
    %319 = vector.load %arg2[%c1_219, %c0_220, %c0_221, %c0_222, %c0_223] : memref<2x3x4x32x8xbf16, #tpu.memory_space<vmem>>, vector<1x1x1x32x8xbf16>
    %320 = vector.shape_cast %319 : vector<1x1x1x32x8xbf16> to vector<32x8xbf16>
    %cst_224 = arith.constant dense<0.000000e+00> : vector<16x8xf32>
    %321 = tpu.matmul %317, %320, %cst_224 {dimension_numbers = #tpu.dot_dimension_numbers<[1], [0], [0], [1], [0, 0, 1, 1], [], []>} : vector<16x32xbf16>, vector<32x8xbf16>, vector<16x8xf32> -> vector<16x8xf32>
    %c1_225 = arith.constant 1 : index
    %c0_226 = arith.constant 0 : index
    %c0_227 = arith.constant 0 : index
    %c0_228 = arith.constant 0 : index
    %c0_229 = arith.constant 0 : index
    %322 = vector.load %arg3[%c1_225, %c0_226, %c0_227, %c0_228, %c0_229] : memref<2x3x4x1x8xbf16, #tpu.memory_space<vmem>>, vector<1x1x1x1x8xbf16>
    %323 = vector.shape_cast %322 : vector<1x1x1x1x8xbf16> to vector<1x8xbf16>
    %324 = arith.extf %323 : vector<1x8xbf16> to vector<1x8xf32>
    %325 = vector.broadcast %324 : vector<1x8xf32> to vector<16x8xf32>
    %326 = arith.addf %321, %325 : vector<16x8xf32>
    %327 = arith.truncf %326 : vector<16x8xf32> to vector<16x8xbf16>
    %c1_230 = arith.constant 1 : index
    %c1_231 = arith.constant 1 : index
    %c0_232 = arith.constant 0 : index
    %c0_233 = arith.constant 0 : index
    %c0_234 = arith.constant 0 : index
    %328 = vector.load %arg2[%c1_230, %c1_231, %c0_232, %c0_233, %c0_234] : memref<2x3x4x32x8xbf16, #tpu.memory_space<vmem>>, vector<1x1x1x32x8xbf16>
    %329 = vector.shape_cast %328 : vector<1x1x1x32x8xbf16> to vector<32x8xbf16>
    %cst_235 = arith.constant dense<0.000000e+00> : vector<16x8xf32>
    %330 = tpu.matmul %317, %329, %cst_235 {dimension_numbers = #tpu.dot_dimension_numbers<[1], [0], [0], [1], [0, 0, 1, 1], [], []>} : vector<16x32xbf16>, vector<32x8xbf16>, vector<16x8xf32> -> vector<16x8xf32>
    %c1_236 = arith.constant 1 : index
    %c1_237 = arith.constant 1 : index
    %c0_238 = arith.constant 0 : index
    %c0_239 = arith.constant 0 : index
    %c0_240 = arith.constant 0 : index
    %331 = vector.load %arg3[%c1_236, %c1_237, %c0_238, %c0_239, %c0_240] : memref<2x3x4x1x8xbf16, #tpu.memory_space<vmem>>, vector<1x1x1x1x8xbf16>
    %332 = vector.shape_cast %331 : vector<1x1x1x1x8xbf16> to vector<1x8xbf16>
    %333 = arith.extf %332 : vector<1x8xbf16> to vector<1x8xf32>
    %334 = vector.broadcast %333 : vector<1x8xf32> to vector<16x8xf32>
    %335 = arith.addf %330, %334 : vector<16x8xf32>
    %336 = arith.truncf %335 : vector<16x8xf32> to vector<16x8xbf16>
    %c1_241 = arith.constant 1 : index
    %c2_242 = arith.constant 2 : index
    %c0_243 = arith.constant 0 : index
    %c0_244 = arith.constant 0 : index
    %c0_245 = arith.constant 0 : index
    %337 = vector.load %arg2[%c1_241, %c2_242, %c0_243, %c0_244, %c0_245] : memref<2x3x4x32x8xbf16, #tpu.memory_space<vmem>>, vector<1x1x1x32x8xbf16>
    %338 = vector.shape_cast %337 : vector<1x1x1x32x8xbf16> to vector<32x8xbf16>
    %cst_246 = arith.constant dense<0.000000e+00> : vector<16x8xf32>
    %339 = tpu.matmul %317, %338, %cst_246 {dimension_numbers = #tpu.dot_dimension_numbers<[1], [0], [0], [1], [0, 0, 1, 1], [], []>} : vector<16x32xbf16>, vector<32x8xbf16>, vector<16x8xf32> -> vector<16x8xf32>
    %c1_247 = arith.constant 1 : index
    %c2_248 = arith.constant 2 : index
    %c0_249 = arith.constant 0 : index
    %c0_250 = arith.constant 0 : index
    %c0_251 = arith.constant 0 : index
    %340 = vector.load %arg3[%c1_247, %c2_248, %c0_249, %c0_250, %c0_251] : memref<2x3x4x1x8xbf16, #tpu.memory_space<vmem>>, vector<1x1x1x1x8xbf16>
    %341 = vector.shape_cast %340 : vector<1x1x1x1x8xbf16> to vector<1x8xbf16>
    %342 = arith.extf %341 : vector<1x8xbf16> to vector<1x8xf32>
    %343 = vector.broadcast %342 : vector<1x8xf32> to vector<16x8xf32>
    %344 = arith.addf %339, %343 : vector<16x8xf32>
    %345 = arith.truncf %344 : vector<16x8xf32> to vector<16x8xbf16>
    %cst_252 = arith.constant dense<0.000000e+00> : vector<16x16xf32>
    %346 = tpu.matmul %327, %336, %cst_252 {dimension_numbers = #tpu.dot_dimension_numbers<[1], [1], [0], [0], [0, 0, 1, 0], [], []>} : vector<16x8xbf16>, vector<16x8xbf16>, vector<16x16xf32> -> vector<16x16xf32>
    %347 = arith.addf %346, %14 : vector<16x16xf32>
    %cst_253 = arith.constant dense<0xFF800000> : vector<16xf32>
    %348 = vector.multi_reduction <maximumf>, %347, %cst_253 [1] : vector<16x16xf32> to vector<16xf32>
    %349 = vector.shape_cast %348 : vector<16xf32> to vector<16x1xf32>
    %350 = vector.broadcast %349 : vector<16x1xf32> to vector<16x16xf32>
    %351 = arith.subf %347, %350 : vector<16x16xf32>
    %352 = math.exp %351 : vector<16x16xf32>
    %cst_254 = arith.constant dense<0.000000e+00> : vector<16xf32>
    %353 = vector.multi_reduction <add>, %352, %cst_254 [1] : vector<16x16xf32> to vector<16xf32>
    %354 = vector.shape_cast %353 : vector<16xf32> to vector<16x1xf32>
    %355 = tpu.reciprocal %354 {approx = true} : vector<16x1xf32> -> vector<16x1xf32>
    %356 = vector.broadcast %355 : vector<16x1xf32> to vector<16x16xf32>
    %357 = arith.mulf %352, %356 : vector<16x16xf32>
    %358 = arith.truncf %357 : vector<16x16xf32> to vector<16x16xbf16>
    %cst_255 = arith.constant dense<0.000000e+00> : vector<16x8xf32>
    %359 = tpu.matmul %358, %345, %cst_255 {dimension_numbers = #tpu.dot_dimension_numbers<[1], [0], [0], [1], [0, 0, 1, 1], [], []>} : vector<16x16xbf16>, vector<16x8xbf16>, vector<16x8xf32> -> vector<16x8xf32>
    %360 = arith.truncf %359 : vector<16x8xf32> to vector<16x8xbf16>
    %c1_256 = arith.constant 1 : index
    %c0_257 = arith.constant 0 : index
    %c0_258 = arith.constant 0 : index
    %c0_259 = arith.constant 0 : index
    %361 = vector.load %arg4[%c1_256, %c0_257, %c0_258, %c0_259] : memref<2x4x8x32xbf16, #tpu.memory_space<vmem>>, vector<1x1x8x32xbf16>
    %362 = vector.shape_cast %361 : vector<1x1x8x32xbf16> to vector<8x32xbf16>
    %cst_260 = arith.constant dense<0.000000e+00> : vector<16x32xf32>
    %363 = tpu.matmul %360, %362, %cst_260 {dimension_numbers = #tpu.dot_dimension_numbers<[1], [0], [0], [1], [0, 0, 1, 1], [], []>} : vector<16x8xbf16>, vector<8x32xbf16>, vector<16x32xf32> -> vector<16x32xf32>
    %364 = arith.addf %318, %363 : vector<16x32xf32>
    %c1_261 = arith.constant 1 : index
    %c0_262 = arith.constant 0 : index
    %c1_263 = arith.constant 1 : index
    %c0_264 = arith.constant 0 : index
    %c0_265 = arith.constant 0 : index
    %365 = vector.load %arg2[%c1_261, %c0_262, %c1_263, %c0_264, %c0_265] : memref<2x3x4x32x8xbf16, #tpu.memory_space<vmem>>, vector<1x1x1x32x8xbf16>
    %366 = vector.shape_cast %365 : vector<1x1x1x32x8xbf16> to vector<32x8xbf16>
    %cst_266 = arith.constant dense<0.000000e+00> : vector<16x8xf32>
    %367 = tpu.matmul %317, %366, %cst_266 {dimension_numbers = #tpu.dot_dimension_numbers<[1], [0], [0], [1], [0, 0, 1, 1], [], []>} : vector<16x32xbf16>, vector<32x8xbf16>, vector<16x8xf32> -> vector<16x8xf32>
    %c1_267 = arith.constant 1 : index
    %c0_268 = arith.constant 0 : index
    %c1_269 = arith.constant 1 : index
    %c0_270 = arith.constant 0 : index
    %c0_271 = arith.constant 0 : index
    %368 = vector.load %arg3[%c1_267, %c0_268, %c1_269, %c0_270, %c0_271] : memref<2x3x4x1x8xbf16, #tpu.memory_space<vmem>>, vector<1x1x1x1x8xbf16>
    %369 = vector.shape_cast %368 : vector<1x1x1x1x8xbf16> to vector<1x8xbf16>
    %370 = arith.extf %369 : vector<1x8xbf16> to vector<1x8xf32>
    %371 = vector.broadcast %370 : vector<1x8xf32> to vector<16x8xf32>
    %372 = arith.addf %367, %371 : vector<16x8xf32>
    %373 = arith.truncf %372 : vector<16x8xf32> to vector<16x8xbf16>
    %c1_272 = arith.constant 1 : index
    %c1_273 = arith.constant 1 : index
    %c1_274 = arith.constant 1 : index
    %c0_275 = arith.constant 0 : index
    %c0_276 = arith.constant 0 : index
    %374 = vector.load %arg2[%c1_272, %c1_273, %c1_274, %c0_275, %c0_276] : memref<2x3x4x32x8xbf16, #tpu.memory_space<vmem>>, vector<1x1x1x32x8xbf16>
    %375 = vector.shape_cast %374 : vector<1x1x1x32x8xbf16> to vector<32x8xbf16>
    %cst_277 = arith.constant dense<0.000000e+00> : vector<16x8xf32>
    %376 = tpu.matmul %317, %375, %cst_277 {dimension_numbers = #tpu.dot_dimension_numbers<[1], [0], [0], [1], [0, 0, 1, 1], [], []>} : vector<16x32xbf16>, vector<32x8xbf16>, vector<16x8xf32> -> vector<16x8xf32>
    %c1_278 = arith.constant 1 : index
    %c1_279 = arith.constant 1 : index
    %c1_280 = arith.constant 1 : index
    %c0_281 = arith.constant 0 : index
    %c0_282 = arith.constant 0 : index
    %377 = vector.load %arg3[%c1_278, %c1_279, %c1_280, %c0_281, %c0_282] : memref<2x3x4x1x8xbf16, #tpu.memory_space<vmem>>, vector<1x1x1x1x8xbf16>
    %378 = vector.shape_cast %377 : vector<1x1x1x1x8xbf16> to vector<1x8xbf16>
    %379 = arith.extf %378 : vector<1x8xbf16> to vector<1x8xf32>
    %380 = vector.broadcast %379 : vector<1x8xf32> to vector<16x8xf32>
    %381 = arith.addf %376, %380 : vector<16x8xf32>
    %382 = arith.truncf %381 : vector<16x8xf32> to vector<16x8xbf16>
    %c1_283 = arith.constant 1 : index
    %c2_284 = arith.constant 2 : index
    %c1_285 = arith.constant 1 : index
    %c0_286 = arith.constant 0 : index
    %c0_287 = arith.constant 0 : index
    %383 = vector.load %arg2[%c1_283, %c2_284, %c1_285, %c0_286, %c0_287] : memref<2x3x4x32x8xbf16, #tpu.memory_space<vmem>>, vector<1x1x1x32x8xbf16>
    %384 = vector.shape_cast %383 : vector<1x1x1x32x8xbf16> to vector<32x8xbf16>
    %cst_288 = arith.constant dense<0.000000e+00> : vector<16x8xf32>
    %385 = tpu.matmul %317, %384, %cst_288 {dimension_numbers = #tpu.dot_dimension_numbers<[1], [0], [0], [1], [0, 0, 1, 1], [], []>} : vector<16x32xbf16>, vector<32x8xbf16>, vector<16x8xf32> -> vector<16x8xf32>
    %c1_289 = arith.constant 1 : index
    %c2_290 = arith.constant 2 : index
    %c1_291 = arith.constant 1 : index
    %c0_292 = arith.constant 0 : index
    %c0_293 = arith.constant 0 : index
    %386 = vector.load %arg3[%c1_289, %c2_290, %c1_291, %c0_292, %c0_293] : memref<2x3x4x1x8xbf16, #tpu.memory_space<vmem>>, vector<1x1x1x1x8xbf16>
    %387 = vector.shape_cast %386 : vector<1x1x1x1x8xbf16> to vector<1x8xbf16>
    %388 = arith.extf %387 : vector<1x8xbf16> to vector<1x8xf32>
    %389 = vector.broadcast %388 : vector<1x8xf32> to vector<16x8xf32>
    %390 = arith.addf %385, %389 : vector<16x8xf32>
    %391 = arith.truncf %390 : vector<16x8xf32> to vector<16x8xbf16>
    %cst_294 = arith.constant dense<0.000000e+00> : vector<16x16xf32>
    %392 = tpu.matmul %373, %382, %cst_294 {dimension_numbers = #tpu.dot_dimension_numbers<[1], [1], [0], [0], [0, 0, 1, 0], [], []>} : vector<16x8xbf16>, vector<16x8xbf16>, vector<16x16xf32> -> vector<16x16xf32>
    %393 = arith.addf %392, %14 : vector<16x16xf32>
    %cst_295 = arith.constant dense<0xFF800000> : vector<16xf32>
    %394 = vector.multi_reduction <maximumf>, %393, %cst_295 [1] : vector<16x16xf32> to vector<16xf32>
    %395 = vector.shape_cast %394 : vector<16xf32> to vector<16x1xf32>
    %396 = vector.broadcast %395 : vector<16x1xf32> to vector<16x16xf32>
    %397 = arith.subf %393, %396 : vector<16x16xf32>
    %398 = math.exp %397 : vector<16x16xf32>
    %cst_296 = arith.constant dense<0.000000e+00> : vector<16xf32>
    %399 = vector.multi_reduction <add>, %398, %cst_296 [1] : vector<16x16xf32> to vector<16xf32>
    %400 = vector.shape_cast %399 : vector<16xf32> to vector<16x1xf32>
    %401 = tpu.reciprocal %400 {approx = true} : vector<16x1xf32> -> vector<16x1xf32>
    %402 = vector.broadcast %401 : vector<16x1xf32> to vector<16x16xf32>
    %403 = arith.mulf %398, %402 : vector<16x16xf32>
    %404 = arith.truncf %403 : vector<16x16xf32> to vector<16x16xbf16>
    %cst_297 = arith.constant dense<0.000000e+00> : vector<16x8xf32>
    %405 = tpu.matmul %404, %391, %cst_297 {dimension_numbers = #tpu.dot_dimension_numbers<[1], [0], [0], [1], [0, 0, 1, 1], [], []>} : vector<16x16xbf16>, vector<16x8xbf16>, vector<16x8xf32> -> vector<16x8xf32>
    %406 = arith.truncf %405 : vector<16x8xf32> to vector<16x8xbf16>
    %c1_298 = arith.constant 1 : index
    %c1_299 = arith.constant 1 : index
    %c0_300 = arith.constant 0 : index
    %c0_301 = arith.constant 0 : index
    %407 = vector.load %arg4[%c1_298, %c1_299, %c0_300, %c0_301] : memref<2x4x8x32xbf16, #tpu.memory_space<vmem>>, vector<1x1x8x32xbf16>
    %408 = vector.shape_cast %407 : vector<1x1x8x32xbf16> to vector<8x32xbf16>
    %cst_302 = arith.constant dense<0.000000e+00> : vector<16x32xf32>
    %409 = tpu.matmul %406, %408, %cst_302 {dimension_numbers = #tpu.dot_dimension_numbers<[1], [0], [0], [1], [0, 0, 1, 1], [], []>} : vector<16x8xbf16>, vector<8x32xbf16>, vector<16x32xf32> -> vector<16x32xf32>
    %410 = arith.addf %364, %409 : vector<16x32xf32>
    %c1_303 = arith.constant 1 : index
    %c0_304 = arith.constant 0 : index
    %c2_305 = arith.constant 2 : index
    %c0_306 = arith.constant 0 : index
    %c0_307 = arith.constant 0 : index
    %411 = vector.load %arg2[%c1_303, %c0_304, %c2_305, %c0_306, %c0_307] : memref<2x3x4x32x8xbf16, #tpu.memory_space<vmem>>, vector<1x1x1x32x8xbf16>
    %412 = vector.shape_cast %411 : vector<1x1x1x32x8xbf16> to vector<32x8xbf16>
    %cst_308 = arith.constant dense<0.000000e+00> : vector<16x8xf32>
    %413 = tpu.matmul %317, %412, %cst_308 {dimension_numbers = #tpu.dot_dimension_numbers<[1], [0], [0], [1], [0, 0, 1, 1], [], []>} : vector<16x32xbf16>, vector<32x8xbf16>, vector<16x8xf32> -> vector<16x8xf32>
    %c1_309 = arith.constant 1 : index
    %c0_310 = arith.constant 0 : index
    %c2_311 = arith.constant 2 : index
    %c0_312 = arith.constant 0 : index
    %c0_313 = arith.constant 0 : index
    %414 = vector.load %arg3[%c1_309, %c0_310, %c2_311, %c0_312, %c0_313] : memref<2x3x4x1x8xbf16, #tpu.memory_space<vmem>>, vector<1x1x1x1x8xbf16>
    %415 = vector.shape_cast %414 : vector<1x1x1x1x8xbf16> to vector<1x8xbf16>
    %416 = arith.extf %415 : vector<1x8xbf16> to vector<1x8xf32>
    %417 = vector.broadcast %416 : vector<1x8xf32> to vector<16x8xf32>
    %418 = arith.addf %413, %417 : vector<16x8xf32>
    %419 = arith.truncf %418 : vector<16x8xf32> to vector<16x8xbf16>
    %c1_314 = arith.constant 1 : index
    %c1_315 = arith.constant 1 : index
    %c2_316 = arith.constant 2 : index
    %c0_317 = arith.constant 0 : index
    %c0_318 = arith.constant 0 : index
    %420 = vector.load %arg2[%c1_314, %c1_315, %c2_316, %c0_317, %c0_318] : memref<2x3x4x32x8xbf16, #tpu.memory_space<vmem>>, vector<1x1x1x32x8xbf16>
    %421 = vector.shape_cast %420 : vector<1x1x1x32x8xbf16> to vector<32x8xbf16>
    %cst_319 = arith.constant dense<0.000000e+00> : vector<16x8xf32>
    %422 = tpu.matmul %317, %421, %cst_319 {dimension_numbers = #tpu.dot_dimension_numbers<[1], [0], [0], [1], [0, 0, 1, 1], [], []>} : vector<16x32xbf16>, vector<32x8xbf16>, vector<16x8xf32> -> vector<16x8xf32>
    %c1_320 = arith.constant 1 : index
    %c1_321 = arith.constant 1 : index
    %c2_322 = arith.constant 2 : index
    %c0_323 = arith.constant 0 : index
    %c0_324 = arith.constant 0 : index
    %423 = vector.load %arg3[%c1_320, %c1_321, %c2_322, %c0_323, %c0_324] : memref<2x3x4x1x8xbf16, #tpu.memory_space<vmem>>, vector<1x1x1x1x8xbf16>
    %424 = vector.shape_cast %423 : vector<1x1x1x1x8xbf16> to vector<1x8xbf16>
    %425 = arith.extf %424 : vector<1x8xbf16> to vector<1x8xf32>
    %426 = vector.broadcast %425 : vector<1x8xf32> to vector<16x8xf32>
    %427 = arith.addf %422, %426 : vector<16x8xf32>
    %428 = arith.truncf %427 : vector<16x8xf32> to vector<16x8xbf16>
    %c1_325 = arith.constant 1 : index
    %c2_326 = arith.constant 2 : index
    %c2_327 = arith.constant 2 : index
    %c0_328 = arith.constant 0 : index
    %c0_329 = arith.constant 0 : index
    %429 = vector.load %arg2[%c1_325, %c2_326, %c2_327, %c0_328, %c0_329] : memref<2x3x4x32x8xbf16, #tpu.memory_space<vmem>>, vector<1x1x1x32x8xbf16>
    %430 = vector.shape_cast %429 : vector<1x1x1x32x8xbf16> to vector<32x8xbf16>
    %cst_330 = arith.constant dense<0.000000e+00> : vector<16x8xf32>
    %431 = tpu.matmul %317, %430, %cst_330 {dimension_numbers = #tpu.dot_dimension_numbers<[1], [0], [0], [1], [0, 0, 1, 1], [], []>} : vector<16x32xbf16>, vector<32x8xbf16>, vector<16x8xf32> -> vector<16x8xf32>
    %c1_331 = arith.constant 1 : index
    %c2_332 = arith.constant 2 : index
    %c2_333 = arith.constant 2 : index
    %c0_334 = arith.constant 0 : index
    %c0_335 = arith.constant 0 : index
    %432 = vector.load %arg3[%c1_331, %c2_332, %c2_333, %c0_334, %c0_335] : memref<2x3x4x1x8xbf16, #tpu.memory_space<vmem>>, vector<1x1x1x1x8xbf16>
    %433 = vector.shape_cast %432 : vector<1x1x1x1x8xbf16> to vector<1x8xbf16>
    %434 = arith.extf %433 : vector<1x8xbf16> to vector<1x8xf32>
    %435 = vector.broadcast %434 : vector<1x8xf32> to vector<16x8xf32>
    %436 = arith.addf %431, %435 : vector<16x8xf32>
    %437 = arith.truncf %436 : vector<16x8xf32> to vector<16x8xbf16>
    %cst_336 = arith.constant dense<0.000000e+00> : vector<16x16xf32>
    %438 = tpu.matmul %419, %428, %cst_336 {dimension_numbers = #tpu.dot_dimension_numbers<[1], [1], [0], [0], [0, 0, 1, 0], [], []>} : vector<16x8xbf16>, vector<16x8xbf16>, vector<16x16xf32> -> vector<16x16xf32>
    %439 = arith.addf %438, %14 : vector<16x16xf32>
    %cst_337 = arith.constant dense<0xFF800000> : vector<16xf32>
    %440 = vector.multi_reduction <maximumf>, %439, %cst_337 [1] : vector<16x16xf32> to vector<16xf32>
    %441 = vector.shape_cast %440 : vector<16xf32> to vector<16x1xf32>
    %442 = vector.broadcast %441 : vector<16x1xf32> to vector<16x16xf32>
    %443 = arith.subf %439, %442 : vector<16x16xf32>
    %444 = math.exp %443 : vector<16x16xf32>
    %cst_338 = arith.constant dense<0.000000e+00> : vector<16xf32>
    %445 = vector.multi_reduction <add>, %444, %cst_338 [1] : vector<16x16xf32> to vector<16xf32>
    %446 = vector.shape_cast %445 : vector<16xf32> to vector<16x1xf32>
    %447 = tpu.reciprocal %446 {approx = true} : vector<16x1xf32> -> vector<16x1xf32>
    %448 = vector.broadcast %447 : vector<16x1xf32> to vector<16x16xf32>
    %449 = arith.mulf %444, %448 : vector<16x16xf32>
    %450 = arith.truncf %449 : vector<16x16xf32> to vector<16x16xbf16>
    %cst_339 = arith.constant dense<0.000000e+00> : vector<16x8xf32>
    %451 = tpu.matmul %450, %437, %cst_339 {dimension_numbers = #tpu.dot_dimension_numbers<[1], [0], [0], [1], [0, 0, 1, 1], [], []>} : vector<16x16xbf16>, vector<16x8xbf16>, vector<16x8xf32> -> vector<16x8xf32>
    %452 = arith.truncf %451 : vector<16x8xf32> to vector<16x8xbf16>
    %c1_340 = arith.constant 1 : index
    %c2_341 = arith.constant 2 : index
    %c0_342 = arith.constant 0 : index
    %c0_343 = arith.constant 0 : index
    %453 = vector.load %arg4[%c1_340, %c2_341, %c0_342, %c0_343] : memref<2x4x8x32xbf16, #tpu.memory_space<vmem>>, vector<1x1x8x32xbf16>
    %454 = vector.shape_cast %453 : vector<1x1x8x32xbf16> to vector<8x32xbf16>
    %cst_344 = arith.constant dense<0.000000e+00> : vector<16x32xf32>
    %455 = tpu.matmul %452, %454, %cst_344 {dimension_numbers = #tpu.dot_dimension_numbers<[1], [0], [0], [1], [0, 0, 1, 1], [], []>} : vector<16x8xbf16>, vector<8x32xbf16>, vector<16x32xf32> -> vector<16x32xf32>
    %456 = arith.addf %410, %455 : vector<16x32xf32>
    %c1_345 = arith.constant 1 : index
    %c0_346 = arith.constant 0 : index
    %c3_347 = arith.constant 3 : index
    %c0_348 = arith.constant 0 : index
    %c0_349 = arith.constant 0 : index
    %457 = vector.load %arg2[%c1_345, %c0_346, %c3_347, %c0_348, %c0_349] : memref<2x3x4x32x8xbf16, #tpu.memory_space<vmem>>, vector<1x1x1x32x8xbf16>
    %458 = vector.shape_cast %457 : vector<1x1x1x32x8xbf16> to vector<32x8xbf16>
    %cst_350 = arith.constant dense<0.000000e+00> : vector<16x8xf32>
    %459 = tpu.matmul %317, %458, %cst_350 {dimension_numbers = #tpu.dot_dimension_numbers<[1], [0], [0], [1], [0, 0, 1, 1], [], []>} : vector<16x32xbf16>, vector<32x8xbf16>, vector<16x8xf32> -> vector<16x8xf32>
    %c1_351 = arith.constant 1 : index
    %c0_352 = arith.constant 0 : index
    %c3_353 = arith.constant 3 : index
    %c0_354 = arith.constant 0 : index
    %c0_355 = arith.constant 0 : index
    %460 = vector.load %arg3[%c1_351, %c0_352, %c3_353, %c0_354, %c0_355] : memref<2x3x4x1x8xbf16, #tpu.memory_space<vmem>>, vector<1x1x1x1x8xbf16>
    %461 = vector.shape_cast %460 : vector<1x1x1x1x8xbf16> to vector<1x8xbf16>
    %462 = arith.extf %461 : vector<1x8xbf16> to vector<1x8xf32>
    %463 = vector.broadcast %462 : vector<1x8xf32> to vector<16x8xf32>
    %464 = arith.addf %459, %463 : vector<16x8xf32>
    %465 = arith.truncf %464 : vector<16x8xf32> to vector<16x8xbf16>
    %c1_356 = arith.constant 1 : index
    %c1_357 = arith.constant 1 : index
    %c3_358 = arith.constant 3 : index
    %c0_359 = arith.constant 0 : index
    %c0_360 = arith.constant 0 : index
    %466 = vector.load %arg2[%c1_356, %c1_357, %c3_358, %c0_359, %c0_360] : memref<2x3x4x32x8xbf16, #tpu.memory_space<vmem>>, vector<1x1x1x32x8xbf16>
    %467 = vector.shape_cast %466 : vector<1x1x1x32x8xbf16> to vector<32x8xbf16>
    %cst_361 = arith.constant dense<0.000000e+00> : vector<16x8xf32>
    %468 = tpu.matmul %317, %467, %cst_361 {dimension_numbers = #tpu.dot_dimension_numbers<[1], [0], [0], [1], [0, 0, 1, 1], [], []>} : vector<16x32xbf16>, vector<32x8xbf16>, vector<16x8xf32> -> vector<16x8xf32>
    %c1_362 = arith.constant 1 : index
    %c1_363 = arith.constant 1 : index
    %c3_364 = arith.constant 3 : index
    %c0_365 = arith.constant 0 : index
    %c0_366 = arith.constant 0 : index
    %469 = vector.load %arg3[%c1_362, %c1_363, %c3_364, %c0_365, %c0_366] : memref<2x3x4x1x8xbf16, #tpu.memory_space<vmem>>, vector<1x1x1x1x8xbf16>
    %470 = vector.shape_cast %469 : vector<1x1x1x1x8xbf16> to vector<1x8xbf16>
    %471 = arith.extf %470 : vector<1x8xbf16> to vector<1x8xf32>
    %472 = vector.broadcast %471 : vector<1x8xf32> to vector<16x8xf32>
    %473 = arith.addf %468, %472 : vector<16x8xf32>
    %474 = arith.truncf %473 : vector<16x8xf32> to vector<16x8xbf16>
    %c1_367 = arith.constant 1 : index
    %c2_368 = arith.constant 2 : index
    %c3_369 = arith.constant 3 : index
    %c0_370 = arith.constant 0 : index
    %c0_371 = arith.constant 0 : index
    %475 = vector.load %arg2[%c1_367, %c2_368, %c3_369, %c0_370, %c0_371] : memref<2x3x4x32x8xbf16, #tpu.memory_space<vmem>>, vector<1x1x1x32x8xbf16>
    %476 = vector.shape_cast %475 : vector<1x1x1x32x8xbf16> to vector<32x8xbf16>
    %cst_372 = arith.constant dense<0.000000e+00> : vector<16x8xf32>
    %477 = tpu.matmul %317, %476, %cst_372 {dimension_numbers = #tpu.dot_dimension_numbers<[1], [0], [0], [1], [0, 0, 1, 1], [], []>} : vector<16x32xbf16>, vector<32x8xbf16>, vector<16x8xf32> -> vector<16x8xf32>
    %c1_373 = arith.constant 1 : index
    %c2_374 = arith.constant 2 : index
    %c3_375 = arith.constant 3 : index
    %c0_376 = arith.constant 0 : index
    %c0_377 = arith.constant 0 : index
    %478 = vector.load %arg3[%c1_373, %c2_374, %c3_375, %c0_376, %c0_377] : memref<2x3x4x1x8xbf16, #tpu.memory_space<vmem>>, vector<1x1x1x1x8xbf16>
    %479 = vector.shape_cast %478 : vector<1x1x1x1x8xbf16> to vector<1x8xbf16>
    %480 = arith.extf %479 : vector<1x8xbf16> to vector<1x8xf32>
    %481 = vector.broadcast %480 : vector<1x8xf32> to vector<16x8xf32>
    %482 = arith.addf %477, %481 : vector<16x8xf32>
    %483 = arith.truncf %482 : vector<16x8xf32> to vector<16x8xbf16>
    %cst_378 = arith.constant dense<0.000000e+00> : vector<16x16xf32>
    %484 = tpu.matmul %465, %474, %cst_378 {dimension_numbers = #tpu.dot_dimension_numbers<[1], [1], [0], [0], [0, 0, 1, 0], [], []>} : vector<16x8xbf16>, vector<16x8xbf16>, vector<16x16xf32> -> vector<16x16xf32>
    %485 = arith.addf %484, %14 : vector<16x16xf32>
    %cst_379 = arith.constant dense<0xFF800000> : vector<16xf32>
    %486 = vector.multi_reduction <maximumf>, %485, %cst_379 [1] : vector<16x16xf32> to vector<16xf32>
    %487 = vector.shape_cast %486 : vector<16xf32> to vector<16x1xf32>
    %488 = vector.broadcast %487 : vector<16x1xf32> to vector<16x16xf32>
    %489 = arith.subf %485, %488 : vector<16x16xf32>
    %490 = math.exp %489 : vector<16x16xf32>
    %cst_380 = arith.constant dense<0.000000e+00> : vector<16xf32>
    %491 = vector.multi_reduction <add>, %490, %cst_380 [1] : vector<16x16xf32> to vector<16xf32>
    %492 = vector.shape_cast %491 : vector<16xf32> to vector<16x1xf32>
    %493 = tpu.reciprocal %492 {approx = true} : vector<16x1xf32> -> vector<16x1xf32>
    %494 = vector.broadcast %493 : vector<16x1xf32> to vector<16x16xf32>
    %495 = arith.mulf %490, %494 : vector<16x16xf32>
    %496 = arith.truncf %495 : vector<16x16xf32> to vector<16x16xbf16>
    %cst_381 = arith.constant dense<0.000000e+00> : vector<16x8xf32>
    %497 = tpu.matmul %496, %483, %cst_381 {dimension_numbers = #tpu.dot_dimension_numbers<[1], [0], [0], [1], [0, 0, 1, 1], [], []>} : vector<16x16xbf16>, vector<16x8xbf16>, vector<16x8xf32> -> vector<16x8xf32>
    %498 = arith.truncf %497 : vector<16x8xf32> to vector<16x8xbf16>
    %c1_382 = arith.constant 1 : index
    %c3_383 = arith.constant 3 : index
    %c0_384 = arith.constant 0 : index
    %c0_385 = arith.constant 0 : index
    %499 = vector.load %arg4[%c1_382, %c3_383, %c0_384, %c0_385] : memref<2x4x8x32xbf16, #tpu.memory_space<vmem>>, vector<1x1x8x32xbf16>
    %500 = vector.shape_cast %499 : vector<1x1x8x32xbf16> to vector<8x32xbf16>
    %cst_386 = arith.constant dense<0.000000e+00> : vector<16x32xf32>
    %501 = tpu.matmul %498, %500, %cst_386 {dimension_numbers = #tpu.dot_dimension_numbers<[1], [0], [0], [1], [0, 0, 1, 1], [], []>} : vector<16x8xbf16>, vector<8x32xbf16>, vector<16x32xf32> -> vector<16x32xf32>
    %502 = arith.addf %456, %501 : vector<16x32xf32>
    %c9 = arith.constant 9 : index
    %c0_387 = arith.constant 0 : index
    %c0_388 = arith.constant 0 : index
    %503 = vector.load %arg6[%c9, %c0_387, %c0_388] : memref<18x1x128xbf16, #tpu.memory_space<vmem>>, vector<1x1x32xbf16>
    %504 = vector.shape_cast %503 : vector<1x1x32xbf16> to vector<1x32xbf16>
    %505 = arith.extf %504 : vector<1x32xbf16> to vector<1x32xf32>
    %506 = vector.broadcast %505 : vector<1x32xf32> to vector<16x32xf32>
    %507 = arith.addf %502, %506 : vector<16x32xf32>
    %508 = arith.addf %507, %316 : vector<16x32xf32>
    %c10 = arith.constant 10 : index
    %c0_389 = arith.constant 0 : index
    %c0_390 = arith.constant 0 : index
    %509 = vector.load %arg6[%c10, %c0_389, %c0_390] : memref<18x1x128xbf16, #tpu.memory_space<vmem>>, vector<1x1x32xbf16>
    %510 = vector.shape_cast %509 : vector<1x1x32xbf16> to vector<1x32xbf16>
    %511 = arith.extf %510 : vector<1x32xbf16> to vector<1x32xf32>
    %c11 = arith.constant 11 : index
    %c0_391 = arith.constant 0 : index
    %c0_392 = arith.constant 0 : index
    %512 = vector.load %arg6[%c11, %c0_391, %c0_392] : memref<18x1x128xbf16, #tpu.memory_space<vmem>>, vector<1x1x32xbf16>
    %513 = vector.shape_cast %512 : vector<1x1x32xbf16> to vector<1x32xbf16>
    %514 = arith.extf %513 : vector<1x32xbf16> to vector<1x32xf32>
    %cst_393 = arith.constant dense<0.000000e+00> : vector<16xf32>
    %515 = vector.multi_reduction <add>, %508, %cst_393 [1] : vector<16x32xf32> to vector<16xf32>
    %516 = vector.shape_cast %515 : vector<16xf32> to vector<16x1xf32>
    %cst_394 = arith.constant 3.200000e+01 : f32
    %517 = vector.broadcast %cst_394 : f32 to vector<16x1xf32>
    %518 = arith.divf %516, %517 : vector<16x1xf32>
    %519 = vector.broadcast %518 : vector<16x1xf32> to vector<16x32xf32>
    %520 = arith.subf %508, %519 : vector<16x32xf32>
    %521 = arith.mulf %520, %520 : vector<16x32xf32>
    %cst_395 = arith.constant dense<0.000000e+00> : vector<16xf32>
    %522 = vector.multi_reduction <add>, %521, %cst_395 [1] : vector<16x32xf32> to vector<16xf32>
    %523 = vector.shape_cast %522 : vector<16xf32> to vector<16x1xf32>
    %cst_396 = arith.constant 3.200000e+01 : f32
    %524 = vector.broadcast %cst_396 : f32 to vector<16x1xf32>
    %525 = arith.divf %523, %524 : vector<16x1xf32>
    %cst_397 = arith.constant 9.99999996E-13 : f32
    %526 = vector.broadcast %cst_397 : f32 to vector<16x1xf32>
    %527 = arith.addf %525, %526 : vector<16x1xf32>
    %528 = math.rsqrt %527 : vector<16x1xf32>
    %529 = vector.broadcast %528 : vector<16x1xf32> to vector<16x32xf32>
    %530 = arith.mulf %520, %529 : vector<16x32xf32>
    %531 = vector.broadcast %511 : vector<1x32xf32> to vector<16x32xf32>
    %532 = arith.mulf %530, %531 : vector<16x32xf32>
    %533 = vector.broadcast %514 : vector<1x32xf32> to vector<16x32xf32>
    %534 = arith.addf %532, %533 : vector<16x32xf32>
    %c160 = arith.constant 160 : index
    %c0_398 = arith.constant 0 : index
    %535 = vector.load %arg5[%c160, %c0_398] : memref<384x128xbf16, #tpu.memory_space<vmem>>, vector<32x128xbf16>
    %536 = arith.truncf %534 : vector<16x32xf32> to vector<16x32xbf16>
    %cst_399 = arith.constant dense<0.000000e+00> : vector<16x128xf32>
    %537 = tpu.matmul %536, %535, %cst_399 {dimension_numbers = #tpu.dot_dimension_numbers<[1], [0], [0], [1], [0, 0, 1, 1], [], []>} : vector<16x32xbf16>, vector<32x128xbf16>, vector<16x128xf32> -> vector<16x128xf32>
    %c12 = arith.constant 12 : index
    %c0_400 = arith.constant 0 : index
    %c0_401 = arith.constant 0 : index
    %538 = vector.load %arg6[%c12, %c0_400, %c0_401] : memref<18x1x128xbf16, #tpu.memory_space<vmem>>, vector<1x1x128xbf16>
    %539 = vector.shape_cast %538 : vector<1x1x128xbf16> to vector<1x128xbf16>
    %540 = arith.extf %539 : vector<1x128xbf16> to vector<1x128xf32>
    %541 = vector.broadcast %540 : vector<1x128xf32> to vector<16x128xf32>
    %542 = arith.addf %537, %541 : vector<16x128xf32>
    %cst_402 = arith.constant 5.000000e-01 : f32
    %543 = vector.broadcast %cst_402 : f32 to vector<16x128xf32>
    %544 = arith.mulf %543, %542 : vector<16x128xf32>
    %cst_403 = arith.constant 4.471500e-02 : f32
    %545 = vector.broadcast %cst_403 : f32 to vector<16x128xf32>
    %546 = arith.mulf %545, %542 : vector<16x128xf32>
    %547 = arith.mulf %546, %542 : vector<16x128xf32>
    %548 = arith.mulf %547, %542 : vector<16x128xf32>
    %549 = arith.addf %542, %548 : vector<16x128xf32>
    %cst_404 = arith.constant 0.797884583 : f32
    %550 = vector.broadcast %cst_404 : f32 to vector<16x128xf32>
    %551 = arith.mulf %550, %549 : vector<16x128xf32>
    %552 = math.tanh %551 : vector<16x128xf32>
    %cst_405 = arith.constant 1.000000e+00 : f32
    %553 = vector.broadcast %cst_405 : f32 to vector<16x128xf32>
    %554 = arith.addf %553, %552 : vector<16x128xf32>
    %555 = arith.mulf %544, %554 : vector<16x128xf32>
    %c192 = arith.constant 192 : index
    %c0_406 = arith.constant 0 : index
    %556 = vector.load %arg5[%c192, %c0_406] : memref<384x128xbf16, #tpu.memory_space<vmem>>, vector<128x32xbf16>
    %557 = arith.truncf %555 : vector<16x128xf32> to vector<16x128xbf16>
    %cst_407 = arith.constant dense<0.000000e+00> : vector<16x32xf32>
    %558 = tpu.matmul %557, %556, %cst_407 {dimension_numbers = #tpu.dot_dimension_numbers<[1], [0], [0], [1], [0, 0, 1, 1], [], []>} : vector<16x128xbf16>, vector<128x32xbf16>, vector<16x32xf32> -> vector<16x32xf32>
    %c13 = arith.constant 13 : index
    %c0_408 = arith.constant 0 : index
    %c0_409 = arith.constant 0 : index
    %559 = vector.load %arg6[%c13, %c0_408, %c0_409] : memref<18x1x128xbf16, #tpu.memory_space<vmem>>, vector<1x1x32xbf16>
    %560 = vector.shape_cast %559 : vector<1x1x32xbf16> to vector<1x32xbf16>
    %561 = arith.extf %560 : vector<1x32xbf16> to vector<1x32xf32>
    %562 = vector.broadcast %561 : vector<1x32xf32> to vector<16x32xf32>
    %563 = arith.addf %558, %562 : vector<16x32xf32>
    %564 = arith.addf %563, %534 : vector<16x32xf32>
    %c14 = arith.constant 14 : index
    %c0_410 = arith.constant 0 : index
    %c0_411 = arith.constant 0 : index
    %565 = vector.load %arg6[%c14, %c0_410, %c0_411] : memref<18x1x128xbf16, #tpu.memory_space<vmem>>, vector<1x1x32xbf16>
    %566 = vector.shape_cast %565 : vector<1x1x32xbf16> to vector<1x32xbf16>
    %567 = arith.extf %566 : vector<1x32xbf16> to vector<1x32xf32>
    %c15 = arith.constant 15 : index
    %c0_412 = arith.constant 0 : index
    %c0_413 = arith.constant 0 : index
    %568 = vector.load %arg6[%c15, %c0_412, %c0_413] : memref<18x1x128xbf16, #tpu.memory_space<vmem>>, vector<1x1x32xbf16>
    %569 = vector.shape_cast %568 : vector<1x1x32xbf16> to vector<1x32xbf16>
    %570 = arith.extf %569 : vector<1x32xbf16> to vector<1x32xf32>
    %cst_414 = arith.constant dense<0.000000e+00> : vector<16xf32>
    %571 = vector.multi_reduction <add>, %564, %cst_414 [1] : vector<16x32xf32> to vector<16xf32>
    %572 = vector.shape_cast %571 : vector<16xf32> to vector<16x1xf32>
    %cst_415 = arith.constant 3.200000e+01 : f32
    %573 = vector.broadcast %cst_415 : f32 to vector<16x1xf32>
    %574 = arith.divf %572, %573 : vector<16x1xf32>
    %575 = vector.broadcast %574 : vector<16x1xf32> to vector<16x32xf32>
    %576 = arith.subf %564, %575 : vector<16x32xf32>
    %577 = arith.mulf %576, %576 : vector<16x32xf32>
    %cst_416 = arith.constant dense<0.000000e+00> : vector<16xf32>
    %578 = vector.multi_reduction <add>, %577, %cst_416 [1] : vector<16x32xf32> to vector<16xf32>
    %579 = vector.shape_cast %578 : vector<16xf32> to vector<16x1xf32>
    %cst_417 = arith.constant 3.200000e+01 : f32
    %580 = vector.broadcast %cst_417 : f32 to vector<16x1xf32>
    %581 = arith.divf %579, %580 : vector<16x1xf32>
    %cst_418 = arith.constant 9.99999996E-13 : f32
    %582 = vector.broadcast %cst_418 : f32 to vector<16x1xf32>
    %583 = arith.addf %581, %582 : vector<16x1xf32>
    %584 = math.rsqrt %583 : vector<16x1xf32>
    %585 = vector.broadcast %584 : vector<16x1xf32> to vector<16x32xf32>
    %586 = arith.mulf %576, %585 : vector<16x32xf32>
    %587 = vector.broadcast %567 : vector<1x32xf32> to vector<16x32xf32>
    %588 = arith.mulf %586, %587 : vector<16x32xf32>
    %589 = vector.broadcast %570 : vector<1x32xf32> to vector<16x32xf32>
    %590 = arith.addf %588, %589 : vector<16x32xf32>
    %c352 = arith.constant 352 : index
    %c0_419 = arith.constant 0 : index
    %591 = vector.load %arg5[%c352, %c0_419] : memref<384x128xbf16, #tpu.memory_space<vmem>>, vector<32x32xbf16>
    %592 = arith.truncf %590 : vector<16x32xf32> to vector<16x32xbf16>
    %cst_420 = arith.constant dense<0.000000e+00> : vector<16x32xf32>
    %593 = tpu.matmul %592, %591, %cst_420 {dimension_numbers = #tpu.dot_dimension_numbers<[1], [0], [0], [1], [0, 0, 1, 1], [], []>} : vector<16x32xbf16>, vector<32x32xbf16>, vector<16x32xf32> -> vector<16x32xf32>
    %c16 = arith.constant 16 : index
    %c0_421 = arith.constant 0 : index
    %c0_422 = arith.constant 0 : index
    %594 = vector.load %arg6[%c16, %c0_421, %c0_422] : memref<18x1x128xbf16, #tpu.memory_space<vmem>>, vector<1x1x32xbf16>
    %595 = vector.shape_cast %594 : vector<1x1x32xbf16> to vector<1x32xbf16>
    %596 = arith.extf %595 : vector<1x32xbf16> to vector<1x32xf32>
    %597 = vector.broadcast %596 : vector<1x32xf32> to vector<16x32xf32>
    %598 = arith.addf %593, %597 : vector<16x32xf32>
    %cst_423 = arith.constant 0.000000e+00 : f32
    %599 = vector.broadcast %cst_423 : f32 to vector<16x32xf32>
    %600 = arith.maximumf %598, %599 : vector<16x32xf32>
    %c320 = arith.constant 320 : index
    %c0_424 = arith.constant 0 : index
    %601 = vector.load %arg5[%c320, %c0_424] : memref<384x128xbf16, #tpu.memory_space<vmem>>, vector<32x128xbf16>
    %602 = arith.truncf %600 : vector<16x32xf32> to vector<16x32xbf16>
    %cst_425 = arith.constant dense<0.000000e+00> : vector<16x128xf32>
    %603 = tpu.matmul %602, %601, %cst_425 {dimension_numbers = #tpu.dot_dimension_numbers<[1], [0], [0], [1], [0, 0, 1, 1], [], []>} : vector<16x32xbf16>, vector<32x128xbf16>, vector<16x128xf32> -> vector<16x128xf32>
    %c17 = arith.constant 17 : index
    %c0_426 = arith.constant 0 : index
    %c0_427 = arith.constant 0 : index
    %604 = vector.load %arg6[%c17, %c0_426, %c0_427] : memref<18x1x128xbf16, #tpu.memory_space<vmem>>, vector<1x1x128xbf16>
    %605 = vector.shape_cast %604 : vector<1x1x128xbf16> to vector<1x128xbf16>
    %606 = arith.extf %605 : vector<1x128xbf16> to vector<1x128xf32>
    %607 = vector.broadcast %606 : vector<1x128xf32> to vector<16x128xf32>
    %608 = arith.addf %603, %607 : vector<16x128xf32>
    %609 = arith.truncf %608 : vector<16x128xf32> to vector<16x128xbf16>
    %c0_428 = arith.constant 0 : index
    %c0_429 = arith.constant 0 : index
    %610 = vector.load %arg7[%c0_428, %c0_429] : memref<16x128xbf16, #tpu.memory_space<vmem>>, vector<16x128xbf16>
    tpu.vector_store %arg7[%c0_428, %c0_429], %609 {strides = array<i32>} : memref<16x128xbf16, #tpu.memory_space<vmem>>, vector<16x128xbf16>,
    return
  }
}

</mosaic_0001>

<bundles_post_ra>
// kernel: bert_module_bf16_forward.1
= control target key start
LH: loop header
LB: loop body
LE: loop exit
PB: predicated region body
PF: predicated region fallthrough
CT: control target
= control target key end

     0   :  { %vm58_vm0 = vcmask 261120   ;;  %v4764_v16 = vmov 0.0   ;;  %vm4765_vm1 = vmmov 0   ;;  %v27_v23 = vlaneseq  ;;  %s5684_s0 = inlined_call_operand.vmem [shape: bf16[16,32], index: 0, kind: input, shape index: {}]   ;;  %s5685_s2 = inlined_call_operand.vmem [shape: bf16[2,3,4,32,8], index: 2, kind: input, shape index: {}]   ;;  %s5686_s6 = inlined_call_operand.vmem [shape: bf16[18,1,128], index: 6, kind: input, shape index: {}]   ;;  %s5687_s3 = inlined_call_operand.vmem [shape: bf16[2,3,4,1,8], index: 3, kind: input, shape index: {}]   ;;  %s5688_s1 = inlined_call_operand.vmem [shape: f32[1,16], index: 1, kind: input, shape index: {}]   ;;  %s5689_s4 = inlined_call_operand.vmem [shape: bf16[2,4,8,32], index: 4, kind: input, shape index: {}]   ;;  %s5690_s5 = inlined_call_operand.vmem [shape: bf16[384,128], index: 5, kind: input, shape index: {}]   ;;  %s5691_s7 = inlined_call_operand.vmem [shape: bf16[16,128], index: 7, kind: output, shape index: {}]  }
   0x1   :  { %v4030_v0 = vld [vmem:[%s5684_s0] sm:$0xff]   ;;  %4188 = vmatprep.subr.bf16.mxu1 %v4764_v16  ;;  %4204 = vmatprep.subr.bf16.mxu0 %v4764_v16  ;;  %v4602_v18 = vld [vmem:[%s5685_s2 + $0x8] sm:$0xff]   ;;  %vm298_vm2 = vcmask 64512   ;;  %vm346_vm9 = vcmask 130048   ;;  %vm734_vm10 = vcmask 1043456  }
   0x2   :  { %v4031_v1 = vunpack.c.l.bf16 %v4030_v0  ;;  %v4032_v2 = vunpack.c.h.bf16 %v4030_v0  ;;  %v4600_v15 = vld [vmem:[%s5685_s2] sm:$0xff]   ;;  %v4603_v19 = vld [vmem:[%s5685_s2 + $0x88] sm:$0xff]   ;;  %4192 = vmatprep.mubr.msk.bf16.mxu1 %vm4765_vm1, %v4764_v16  ;;  %4208 = vmatprep.mubr.msk.bf16.mxu0 %vm4765_vm1, %v4764_v16  ;;  %v4838_v27 = vshrl.u32 %v27_v23, 7 }
   0x3   :  { %v4601_v17 = vld [vmem:[%s5685_s2 + $0x80] sm:$0xff]   ;;  %4189 = vmatpush3.bf16.msra.mxu1 %v4600_v15  ;;  %v4605_v45 = vld [vmem:[%s5685_s2 + $0x48] sm:$0xff]   ;;  %v4608_v15 = vld [vmem:[%s5685_s2 + $0x90] sm:$0xff]  }
   0x4   :  { %v59_v3 = vsel %vm58_vm0, %v4031_v1, 0.0  ;;  %v62_v4 = vsel %vm58_vm0, %v4032_v2, 0.0  ;;  %4205 = vmatpush3.bf16.msra.mxu0 %v4601_v17  ;;  %4190 = vmatprep.subr.bf16.mxu1 %v4764_v16  ;;  %v53_v28 = vld [vmem:[%s5686_s6] sm:$0x1]  ;;  %v4844_v29 = vsub.s32 0, %v4838_v27  ;;  %v4609_v17 = vld [vmem:[%s5685_s2 + $0x98] sm:$0xff]  }
   0x5   :  { %60 = vadd.xlane.f32.xlu0 %v59_v3  ;;  %4206 = vmatprep.subr.bf16.mxu0 %v4764_v16  ;;  %v54_v30 = vunpack.c.l.bf16 %v53_v28  ;;  %v3762_v31 = vld [vmem:[%s5686_s6 + $0x1] sm:$0x1]  ;;  %v103_v46 = vld [vmem:[%s5687_s3] sm:$0x1]  ;;  %v3778_v47 = vld [vmem:[%s5687_s3 + $0x8] sm:$0x1] }
   0x6   :  { %v57_v33 = vunpack.c.l.bf16 %v3762_v31  ;;  %v4604_v43 = vld [vmem:[%s5685_s2 + $0x40] sm:$0xff]   ;;  %v104_v48 = vunpack.c.l.bf16 %v103_v46  ;;  %v239_v49 = vunpack.c.l.bf16 %v3778_v47  ;;  %v3804_v46 = vld [vmem:[%s5687_s3 + $0x9] sm:$0x1] }
   0x7   :  { %4191 = vmatpush3.bf16.msra.mxu1 %v4602_v18  ;;  %v89_v34 = vrot.slane %v54_v30, %v4844_v29  ;;  %v3770_v52 = vld [vmem:[%s5687_s3 + $0x4] sm:$0x1]  ;;  %v35_v18 = vld [vmem:[%s5688_s1] sm:$0x1]  ;;  %v4767_v30 = vmov -1e+09  }
   0x8   :  { %4207 = vmatpush3.bf16.msra.mxu0 %v4603_v19  ;;  %4196 = vmatprep.subr.bf16.mxu1 %v4764_v16  ;;  %v95_v37 = vrot.slane %v57_v33, %v4844_v29  ;;  %v108_v50 = vrot.slane %v104_v48, %v4844_v29  ;;  %v243_v51 = vrot.slane %v239_v49, %v4844_v29  ;;  %v173_v59 = vunpack.c.l.bf16 %v3770_v52 }
   0x9   :  { %63 = vadd.xlane.f32.xlu0 %v62_v4  ;;  %4218 = vmatprep.subr.bf16.mxu0 %v4764_v16  ;;  %vm36_vm3 = vcmp.gt.f32.partialorder %v35_v18, 0.5  ;;  %v33_v19 = vand.u32 127, %v27_v23  ;;  %v555_v52 = vunpack.c.l.bf16 %v3804_v46 }
   0xa   :  { %v177_v4 = vrot.slane %v173_v59, %v4844_v29 }
  0x92   :  { %v61_v5 = vpop.xlane.xlu0 %60 }
  0x93   :  { %v66_v6 = vmul.f32 0.03125, %v61_v5 }
  0x95   :  { %v68_v7 = vsub.f32 %v4031_v1, %v66_v6 }
  0x96   :  { %v64_v8 = vpop.xlane.xlu0 %63 }
  0x97   :  { %v67_v9 = vmul.f32 0.03125, %v64_v8  ;;  %v70_v10 = vmul.f32 %v68_v7, %v68_v7 }
  0x99   :  { %v69_v11 = vsub.f32 %v4032_v2, %v67_v9  ;;  %v72_v12 = vsel %vm58_vm0, %v70_v10, 0.0 }
  0x9a   :  { %73 = vadd.xlane.f32.xlu1 %v72_v12 }
  0x9b   :  { %v71_v13 = vmul.f32 %v69_v11, %v69_v11 }
  0x9d   :  { %v75_v14 = vsel %vm58_vm0, %v71_v13, 0.0  ;;  %v4606_v13 = vld [vmem:[%s5685_s2 + $0x10] sm:$0xff]  }
  0x9e   :  { %76 = vadd.xlane.f32.xlu1 %v75_v14  ;;  %v4607_v14 = vld [vmem:[%s5685_s2 + $0x18] sm:$0xff]  }
 0x127   :  { %v74_v20 = vpop.xlane.xlu1 %73 }
 0x128   :  { %v78_v21 = vmul.f32 0.03125, %v74_v20  ;;  %v4766_v20 = vmov 0  }
 0x12a   :  { %v80_v22 = vadd.f32 1e-12, %v78_v21  ;;  %v39_v21 = vsel %vm36_vm3, 1, %v4766_v20 }
 0x12b   :  { %v77_v24 = vpop.xlane.xlu1 %76 }
 0x12c   :  { %4672 = vrsqrt.f32 %v80_v22  ;;  %v79_v25 = vmul.f32 0.03125, %v77_v24  ;;  %v29_v22 = vadd.s32 8, %v4838_v27  ;;  %v30_v24 = vshra.s32 %v4838_v27, 3  ;;  %v3788_v27 = vld [vmem:[%s5687_s3 + $0x1] sm:$0x1] }
 0x12e   :  { %v81_v26 = vadd.f32 1e-12, %v79_v25  ;;  %v34_v25 = vshra.s32 %v33_v19, 3  ;;  %v31_v28 = vshra.s32 %v29_v22, 3  ;;  %v3796_v19 = vld [vmem:[%s5687_s3 + $0x5] sm:$0x1] }
 0x130   :  { %4674 = vrsqrt.f32 %v81_v26  ;;  %v43_v26 = vrot.slane %v39_v21, %v4844_v29  ;;  %vm37_vm4 = vcmp.eq.s32.totalorder %v30_v24, %v34_v25  ;;  %vm38_vm6 = vcmp.eq.s32.totalorder %v31_v28, %v34_v25 }
 0x131   :  { %v489_v25 = vunpack.c.l.bf16 %v3796_v19  ;;  %v4616_v19 = vld [vmem:[%s5685_s2 + $0xa0] sm:$0xff]  }
 0x132   :  { %vm44_vm5 = vcmp.eq.s32.totalorder %v43_v26, 1 }
 0x133   :  { %vm45_vm7 = vmand %vm37_vm4, %vm44_vm5  ;;  %v493_v26 = vrot.slane %v489_v25, %v4844_v29 }
 0x134   :  { %vm46_vm8 = vmand %vm38_vm6, %vm44_vm5  ;;  %v4928_v31 = vsel %vm45_vm7, 0.0, %v4767_v30 }
 0x135   :  { %v4930_v23 = vsel %vm46_vm8, 0.0, %v4767_v30 }
 0x136   :  { %v4673_v32 = vpop.eup %4672 }
 0x137   :  { %v84_v35 = vmul.f32 %v4673_v32, %v68_v7 }
 0x139   :  { %v90_v38 = vmul.f32 %v89_v34, %v84_v35 }
 0x13a   :  { %v4675_v36 = vpop.eup %4674 }
 0x13b   :  { %v85_v39 = vmul.f32 %v4675_v36, %v69_v11  ;;  %v4851_v41 = vadd.f32 %v95_v37, %v90_v38 }
 0x13d   :  { %v91_v40 = vmul.f32 %v89_v34, %v85_v39  ;;  %v423_v39 = vunpack.c.l.bf16 %v3788_v27 }
 0x13f   :  { %v4853_v42 = vadd.f32 %v95_v37, %v91_v40 }
 0x141   :  { %v4860_v44 = vpack.c.bf16 %v4853_v42, %v4851_v41 }
 0x143   :  { %4193 = vmatmul.mubr.msk.bf16.vlgmr.msra.gmra.mrb[0].mxu1 %vm58_vm0, %v4860_v44  ;;  %4209 = vmatmul.mubr.msk.bf16.vlgmr.msra.gmra.mrb[0].mxu0 %vm58_vm0, %v4860_v44 }
 0x144   :  { %4197 = vmatpush3.bf16.msra.mxu1 %v4604_v43  ;;  %4200 = vmatprep.mubr.msk.bf16.mxu1 %vm4765_vm1, %v4764_v16  ;;  %v427_v43 = vrot.slane %v423_v39, %v4844_v29 }
 0x145   :  { %4198 = vmatprep.subr.bf16.mxu1 %v4764_v16  ;;  %4220 = vmatprep.mubr.msk.bf16.mxu0 %vm4765_vm1, %v4764_v16 }
 0x148   :  { %4199 = vmatpush3.bf16.msra.mxu1 %v4605_v45 }
 0x149   :  { %4212 = vmatprep.subr.bf16.mxu1 %v4764_v16 }
 0x14b   :  { %4201 = vmatmul.mubr.msk.bf16.vlgmr.msra.gmra.mrb[4].mxu1 %vm58_vm0, %v4860_v44 }
 0x14c   :  { %4214 = vmatprep.mubr.msk.bf16.mxu1 %vm4765_vm1, %v4764_v16 }
 0x216   :  { %v158_v53 = vpop.f32.mrb[0].mxu1  ;;  %v290_v54 = vpop.f32.mrb[0].mxu0 }
 0x217   :  { %v4194_v55 = vpop.f32.mrb[1].mxu1  ;;  %v4210_v56 = vpop.f32.mrb[1].mxu0  ;;  %v159_v60 = vadd.f32 %v158_v53, %v108_v50  ;;  %v291_v61 = vadd.f32 %v290_v54, %v243_v51  ;;  %v559_v54 = vrot.slane %v555_v52, %v4844_v29 }
 0x218   :  { %v161_v57 = vpop.f32.mrb[2].mxu1  ;;  %v293_v58 = vpop.f32.mrb[2].mxu0 }
 0x219   :  { %v162_v62 = vadd.f32 %v161_v57, %v108_v50  ;;  %v294_v63 = vadd.f32 %v293_v58, %v243_v51  ;;  %v4195_v0 = vpop.f32.mrb[3].mxu1  ;;  %v4211_v1 = vpop.f32.mrb[3].mxu0 }
 0x21b   :  { %v165_v2 = vpack.c.bf16 %v162_v62, %v159_v60  ;;  %v297_v3 = vpack.c.bf16 %v294_v63, %v291_v61 }
 0x21d   :  { %4219 = vmatpush3.bf16.msra.mxu0 %v297_v3 }
 0x21e   :  { %v224_v5 = vpop.f32.mrb[4].mxu1  ;;  %4232 = vmatprep.subr.bf16.mxu0 %v4764_v16 }
 0x21f   :  { %v4202_v6 = vpop.f32.mrb[5].mxu1  ;;  %v225_v8 = vadd.f32 %v224_v5, %v177_v4 }
 0x220   :  { %v227_v7 = vpop.f32.mrb[6].mxu1 }
 0x221   :  { %v228_v9 = vadd.f32 %v227_v7, %v177_v4  ;;  %v4203_v10 = vpop.f32.mrb[7].mxu1 }
 0x223   :  { %v231_v11 = vpack.c.bf16 %v228_v9, %v225_v8 }
 0x225   :  { %v303_v12 = vsel %vm298_vm2, %v231_v11, 0 }
 0x226   :  { %4213 = vmatpush3.bf16.xpose.msra.mxu1 %v303_v12 }
 0x227   :  { %4224 = vmatprep.subr.bf16.mxu1 %v4764_v16 }
 0x22d   :  { %4215 = vmatmul.mubr.msk.bf16.vlgmr.msra.gmra.mrb[8].mxu1 %vm298_vm2, %v165_v2 }
 0x22e   :  { %4225 = vmatpush3.bf16.msra.mxu1 %v4606_v13  ;;  %4228 = vmatprep.mubr.msk.bf16.mxu1 %vm4765_vm1, %v4764_v16 }
 0x22f   :  { %4226 = vmatprep.subr.bf16.mxu1 %v4764_v16 }
 0x232   :  { %4227 = vmatpush3.bf16.msra.mxu1 %v4607_v14  ;;  %v4610_v14 = vld [vmem:[%s5685_s2 + $0x50] sm:$0xff]  }
 0x233   :  { %4240 = vmatprep.subr.bf16.mxu1 %v4764_v16 }
 0x235   :  { %4229 = vmatmul.mubr.msk.bf16.vlgmr.msra.gmra.mrb[12].mxu1 %vm58_vm0, %v4860_v44 }
 0x236   :  { %4241 = vmatpush3.bf16.msra.mxu1 %v4608_v15  ;;  %4244 = vmatprep.mubr.msk.bf16.mxu1 %vm4765_vm1, %v4764_v16 }
 0x237   :  { %4242 = vmatprep.subr.bf16.mxu1 %v4764_v16 }
 0x23a   :  { %4243 = vmatpush3.bf16.msra.mxu1 %v4609_v17  ;;  %v4611_v17 = vld [vmem:[%s5685_s2 + $0x58] sm:$0xff]  }
 0x23b   :  { %4254 = vmatprep.subr.bf16.mxu1 %v4764_v16 }
 0x23d   :  { %4245 = vmatmul.mubr.msk.bf16.vlgmr.msra.gmra.mrb[16].mxu1 %vm58_vm0, %v4860_v44 }
 0x23e   :  { %4256 = vmatprep.mubr.msk.bf16.mxu1 %vm4765_vm1, %v4764_v16 }
 0x300   :  { %v339_v32 = vpop.f32.mrb[8].mxu1 }
 0x301   :  { %v340_v33 = vadd.f32 %v339_v32, %v4928_v31  ;;  %v4216_v34 = vpop.f32.mrb[9].mxu1 }
 0x302   :  { %v342_v35 = vpop.f32.mrb[10].mxu1 }
 0x303   :  { %v343_v36 = vadd.f32 %v342_v35, %v4930_v23  ;;  %v4217_v37 = vpop.f32.mrb[11].mxu1  ;;  %v347_v38 = vsel %vm346_vm9, %v340_v33, -inf }
 0x304   :  { %348 = vmax.xlane.f32.xlu0 %v347_v38 }
 0x305   :  { %v350_v40 = vsel %vm346_vm9, %v343_v36, -inf }
 0x306   :  { %351 = vmax.xlane.f32.xlu1 %v350_v40 }
 0x308   :  { %v474_v45 = vpop.f32.mrb[12].mxu1 }
 0x309   :  { %v4230_v47 = vpop.f32.mrb[13].mxu1  ;;  %v4943_v49 = vadd.f32 %v474_v45, %v427_v43 }
 0x30a   :  { %v477_v48 = vpop.f32.mrb[14].mxu1 }
 0x30b   :  { %v4945_v50 = vadd.f32 %v477_v48, %v427_v43  ;;  %v4231_v51 = vpop.f32.mrb[15].mxu1 }
 0x30d   :  { %v481_v53 = vpack.c.bf16 %v4945_v50, %v4943_v49 }
 0x310   :  { %v606_v55 = vpop.f32.mrb[16].mxu1 }
 0x311   :  { %v4246_v56 = vpop.f32.mrb[17].mxu1  ;;  %v607_v58 = vadd.f32 %v606_v55, %v559_v54 }
 0x312   :  { %v609_v57 = vpop.f32.mrb[18].mxu1 }
 0x313   :  { %v610_v59 = vadd.f32 %v609_v57, %v559_v54  ;;  %v4247_v60 = vpop.f32.mrb[19].mxu1 }
 0x315   :  { %v613_v61 = vpack.c.bf16 %v610_v59, %v607_v58  ;;  %v3810_v58 = vld [vmem:[%s5689_s4 + $0x4] sm:$0xf] }
 0x316   :  { %v736_v59 = vsel %vm734_vm10, %v3810_v58, 0 }
 0x317   :  { %4255 = vmatpush3.bf16.msra.mxu1 %v613_v61 }
 0x318   :  { %4266 = vmatprep.subr.bf16.mxu1 %v4764_v16 }
 0x391   :  { %v349_v62 = vpop.xlane.xlu0 %348 }
 0x392   :  { %v353_v63 = vsub.f32 %v340_v33, %v349_v62 }
 0x393   :  { %v352_v0 = vpop.xlane.xlu1 %351 }
 0x394   :  { %v355_v1 = vmul.f32 1.442695, %v353_v63  ;;  %v354_v2 = vsub.f32 %v343_v36, %v352_v0  ;;  %v415_v0 = vld [vmem:[%s5689_s4] sm:$0xf] }
 0x396   :  { %4676 = vpow2.f32 %v355_v1  ;;  %v357_v3 = vmul.f32 1.442695, %v354_v2 }
 0x398   :  { %4678 = vpow2.f32 %v357_v3 }
 0x3a0   :  { %v4677_v4 = vpop.eup %4676 }
 0x3a1   :  { %v359_v5 = vsel %vm346_vm9, %v4677_v4, 0.0 }
 0x3a2   :  { %v4679_v6 = vpop.eup %4678  ;;  %360 = vadd.xlane.f32.xlu0 %v359_v5  ;;  %v4612_v5 = vld [vmem:[%s5685_s2 + $0x60] sm:$0xff]  }
 0x3a3   :  { %v362_v7 = vsel %vm346_vm9, %v4679_v6, 0.0 }
 0x3a4   :  { %363 = vadd.xlane.f32.xlu1 %v362_v7 }
 0x42f   :  { %v361_v8 = vpop.xlane.xlu0 %360 }
 0x430   :  { %4680 = vrcp.f32 %v361_v8 }
 0x431   :  { %v364_v9 = vpop.xlane.xlu1 %363 }
 0x432   :  { %4682 = vrcp.f32 %v364_v9 }
 0x43a   :  { %v4681_v10 = vpop.eup %4680 }
 0x43b   :  { %v367_v12 = vmul.f32 %v4681_v10, %v4677_v4  ;;  %v783_v4 = vsel %vm734_vm10, %v415_v0, 0  ;;  %v4614_v10 = vld [vmem:[%s5685_s2 + $0x20] sm:$0xff]  }
 0x43c   :  { %v4683_v11 = vpop.eup %4682 }
 0x43d   :  { %v368_v13 = vmul.f32 %v4683_v11, %v4679_v6  ;;  %v4613_v6 = vld [vmem:[%s5685_s2 + $0x68] sm:$0xff]  }
 0x43f   :  { %v369_v15 = vpack.c.bf16 %v368_v13, %v367_v12  ;;  %v4615_v13 = vld [vmem:[%s5685_s2 + $0x28] sm:$0xff]  }
 0x441   :  { %4221 = vmatmul.mubr.msk.bf16.vlgmr.msra.gmra.mrb[4].mxu0 %vm346_vm9, %v369_v15  ;;  %v3825_v15 = vld [vmem:[%s5687_s3 + $0x6] sm:$0x1] }
 0x442   :  { %4233 = vmatpush3.bf16.msra.mxu0 %v4610_v14  ;;  %4236 = vmatprep.mubr.msk.bf16.mxu0 %vm4765_vm1, %v4764_v16 }
 0x443   :  { %4234 = vmatprep.subr.bf16.mxu0 %v4764_v16 }
 0x446   :  { %4235 = vmatpush3.bf16.msra.mxu0 %v4611_v17 }
 0x447   :  { %4248 = vmatprep.subr.bf16.mxu0 %v4764_v16 }
 0x449   :  { %4237 = vmatmul.mubr.msk.bf16.vlgmr.msra.gmra.mrb[8].mxu0 %vm58_vm0, %v4860_v44 }
 0x44a   :  { %4250 = vmatprep.mubr.msk.bf16.mxu0 %vm4765_vm1, %v4764_v16 }
 0x514   :  { %v4968_v18 = vpop.f32.mrb[4].mxu0 }
 0x515   :  { %v4222_v20 = vpop.f32.mrb[5].mxu0 }
 0x516   :  { %v4973_v21 = vpop.f32.mrb[6].mxu0 }
 0x517   :  { %v414_v22 = vpack.c.bf16 %v4973_v21, %v4968_v18  ;;  %v4223_v24 = vpop.f32.mrb[7].mxu0  ;;  %v899_v21 = vunpack.c.l.bf16 %v3825_v15 }
 0x519   :  { %v903_v24 = vrot.slane %v899_v21, %v4844_v29 }
 0x51c   :  { %v540_v28 = vpop.f32.mrb[8].mxu0 }
 0x51d   :  { %v4238_v30 = vpop.f32.mrb[9].mxu0  ;;  %v541_v27 = vadd.f32 %v540_v28, %v493_v26 }
 0x51e   :  { %v543_v32 = vpop.f32.mrb[10].mxu0 }
 0x51f   :  { %v544_v33 = vadd.f32 %v543_v32, %v493_v26  ;;  %v4239_v34 = vpop.f32.mrb[11].mxu0 }
 0x521   :  { %v547_v35 = vpack.c.bf16 %v544_v33, %v541_v27 }
 0x523   :  { %v618_v36 = vsel %vm298_vm2, %v547_v35, 0 }
 0x524   :  { %4249 = vmatpush3.bf16.xpose.msra.mxu0 %v618_v36  ;;  %v3817_v36 = vld [vmem:[%s5687_s3 + $0x2] sm:$0x1] }
 0x525   :  { %4260 = vmatprep.subr.bf16.mxu0 %v4764_v16 }
 0x52b   :  { %4251 = vmatmul.mubr.msk.bf16.vlgmr.msra.gmra.mrb[12].mxu0 %vm298_vm2, %v481_v53 }
 0x52c   :  { %4262 = vmatprep.mubr.msk.bf16.mxu0 %vm4765_vm1, %v4764_v16  ;;  %4261 = vmatpush3.bf16.msra.mxu0 %v736_v59 }
 0x52d   :  { %4272 = vmatprep.subr.bf16.mxu0 %v4764_v16 }
 0x5fe   :  { %v654_v37 = vpop.f32.mrb[12].mxu0 }
 0x5ff   :  { %v655_v38 = vadd.f32 %v654_v37, %v4928_v31  ;;  %v4252_v39 = vpop.f32.mrb[13].mxu0 }
 0x600   :  { %v657_v40 = vpop.f32.mrb[14].mxu0 }
 0x601   :  { %v658_v43 = vadd.f32 %v657_v40, %v4930_v23  ;;  %v4253_v45 = vpop.f32.mrb[15].mxu0  ;;  %v661_v46 = vsel %vm346_vm9, %v655_v38, -inf }
 0x602   :  { %662 = vmax.xlane.f32.xlu0 %v661_v46  ;;  %v833_v45 = vunpack.c.l.bf16 %v3817_v36  ;;  %v3845_v36 = vld [vmem:[%s5687_s3 + $0x3] sm:$0x1] }
 0x603   :  { %v664_v47 = vsel %vm346_vm9, %v658_v43, -inf }
 0x604   :  { %665 = vmax.xlane.f32.xlu1 %v664_v47  ;;  %v837_v46 = vrot.slane %v833_v45, %v4844_v29 }
 0x68f   :  { %v663_v48 = vpop.xlane.xlu0 %662 }
 0x690   :  { %v667_v49 = vsub.f32 %v655_v38, %v663_v48  ;;  %v3833_v48 = vld [vmem:[%s5687_s3 + $0xa] sm:$0x1] }
 0x691   :  { %v666_v50 = vpop.xlane.xlu1 %665 }
 0x692   :  { %v669_v51 = vmul.f32 1.442695, %v667_v49  ;;  %v668_v52 = vsub.f32 %v658_v43, %v666_v50 }
 0x694   :  { %4684 = vpow2.f32 %v669_v51  ;;  %v671_v53 = vmul.f32 1.442695, %v668_v52 }
 0x696   :  { %4686 = vpow2.f32 %v671_v53 }
 0x69e   :  { %v4685_v54 = vpop.eup %4684 }
 0x69f   :  { %v673_v55 = vsel %vm346_vm9, %v4685_v54, 0.0 }
 0x6a0   :  { %v4687_v56 = vpop.eup %4686  ;;  %674 = vadd.xlane.f32.xlu0 %v673_v55 }
 0x6a1   :  { %v676_v57 = vsel %vm346_vm9, %v4687_v56, 0.0 }
 0x6a2   :  { %677 = vadd.xlane.f32.xlu1 %v676_v57 }
 0x72d   :  { %v675_v60 = vpop.xlane.xlu0 %674 }
 0x72e   :  { %4688 = vrcp.f32 %v675_v60 }
 0x72f   :  { %v678_v61 = vpop.xlane.xlu1 %677 }
 0x730   :  { %4690 = vrcp.f32 %v678_v61 }
 0x738   :  { %v4689_v62 = vpop.eup %4688 }
 0x739   :  { %v681_v1 = vmul.f32 %v4689_v62, %v4685_v54  ;;  %v965_v54 = vunpack.c.l.bf16 %v3833_v48  ;;  %v4623_v48 = vld [vmem:[%s5685_s2 + $0x78] sm:$0xff]  }
 0x73a   :  { %v4691_v63 = vpop.eup %4690 }
 0x73b   :  { %v682_v2 = vmul.f32 %v4691_v63, %v4687_v56  ;;  %v969_v56 = vrot.slane %v965_v54, %v4844_v29 }
 0x73d   :  { %v683_v3 = vpack.c.bf16 %v682_v2, %v681_v1 }
 0x73f   :  { %4257 = vmatmul.mubr.msk.bf16.vlgmr.msra.gmra.mrb[20].mxu1 %vm346_vm9, %v683_v3 }
 0x740   :  { %4267 = vmatpush3.bf16.msra.mxu1 %v783_v4  ;;  %4268 = vmatprep.mubr.msk.bf16.mxu1 %vm4765_vm1, %v4764_v16 }
 0x741   :  { %4280 = vmatprep.subr.bf16.mxu1 %v4764_v16 }
 0x747   :  { %4269 = vmatmul.mubr.msk.bf16.vlgmr.msra.gmra.mrb[24].mxu1 %vm298_vm2, %v414_v22  ;;  %v4617_v22 = vld [vmem:[%s5685_s2 + $0xa8] sm:$0xff]  }
 0x748   :  { %4281 = vmatpush3.bf16.msra.mxu1 %v4612_v5  ;;  %4284 = vmatprep.mubr.msk.bf16.mxu1 %vm4765_vm1, %v4764_v16 }
 0x749   :  { %4282 = vmatprep.subr.bf16.mxu1 %v4764_v16 }
 0x74c   :  { %4283 = vmatpush3.bf16.msra.mxu1 %v4613_v6 }
 0x74d   :  { %4296 = vmatprep.subr.bf16.mxu1 %v4764_v16 }
 0x74f   :  { %4285 = vmatmul.mubr.msk.bf16.vlgmr.msra.gmra.mrb[28].mxu1 %vm58_vm0, %v4860_v44 }
 0x750   :  { %4298 = vmatprep.mubr.msk.bf16.mxu1 %vm4765_vm1, %v4764_v16 }
 0x812   :  { %v721_v7 = vpop.f32.mrb[20].mxu1 }
 0x813   :  { %v4258_v8 = vpop.f32.mrb[21].mxu1 }
 0x814   :  { %v724_v9 = vpop.f32.mrb[22].mxu1 }
 0x815   :  { %v728_v11 = vpack.c.bf16 %v724_v9, %v721_v7  ;;  %v4259_v12 = vpop.f32.mrb[23].mxu1 }
 0x817   :  { %4263 = vmatmul.mubr.msk.bf16.vlgmr.msra.gmra.mrb[16].mxu0 %vm298_vm2, %v728_v11 }
 0x818   :  { %4273 = vmatpush3.bf16.msra.mxu0 %v4614_v10  ;;  %4276 = vmatprep.mubr.msk.bf16.mxu0 %vm4765_vm1, %v4764_v16 }
 0x819   :  { %4274 = vmatprep.subr.bf16.mxu0 %v4764_v16 }
 0x81a   :  { %v819_v14 = vpop.f32.mrb[24].mxu1 }
 0x81b   :  { %v4270_v17 = vpop.f32.mrb[25].mxu1 }
 0x81c   :  { %v822_v18 = vpop.f32.mrb[26].mxu1  ;;  %4275 = vmatpush3.bf16.msra.mxu0 %v4615_v13 }
 0x81d   :  { %v4271_v20 = vpop.f32.mrb[27].mxu1  ;;  %4288 = vmatprep.subr.bf16.mxu0 %v4764_v16 }
 0x81f   :  { %4277 = vmatmul.mubr.msk.bf16.vlgmr.msra.gmra.mrb[20].mxu0 %vm58_vm0, %v4860_v44 }
 0x820   :  { %4289 = vmatpush3.bf16.msra.mxu0 %v4616_v19  ;;  %4292 = vmatprep.mubr.msk.bf16.mxu0 %vm4765_vm1, %v4764_v16  ;;  %v3839_v19 = vld [vmem:[%s5689_s4 + $0x8] sm:$0xf] }
 0x821   :  { %4290 = vmatprep.subr.bf16.mxu0 %v4764_v16  ;;  %v1145_v20 = vsel %vm734_vm10, %v3839_v19, 0 }
 0x822   :  { %v950_v25 = vpop.f32.mrb[28].mxu1 }
 0x823   :  { %v4286_v26 = vpop.f32.mrb[29].mxu1  ;;  %v951_v30 = vadd.f32 %v950_v25, %v903_v24 }
 0x824   :  { %v953_v28 = vpop.f32.mrb[30].mxu1  ;;  %4291 = vmatpush3.bf16.msra.mxu0 %v4617_v22 }
 0x825   :  { %v954_v32 = vadd.f32 %v953_v28, %v903_v24  ;;  %v4287_v27 = vpop.f32.mrb[31].mxu1  ;;  %4302 = vmatprep.subr.bf16.mxu0 %v4764_v16 }
 0x826   :  { %v4619_v27 = vld [vmem:[%s5685_s2 + $0x38] sm:$0xff]  }
 0x827   :  { %v957_v33 = vpack.c.bf16 %v954_v32, %v951_v30  ;;  %4293 = vmatmul.mubr.msk.bf16.vlgmr.msra.gmra.mrb[24].mxu0 %vm58_vm0, %v4860_v44  ;;  %v4618_v30 = vld [vmem:[%s5685_s2 + $0x30] sm:$0xff]  }
 0x828   :  { %4304 = vmatprep.mubr.msk.bf16.mxu0 %vm4765_vm1, %v4764_v16 }
 0x829   :  { %v1028_v34 = vsel %vm298_vm2, %v957_v33, 0  ;;  %v4620_v33 = vld [vmem:[%s5685_s2 + $0xb0] sm:$0xff]  }
 0x82a   :  { %4297 = vmatpush3.bf16.xpose.msra.mxu1 %v1028_v34  ;;  %v4621_v34 = vld [vmem:[%s5685_s2 + $0xb8] sm:$0xff]  }
 0x82b   :  { %4308 = vmatprep.subr.bf16.mxu1 %v4764_v16 }
 0x8ea   :  { %v772_v35 = vpop.f32.mrb[16].mxu0 }
 0x8eb   :  { %v5053_v37 = vadd.f32 %v819_v14, %v772_v35  ;;  %v4264_v38 = vpop.f32.mrb[17].mxu0 }
 0x8ec   :  { %v775_v39 = vpop.f32.mrb[18].mxu0 }
 0x8ed   :  { %v5055_v40 = vadd.f32 %v822_v18, %v775_v39  ;;  %v4265_v43 = vpop.f32.mrb[19].mxu0 }
 0x8ee   :  { %v4622_v43 = vld [vmem:[%s5685_s2 + $0x70] sm:$0xff]  }
 0x8f2   :  { %v884_v47 = vpop.f32.mrb[20].mxu0 }
 0x8f3   :  { %v4278_v49 = vpop.f32.mrb[21].mxu0  ;;  %v885_v51 = vadd.f32 %v884_v47, %v837_v46  ;;  %v1197_v47 = vunpack.c.l.bf16 %v3845_v36 }
 0x8f4   :  { %v887_v50 = vpop.f32.mrb[22].mxu0 }
 0x8f5   :  { %v888_v52 = vadd.f32 %v887_v50, %v837_v46  ;;  %v4279_v53 = vpop.f32.mrb[23].mxu0  ;;  %v1201_v49 = vrot.slane %v1197_v47, %v4844_v29 }
 0x8f7   :  { %v891_v55 = vpack.c.bf16 %v888_v52, %v885_v51  ;;  %v3861_v51 = vld [vmem:[%s5687_s3 + $0xb] sm:$0x1] }
 0x8f9   :  { %4299 = vmatmul.mubr.msk.bf16.vlgmr.msra.gmra.mrb[32].mxu1 %vm298_vm2, %v891_v55 }
 0x8fa   :  { %v1016_v57 = vpop.f32.mrb[24].mxu0  ;;  %4310 = vmatprep.mubr.msk.bf16.mxu1 %vm4765_vm1, %v4764_v16  ;;  %4309 = vmatpush3.bf16.msra.mxu1 %v1145_v20 }
 0x8fb   :  { %v4294_v58 = vpop.f32.mrb[25].mxu0  ;;  %v1017_v60 = vadd.f32 %v1016_v57, %v969_v56  ;;  %4322 = vmatprep.subr.bf16.mxu1 %v4764_v16  ;;  %v1329_v57 = vunpack.c.l.bf16 %v3861_v51 }
 0x8fc   :  { %v1019_v59 = vpop.f32.mrb[26].mxu0 }
 0x8fd   :  { %v1020_v61 = vadd.f32 %v1019_v59, %v969_v56  ;;  %v4295_v62 = vpop.f32.mrb[27].mxu0  ;;  %v1333_v59 = vrot.slane %v1329_v57, %v4844_v29 }
 0x8ff   :  { %v1023_v63 = vpack.c.bf16 %v1020_v61, %v1017_v60 }
 0x901   :  { %4303 = vmatpush3.bf16.msra.mxu0 %v1023_v63 }
 0x902   :  { %4314 = vmatprep.subr.bf16.mxu0 %v4764_v16 }
 0x9cc   :  { %v1064_v0 = vpop.f32.mrb[32].mxu1 }
 0x9cd   :  { %v1065_v1 = vadd.f32 %v1064_v0, %v4928_v31  ;;  %v4300_v2 = vpop.f32.mrb[33].mxu1 }
 0x9ce   :  { %v1067_v3 = vpop.f32.mrb[34].mxu1 }
 0x9cf   :  { %v1068_v4 = vadd.f32 %v1067_v3, %v4930_v23  ;;  %v4301_v5 = vpop.f32.mrb[35].mxu1  ;;  %v1071_v6 = vsel %vm346_vm9, %v1065_v1, -inf }
 0x9d0   :  { %1072 = vmax.xlane.f32.xlu0 %v1071_v6 }
 0x9d1   :  { %v1074_v7 = vsel %vm346_vm9, %v1068_v4, -inf }
 0x9d2   :  { %1075 = vmax.xlane.f32.xlu1 %v1074_v7 }
 0xa5d   :  { %v1073_v8 = vpop.xlane.xlu0 %1072 }
 0xa5e   :  { %v1077_v9 = vsub.f32 %v1065_v1, %v1073_v8 }
 0xa5f   :  { %v1076_v10 = vpop.xlane.xlu1 %1075 }
 0xa60   :  { %v1079_v11 = vmul.f32 1.442695, %v1077_v9  ;;  %v1078_v12 = vsub.f32 %v1068_v4, %v1076_v10 }
 0xa62   :  { %4692 = vpow2.f32 %v1079_v11  ;;  %v1081_v13 = vmul.f32 1.442695, %v1078_v12 }
 0xa64   :  { %4694 = vpow2.f32 %v1081_v13 }
 0xa6c   :  { %v4693_v14 = vpop.eup %4692 }
 0xa6d   :  { %v1083_v15 = vsel %vm346_vm9, %v4693_v14, 0.0 }
 0xa6e   :  { %v4695_v17 = vpop.eup %4694  ;;  %1084 = vadd.xlane.f32.xlu0 %v1083_v15 }
 0xa6f   :  { %v1086_v18 = vsel %vm346_vm9, %v4695_v17, 0.0 }
 0xa70   :  { %1087 = vadd.xlane.f32.xlu1 %v1086_v18 }
 0xafb   :  { %v1085_v21 = vpop.xlane.xlu0 %1084 }
 0xafc   :  { %4696 = vrcp.f32 %v1085_v21 }
 0xafd   :  { %v1088_v22 = vpop.xlane.xlu1 %1087 }
 0xafe   :  { %4698 = vrcp.f32 %v1088_v22 }
 0xb06   :  { %v4697_v24 = vpop.eup %4696 }
 0xb07   :  { %v1091_v26 = vmul.f32 %v4697_v24, %v4693_v14 }
 0xb08   :  { %v4699_v25 = vpop.eup %4698 }
 0xb09   :  { %v1092_v28 = vmul.f32 %v4699_v25, %v4695_v17 }
 0xb0b   :  { %v1093_v32 = vpack.c.bf16 %v1092_v28, %v1091_v26 }
 0xb0d   :  { %4305 = vmatmul.mubr.msk.bf16.vlgmr.msra.gmra.mrb[28].mxu0 %vm346_vm9, %v1093_v32 }
 0xb0e   :  { %4315 = vmatpush3.bf16.msra.mxu0 %v4618_v30  ;;  %4318 = vmatprep.mubr.msk.bf16.mxu0 %vm4765_vm1, %v4764_v16 }
 0xb0f   :  { %4316 = vmatprep.subr.bf16.mxu0 %v4764_v16 }
 0xb12   :  { %4317 = vmatpush3.bf16.msra.mxu0 %v4619_v27 }
 0xb13   :  { %4330 = vmatprep.subr.bf16.mxu0 %v4764_v16 }
 0xb15   :  { %4319 = vmatmul.mubr.msk.bf16.vlgmr.msra.gmra.mrb[32].mxu0 %vm58_vm0, %v4860_v44 }
 0xb16   :  { %4331 = vmatpush3.bf16.msra.mxu0 %v4620_v33  ;;  %4334 = vmatprep.mubr.msk.bf16.mxu0 %vm4765_vm1, %v4764_v16 }
 0xb17   :  { %4332 = vmatprep.subr.bf16.mxu0 %v4764_v16 }
 0xb1a   :  { %4333 = vmatpush3.bf16.msra.mxu0 %v4621_v34 }
 0xb1b   :  { %4344 = vmatprep.subr.bf16.mxu0 %v4764_v16 }
 0xb1d   :  { %4335 = vmatmul.mubr.msk.bf16.vlgmr.msra.gmra.mrb[36].mxu0 %vm58_vm0, %v4860_v44 }
 0xb1e   :  { %4346 = vmatprep.mubr.msk.bf16.mxu0 %vm4765_vm1, %v4764_v16 }
 0xbe0   :  { %v1131_v35 = vpop.f32.mrb[28].mxu0 }
 0xbe1   :  { %v4306_v38 = vpop.f32.mrb[29].mxu0 }
 0xbe2   :  { %v1134_v39 = vpop.f32.mrb[30].mxu0 }
 0xbe3   :  { %v1138_v45 = vpack.c.bf16 %v1134_v39, %v1131_v35  ;;  %v4307_v46 = vpop.f32.mrb[31].mxu0 }
 0xbe5   :  { %4311 = vmatmul.mubr.msk.bf16.vlgmr.msra.gmra.mrb[36].mxu1 %vm298_vm2, %v1138_v45 }
 0xbe6   :  { %4323 = vmatpush3.bf16.msra.mxu1 %v4622_v43  ;;  %4326 = vmatprep.mubr.msk.bf16.mxu1 %vm4765_vm1, %v4764_v16  ;;  %v3867_v43 = vld [vmem:[%s5689_s4 + $0xc] sm:$0xf] }
 0xbe7   :  { %4324 = vmatprep.subr.bf16.mxu1 %v4764_v16  ;;  %v1509_v45 = vsel %vm734_vm10, %v3867_v43, 0 }
 0xbe8   :  { %v1248_v50 = vpop.f32.mrb[32].mxu0 }
 0xbe9   :  { %v4320_v52 = vpop.f32.mrb[33].mxu0  ;;  %v1249_v54 = vadd.f32 %v1248_v50, %v1201_v49 }
 0xbea   :  { %v1251_v53 = vpop.f32.mrb[34].mxu0  ;;  %4325 = vmatpush3.bf16.msra.mxu1 %v4623_v48 }
 0xbeb   :  { %v1252_v55 = vadd.f32 %v1251_v53, %v1201_v49  ;;  %v4321_v56 = vpop.f32.mrb[35].mxu0  ;;  %4338 = vmatprep.subr.bf16.mxu1 %v4764_v16 }
 0xbed   :  { %v1255_v58 = vpack.c.bf16 %v1252_v55, %v1249_v54  ;;  %4327 = vmatmul.mubr.msk.bf16.vlgmr.msra.gmra.mrb[40].mxu1 %vm58_vm0, %v4860_v44  ;;  %v3853_v44 = vld [vmem:[%s5687_s3 + $0x7] sm:$0x1] }
 0xbee   :  { %4340 = vmatprep.mubr.msk.bf16.mxu1 %vm4765_vm1, %v4764_v16  ;;  %v1263_v9 = vunpack.c.l.bf16 %v3853_v44 }
 0xbf0   :  { %v1380_v60 = vpop.f32.mrb[36].mxu0  ;;  %v1267_v10 = vrot.slane %v1263_v9, %v4844_v29 }
 0xbf1   :  { %v4336_v61 = vpop.f32.mrb[37].mxu0  ;;  %v1381_v63 = vadd.f32 %v1380_v60, %v1333_v59 }
 0xbf2   :  { %v1383_v62 = vpop.f32.mrb[38].mxu0 }
 0xbf3   :  { %v1384_v0 = vadd.f32 %v1383_v62, %v1333_v59  ;;  %v4337_v1 = vpop.f32.mrb[39].mxu0 }
 0xbf5   :  { %v1387_v2 = vpack.c.bf16 %v1384_v0, %v1381_v63 }
 0xbf7   :  { %4345 = vmatpush3.bf16.msra.mxu0 %v1387_v2 }
 0xbf8   :  { %4356 = vmatprep.subr.bf16.mxu0 %v4764_v16 }
 0xcb8   :  { %v1181_v3 = vpop.f32.mrb[36].mxu1 }
 0xcb9   :  { %v5132_v4 = vadd.f32 %v1181_v3, %v5053_v37  ;;  %v4312_v5 = vpop.f32.mrb[37].mxu1 }
 0xcba   :  { %v1184_v6 = vpop.f32.mrb[38].mxu1 }
 0xcbb   :  { %v5135_v7 = vadd.f32 %v1184_v6, %v5055_v40  ;;  %v4313_v8 = vpop.f32.mrb[39].mxu1 }
 0xcc0   :  { %v1314_v11 = vpop.f32.mrb[40].mxu1 }
 0xcc1   :  { %v4328_v12 = vpop.f32.mrb[41].mxu1  ;;  %v1315_v14 = vadd.f32 %v1314_v11, %v1267_v10 }
 0xcc2   :  { %v1317_v13 = vpop.f32.mrb[42].mxu1 }
 0xcc3   :  { %v1318_v15 = vadd.f32 %v1317_v13, %v1267_v10  ;;  %v4329_v17 = vpop.f32.mrb[43].mxu1 }
 0xcc5   :  { %v1321_v18 = vpack.c.bf16 %v1318_v15, %v1315_v14 }
 0xcc7   :  { %v1392_v19 = vsel %vm298_vm2, %v1321_v18, 0  ;;  %v4625_v18 = vld [vmem:[%s5690_s5 + $0x8] sm:$0xff]  }
 0xcc8   :  { %4339 = vmatpush3.bf16.xpose.msra.mxu1 %v1392_v19 }
 0xcc9   :  { %4350 = vmatprep.subr.bf16.mxu1 %v4764_v16 }
 0xccf   :  { %4341 = vmatmul.mubr.msk.bf16.vlgmr.msra.gmra.mrb[44].mxu1 %vm298_vm2, %v1255_v58  ;;  %v3869_v58 = vld [vmem:[%s5686_s6 + $0x2] sm:$0x1] }
 0xcd0   :  { %4352 = vmatprep.mubr.msk.bf16.mxu1 %vm4765_vm1, %v4764_v16  ;;  %4351 = vmatpush3.bf16.msra.mxu1 %v1509_v45  ;;  %v1556_v59 = vunpack.c.l.bf16 %v3869_v58 }
 0xcd1   :  { %4364 = vmatprep.subr.bf16.mxu1 %v4764_v16 }
 0xcd2   :  { %v1560_v60 = vrot.slane %v1556_v59, %v4844_v29 }
 0xda2   :  { %v1428_v37 = vpop.f32.mrb[44].mxu1 }
 0xda3   :  { %v1429_v40 = vadd.f32 %v1428_v37, %v4928_v31  ;;  %v4342_v20 = vpop.f32.mrb[45].mxu1 }
 0xda4   :  { %v1431_v21 = vpop.f32.mrb[46].mxu1 }
 0xda5   :  { %v1432_v22 = vadd.f32 %v1431_v21, %v4930_v23  ;;  %v4343_v24 = vpop.f32.mrb[47].mxu1  ;;  %v1435_v25 = vsel %vm346_vm9, %v1429_v40, -inf }
 0xda6   :  { %1436 = vmax.xlane.f32.xlu0 %v1435_v25  ;;  %v3870_v24 = vld [vmem:[%s5686_s6 + $0x3] sm:$0x1] }
 0xda7   :  { %v1438_v26 = vsel %vm346_vm9, %v1432_v22, -inf  ;;  %v1567_v25 = vunpack.c.l.bf16 %v3870_v24 }
 0xda8   :  { %1439 = vmax.xlane.f32.xlu1 %v1438_v26  ;;  %v3871_v26 = vld [vmem:[%s5686_s6 + $0x4] sm:$0x1] }
 0xe33   :  { %v1437_v28 = vpop.xlane.xlu0 %1436 }
 0xe34   :  { %v1441_v30 = vsub.f32 %v1429_v40, %v1437_v28  ;;  %v1600_v28 = vrot.slane %v1567_v25, %v4844_v29 }
 0xe35   :  { %v1440_v32 = vpop.xlane.xlu1 %1439 }
 0xe36   :  { %v1443_v27 = vmul.f32 1.442695, %v1441_v30  ;;  %v1442_v33 = vsub.f32 %v1432_v22, %v1440_v32  ;;  %v1570_v30 = vunpack.c.l.bf16 %v3871_v26 }
 0xe38   :  { %4700 = vpow2.f32 %v1443_v27  ;;  %v1445_v34 = vmul.f32 1.442695, %v1442_v33 }
 0xe3a   :  { %4702 = vpow2.f32 %v1445_v34 }
 0xe42   :  { %v4701_v35 = vpop.eup %4700 }
 0xe43   :  { %v1447_v36 = vsel %vm346_vm9, %v4701_v35, 0.0 }
 0xe44   :  { %v4703_v38 = vpop.eup %4702  ;;  %1448 = vadd.xlane.f32.xlu0 %v1447_v36  ;;  %v1606_v36 = vrot.slane %v1570_v30, %v4844_v29 }
 0xe45   :  { %v1450_v39 = vsel %vm346_vm9, %v4703_v38, 0.0 }
 0xe46   :  { %1451 = vadd.xlane.f32.xlu1 %v1450_v39 }
 0xed1   :  { %v1449_v46 = vpop.xlane.xlu0 %1448 }
 0xed2   :  { %4704 = vrcp.f32 %v1449_v46  ;;  %v4626_v46 = vld [vmem:[%s5690_s5 + $0x10] sm:$0xff]  }
 0xed3   :  { %v1452_v47 = vpop.xlane.xlu1 %1451 }
 0xed4   :  { %4706 = vrcp.f32 %v1452_v47  ;;  %v4627_v47 = vld [vmem:[%s5690_s5 + $0x18] sm:$0xff]  }
 0xedc   :  { %v4705_v48 = vpop.eup %4704 }
 0xedd   :  { %v1455_v50 = vmul.f32 %v4705_v48, %v4701_v35  ;;  %v4628_v48 = vld [vmem:[%s5690_s5 + $0x20] sm:$0xff]  }
 0xede   :  { %v4707_v49 = vpop.eup %4706 }
 0xedf   :  { %v1456_v51 = vmul.f32 %v4707_v49, %v4703_v38  ;;  %v4629_v49 = vld [vmem:[%s5690_s5 + $0x28] sm:$0xff]  }
 0xee1   :  { %v1457_v52 = vpack.c.bf16 %v1456_v51, %v1455_v50  ;;  %v4630_v50 = vld [vmem:[%s5690_s5 + $0x30] sm:$0xff]   ;;  %v4631_v51 = vld [vmem:[%s5690_s5 + $0x38] sm:$0xff]  }
 0xee3   :  { %4347 = vmatmul.mubr.msk.bf16.vlgmr.msra.gmra.mrb[40].mxu0 %vm346_vm9, %v1457_v52  ;;  %v4632_v52 = vld [vmem:[%s5690_s5 + $0x40] sm:$0xff]  }
 0xee4   :  { %4360 = vmatprep.mubr.msk.bf16.mxu0 %vm4765_vm1, %v4764_v16 }
 0xfb6   :  { %v1495_v53 = vpop.f32.mrb[40].mxu0 }
 0xfb7   :  { %v4348_v54 = vpop.f32.mrb[41].mxu0 }
 0xfb8   :  { %v1498_v55 = vpop.f32.mrb[42].mxu0  ;;  %v3872_v54 = vld [vmem:[%s5686_s6 + $0x5] sm:$0x1] }
 0xfb9   :  { %v1502_v56 = vpack.c.bf16 %v1498_v55, %v1495_v53  ;;  %v4349_v57 = vpop.f32.mrb[43].mxu0  ;;  %v4633_v53 = vld [vmem:[%s5690_s5 + $0x48] sm:$0xff]   ;;  %v1616_v55 = vunpack.c.l.bf16 %v3872_v54 }
 0xfbb   :  { %4353 = vmatmul.mubr.msk.bf16.vlgmr.msra.gmra.mrb[48].mxu1 %vm298_vm2, %v1502_v56  ;;  %v1620_v56 = vrot.slane %v1616_v55, %v4844_v29  ;;  %v3886_v55 = vld [vmem:[%s5686_s6 + $0x8] sm:$0x1] }
 0xfbc   :  { %4380 = vmatprep.mubr.msk.bf16.mxu1 %vm4765_vm1, %v4764_v16  ;;  %4365 = vmatpush3.bf16.msra.mxu1 %v4626_v46  ;;  %v4635_v46 = vld [vmem:[%s5685_s2 + $0xc8] sm:$0xff]  }
 0xfbd   :  { %4366 = vmatprep.subr.bf16.mxu1 %v4764_v16 }
 0xfc0   :  { %4367 = vmatpush3.bf16.msra.mxu1 %v4627_v47 }
 0xfc1   :  { %4368 = vmatprep.subr.bf16.mxu1 %v4764_v16 }
 0xfc4   :  { %4369 = vmatpush3.bf16.msra.mxu1 %v4628_v48 }
 0xfc5   :  { %4370 = vmatprep.subr.bf16.mxu1 %v4764_v16 }
 0xfc8   :  { %4371 = vmatpush3.bf16.msra.mxu1 %v4629_v49 }
 0xfc9   :  { %4372 = vmatprep.subr.bf16.mxu1 %v4764_v16 }
 0xfcc   :  { %4373 = vmatpush3.bf16.msra.mxu1 %v4630_v50 }
 0xfcd   :  { %4374 = vmatprep.subr.bf16.mxu1 %v4764_v16 }
 0xfd0   :  { %4375 = vmatpush3.bf16.msra.mxu1 %v4631_v51 }
 0xfd1   :  { %4376 = vmatprep.subr.bf16.mxu1 %v4764_v16 }
 0xfd4   :  { %4377 = vmatpush3.bf16.msra.mxu1 %v4632_v52 }
 0xfd5   :  { %4378 = vmatprep.subr.bf16.mxu1 %v4764_v16 }
 0xfd8   :  { %4379 = vmatpush3.bf16.msra.mxu1 %v4633_v53  ;;  %v3885_v53 = vld [vmem:[%s5686_s6 + $0x7] sm:$0x1] }
 0xfd9   :  { %4414 = vmatprep.subr.bf16.mxu1 %v4764_v16  ;;  %v1812_v54 = vunpack.c.l.bf16 %v3885_v53 }
0x108e   :  { %v1545_v61 = vpop.f32.mrb[48].mxu1 }
0x108f   :  { %v1552_v62 = vadd.f32 %v1545_v61, %v5132_v4  ;;  %v4354_v63 = vpop.f32.mrb[49].mxu1 }
0x1090   :  { %v1548_v0 = vpop.f32.mrb[50].mxu1 }
0x1091   :  { %v1561_v1 = vadd.f32 %v1560_v60, %v1552_v62  ;;  %v1553_v2 = vadd.f32 %v1548_v0, %v5135_v7  ;;  %v4355_v3 = vpop.f32.mrb[51].mxu1 }
0x1093   :  { %v1562_v44 = vadd.f32 %v1560_v60, %v1553_v2  ;;  %v1563_v5 = vadd.f32 %v1561_v1, %v4851_v41 }
0x1095   :  { %v1571_v6 = vsel %vm58_vm0, %v1563_v5, 0.0  ;;  %v1564_v8 = vadd.f32 %v1562_v44, %v4853_v42  ;;  %v4624_v42 = vld [vmem:[%s5690_s5] sm:$0xff]  }
0x1096   :  { %1572 = vadd.xlane.f32.xlu0 %v1571_v6  ;;  %4357 = vmatpush3.bf16.msra.mxu0 %v4624_v42 }
0x1097   :  { %v1574_v9 = vsel %vm58_vm0, %v1564_v8, 0.0  ;;  %4358 = vmatprep.subr.bf16.mxu0 %v4764_v16 }
0x1098   :  { %1575 = vadd.xlane.f32.xlu1 %v1574_v9 }
0x109a   :  { %4359 = vmatpush3.bf16.msra.mxu0 %v4625_v18 }
0x109b   :  { %4384 = vmatprep.subr.bf16.mxu0 %v4764_v16 }
0x1123   :  { %v1573_v10 = vpop.xlane.xlu0 %1572 }
0x1124   :  { %v1577_v11 = vmul.f32 0.03125, %v1573_v10 }
0x1125   :  { %v1576_v4 = vpop.xlane.xlu1 %1575 }
0x1126   :  { %v1579_v12 = vsub.f32 %v1563_v5, %v1577_v11  ;;  %v1578_v13 = vmul.f32 0.03125, %v1576_v4 }
0x1128   :  { %v1580_v14 = vsub.f32 %v1564_v8, %v1578_v13  ;;  %v1581_v15 = vmul.f32 %v1579_v12, %v1579_v12 }
0x112a   :  { %v1583_v7 = vsel %vm58_vm0, %v1581_v15, 0.0  ;;  %v1582_v17 = vmul.f32 %v1580_v14, %v1580_v14 }
0x112b   :  { %1584 = vadd.xlane.f32.xlu0 %v1583_v7 }
0x112c   :  { %v1586_v41 = vsel %vm58_vm0, %v1582_v17, 0.0 }
0x112d   :  { %1587 = vadd.xlane.f32.xlu1 %v1586_v41  ;;  %v3876_v41 = vld [vmem:[%s5686_s6 + $0x6] sm:$0x1] }
0x112e   :  { %v1714_v42 = vunpack.c.l.bf16 %v3876_v41 }
0x1130   :  { %v1718_v18 = vrot.slane %v1714_v42, %v4844_v29 }
0x11b8   :  { %v1585_v19 = vpop.xlane.xlu0 %1584 }
0x11b9   :  { %v1589_v37 = vmul.f32 0.03125, %v1585_v19 }
0x11ba   :  { %v1588_v40 = vpop.xlane.xlu1 %1587 }
0x11bb   :  { %v1591_v20 = vadd.f32 1e-12, %v1589_v37  ;;  %v1590_v21 = vmul.f32 0.03125, %v1588_v40 }
0x11bd   :  { %4708 = vrsqrt.f32 %v1591_v20  ;;  %v1592_v22 = vadd.f32 1e-12, %v1590_v21 }
0x11bf   :  { %4710 = vrsqrt.f32 %v1592_v22 }
0x11c7   :  { %v4709_v32 = vpop.eup %4708 }
0x11c8   :  { %v1595_v27 = vmul.f32 %v4709_v32, %v1579_v12 }
0x11c9   :  { %v4711_v33 = vpop.eup %4710 }
0x11ca   :  { %v1601_v34 = vmul.f32 %v1600_v28, %v1595_v27  ;;  %v1596_v35 = vmul.f32 %v4711_v33, %v1580_v14 }
0x11cc   :  { %v1602_v38 = vmul.f32 %v1600_v28, %v1596_v35  ;;  %v5188_v39 = vadd.f32 %v1606_v36, %v1601_v34 }
0x11ce   :  { %v5190_v43 = vadd.f32 %v1606_v36, %v1602_v38 }
0x11d0   :  { %v1613_v45 = vpack.c.bf16 %v5190_v43, %v5188_v39 }
0x11d2   :  { %4361 = vmatmul.mubr.msk.bf16.vlgmr.msra.gmra.mrb[44].mxu0 %vm58_vm0, %v1613_v45 }
0x11d3   :  { %4388 = vmatprep.mubr.msk.bf16.mxu0 %vm4765_vm1, %v4764_v16 }
0x12a5   :  { %v1670_v57 = vpop.f32.mrb[44].mxu0 }
0x12a6   :  { %v1671_v58 = vadd.f32 %v1670_v57, %v1620_v56  ;;  %v4362_v59 = vpop.f32.mrb[45].mxu0  ;;  %v1845_v57 = vrot.slane %v1812_v54, %v4844_v29 }
0x12a7   :  { %v1673_v60 = vpop.f32.mrb[46].mxu0 }
0x12a8   :  { %v1679_v61 = vmul.f32 0.044715, %v1671_v58  ;;  %v1674_v62 = vadd.f32 %v1673_v60, %v1620_v56  ;;  %v4363_v63 = vpop.f32.mrb[47].mxu0  ;;  %v1677_v12 = vmul.f32 0.5, %v1671_v58  ;;  %v1815_v56 = vunpack.c.l.bf16 %v3886_v55 }
0x12aa   :  { %v1681_v0 = vmul.f32 %v1679_v61, %v1671_v58  ;;  %v1680_v1 = vmul.f32 0.044715, %v1674_v62  ;;  %v1678_v13 = vmul.f32 0.5, %v1674_v62  ;;  %v1851_v61 = vrot.slane %v1815_v56, %v4844_v29 }
0x12ac   :  { %v1683_v2 = vmul.f32 %v1681_v0, %v1671_v58  ;;  %v1682_v3 = vmul.f32 %v1680_v1, %v1674_v62 }
0x12ae   :  { %v1685_v44 = vadd.f32 %v1683_v2, %v1671_v58  ;;  %v1684_v5 = vmul.f32 %v1682_v3, %v1674_v62  ;;  %v4636_v3 = vld [vmem:[%s5685_s2 + $0x100] sm:$0xff]  }
0x12b0   :  { %v1687_v6 = vmul.f32 0.7978846, %v1685_v44  ;;  %v1686_v8 = vadd.f32 %v1684_v5, %v1674_v62  ;;  %v4637_v5 = vld [vmem:[%s5685_s2 + $0x108] sm:$0xff]  }
0x12b2   :  { %4712 = vtanh.f32 %v1687_v6  ;;  %v1688_v9 = vmul.f32 0.7978846, %v1686_v8  ;;  %v4638_v6 = vld [vmem:[%s5685_s2 + $0x140] sm:$0xff]   ;;  %v4639_v8 = vld [vmem:[%s5685_s2 + $0x148] sm:$0xff]  }
0x12b4   :  { %4714 = vtanh.f32 %v1688_v9  ;;  %v3891_v9 = vld [vmem:[%s5687_s3 + $0xc] sm:$0x1] }
0x12bc   :  { %v4713_v10 = vpop.eup %4712 }
0x12bd   :  { %v1691_v11 = vadd.f32 1.0, %v4713_v10  ;;  %v1862_v10 = vunpack.c.l.bf16 %v3891_v9 }
0x12be   :  { %v4715_v4 = vpop.eup %4714 }
0x12bf   :  { %v1692_v14 = vadd.f32 1.0, %v4715_v4  ;;  %v1693_v15 = vmul.f32 %v1691_v11, %v1677_v12  ;;  %v1866_v11 = vrot.slane %v1862_v10, %v4844_v29  ;;  %v3899_v12 = vld [vmem:[%s5687_s3 + $0x10] sm:$0x1] }
0x12c0   :  { %v1931_v41 = vunpack.c.l.bf16 %v3899_v12 }
0x12c1   :  { %v1694_v7 = vmul.f32 %v1692_v14, %v1678_v13 }
0x12c3   :  { %v1711_v17 = vpack.c.bf16 %v1694_v7, %v1693_v15 }
0x12c5   :  { %4381 = vmatmul.mubr.bf16.vlgmr.msra.gmra.mrb[52].mxu1 %v1711_v17 }
0x12c6   :  { %4416 = vmatprep.mubr.msk.bf16.mxu1 %vm4765_vm1, %v4764_v16 }
0x1398   :  { %v1801_v19 = vpop.f32.mrb[52].mxu1 }
0x1399   :  { %v1802_v37 = vadd.f32 %v1801_v19, %v1718_v18  ;;  %v4382_v40 = vpop.f32.mrb[53].mxu1 }
0x139a   :  { %v1804_v20 = vpop.f32.mrb[54].mxu1 }
0x139b   :  { %v1805_v21 = vadd.f32 %v1804_v20, %v1718_v18  ;;  %v4383_v22 = vpop.f32.mrb[55].mxu1  ;;  %v1808_v24 = vadd.f32 %v1802_v37, %v5188_v39  ;;  %v1935_v18 = vrot.slane %v1931_v41, %v4844_v29  ;;  %v3907_v37 = vld [vmem:[%s5687_s3 + $0x14] sm:$0x1] }
0x139d   :  { %v1816_v25 = vsel %vm58_vm0, %v1808_v24, 0.0  ;;  %v1809_v26 = vadd.f32 %v1805_v21, %v5190_v43  ;;  %v4634_v43 = vld [vmem:[%s5685_s2 + $0xc0] sm:$0xff]  }
0x139e   :  { %1817 = vadd.xlane.f32.xlu0 %v1816_v25  ;;  %4385 = vmatpush3.bf16.msra.mxu0 %v4634_v43  ;;  %v1997_v25 = vunpack.c.l.bf16 %v3907_v37  ;;  %v4642_v43 = vld [vmem:[%s5685_s2 + $0x150] sm:$0xff]  }
0x139f   :  { %v1819_v28 = vsel %vm58_vm0, %v1809_v26, 0.0  ;;  %4386 = vmatprep.subr.bf16.mxu0 %v4764_v16 }
0x13a0   :  { %1820 = vadd.xlane.f32.xlu1 %v1819_v28  ;;  %v2001_v28 = vrot.slane %v1997_v25, %v4844_v29 }
0x13a2   :  { %4387 = vmatpush3.bf16.msra.mxu0 %v4635_v46  ;;  %v4643_v46 = vld [vmem:[%s5685_s2 + $0x158] sm:$0xff]  }
0x13a3   :  { %4392 = vmatprep.subr.bf16.mxu0 %v4764_v16 }
0x142b   :  { %v1818_v30 = vpop.xlane.xlu0 %1817 }
0x142c   :  { %v1822_v32 = vmul.f32 0.03125, %v1818_v30 }
0x142d   :  { %v1821_v27 = vpop.xlane.xlu1 %1820 }
0x142e   :  { %v1824_v33 = vsub.f32 %v1808_v24, %v1822_v32  ;;  %v1823_v34 = vmul.f32 0.03125, %v1821_v27 }
0x1430   :  { %v1825_v35 = vsub.f32 %v1809_v26, %v1823_v34  ;;  %v1826_v36 = vmul.f32 %v1824_v33, %v1824_v33 }
0x1432   :  { %v1828_v38 = vsel %vm58_vm0, %v1826_v36, 0.0  ;;  %v1827_v45 = vmul.f32 %v1825_v35, %v1825_v35 }
0x1433   :  { %1829 = vadd.xlane.f32.xlu0 %v1828_v38  ;;  %v4640_v38 = vld [vmem:[%s5685_s2 + $0xd0] sm:$0xff]  }
0x1434   :  { %v1831_v39 = vsel %vm58_vm0, %v1827_v45, 0.0 }
0x1435   :  { %1832 = vadd.xlane.f32.xlu1 %v1831_v39  ;;  %v4641_v39 = vld [vmem:[%s5685_s2 + $0xd8] sm:$0xff]  }
0x14c0   :  { %v1830_v47 = vpop.xlane.xlu0 %1829 }
0x14c1   :  { %v1834_v48 = vmul.f32 0.03125, %v1830_v47 }
0x14c2   :  { %v1833_v49 = vpop.xlane.xlu1 %1832 }
0x14c3   :  { %v1836_v50 = vadd.f32 1e-12, %v1834_v48  ;;  %v1835_v51 = vmul.f32 0.03125, %v1833_v49  ;;  %v3918_v48 = vld [vmem:[%s5687_s3 + $0xd] sm:$0x1] }
0x14c4   :  { %v2180_v55 = vunpack.c.l.bf16 %v3918_v48 }
0x14c5   :  { %4716 = vrsqrt.f32 %v1836_v50  ;;  %v1837_v52 = vadd.f32 1e-12, %v1835_v51 }
0x14c7   :  { %4718 = vrsqrt.f32 %v1837_v52 }
0x14cf   :  { %v4717_v58 = vpop.eup %4716 }
0x14d0   :  { %v1840_v59 = vmul.f32 %v4717_v58, %v1824_v33 }
0x14d1   :  { %v4719_v60 = vpop.eup %4718 }
0x14d2   :  { %v1846_v62 = vmul.f32 %v1845_v57, %v1840_v59  ;;  %v1841_v63 = vmul.f32 %v4719_v60, %v1825_v35  ;;  %v3934_v59 = vld [vmem:[%s5687_s3 + $0x15] sm:$0x1] }
0x14d4   :  { %v1847_v0 = vmul.f32 %v1845_v57, %v1841_v63  ;;  %v5261_v1 = vadd.f32 %v1851_v61, %v1846_v62  ;;  %v2184_v57 = vrot.slane %v2180_v55, %v4844_v29 }
0x14d6   :  { %v5263_v2 = vadd.f32 %v1851_v61, %v1847_v0 }
0x14d8   :  { %v5270_v44 = vpack.c.bf16 %v5263_v2, %v5261_v1 }
0x14da   :  { %4389 = vmatmul.mubr.msk.bf16.vlgmr.msra.gmra.mrb[48].mxu0 %vm58_vm0, %v5270_v44 }
0x14db   :  { %4393 = vmatpush3.bf16.msra.mxu0 %v4636_v3  ;;  %4396 = vmatprep.mubr.msk.bf16.mxu0 %vm4765_vm1, %v4764_v16  ;;  %v2312_v3 = vunpack.c.l.bf16 %v3934_v59 }
0x14dc   :  { %4394 = vmatprep.subr.bf16.mxu0 %v4764_v16 }
0x14df   :  { %4395 = vmatpush3.bf16.msra.mxu0 %v4637_v5 }
0x14e0   :  { %4400 = vmatprep.subr.bf16.mxu0 %v4764_v16 }
0x14e2   :  { %4397 = vmatmul.mubr.msk.bf16.vlgmr.msra.gmra.mrb[52].mxu0 %vm58_vm0, %v5270_v44 }
0x14e3   :  { %4401 = vmatpush3.bf16.msra.mxu0 %v4638_v6  ;;  %4404 = vmatprep.mubr.msk.bf16.mxu0 %vm4765_vm1, %v4764_v16  ;;  %v2316_v6 = vrot.slane %v2312_v3, %v4844_v29 }
0x14e4   :  { %4402 = vmatprep.subr.bf16.mxu0 %v4764_v16 }
0x14e7   :  { %4403 = vmatpush3.bf16.msra.mxu0 %v4639_v8 }
0x14e8   :  { %4408 = vmatprep.subr.bf16.mxu0 %v4764_v16 }
0x14ea   :  { %4405 = vmatmul.mubr.msk.bf16.vlgmr.msra.gmra.mrb[56].mxu0 %vm58_vm0, %v5270_v44 }
0x14eb   :  { %4410 = vmatprep.mubr.msk.bf16.mxu0 %vm4765_vm1, %v4764_v16 }
0x15ad   :  { %v1916_v4 = vpop.f32.mrb[48].mxu0 }
0x15ae   :  { %v4390_v13 = vpop.f32.mrb[49].mxu0  ;;  %v1917_v15 = vadd.f32 %v1916_v4, %v1866_v11 }
0x15af   :  { %v1919_v14 = vpop.f32.mrb[50].mxu0 }
0x15b0   :  { %v1920_v7 = vadd.f32 %v1919_v14, %v1866_v11  ;;  %v4391_v17 = vpop.f32.mrb[51].mxu0 }
0x15b2   :  { %v1923_v42 = vpack.c.bf16 %v1920_v7, %v1917_v15 }
0x15b5   :  { %v1982_v19 = vpop.f32.mrb[52].mxu0 }
0x15b6   :  { %v4398_v40 = vpop.f32.mrb[53].mxu0  ;;  %v1983_v21 = vadd.f32 %v1982_v19, %v1935_v18 }
0x15b7   :  { %v1985_v20 = vpop.f32.mrb[54].mxu0 }
0x15b8   :  { %v1986_v22 = vadd.f32 %v1985_v20, %v1935_v18  ;;  %v4399_v24 = vpop.f32.mrb[55].mxu0 }
0x15ba   :  { %v1989_v26 = vpack.c.bf16 %v1986_v22, %v1983_v21 }
0x15bc   :  { %v2060_v30 = vsel %vm298_vm2, %v1989_v26, 0 }
0x15bd   :  { %v2048_v32 = vpop.f32.mrb[56].mxu0  ;;  %4409 = vmatpush3.bf16.xpose.msra.mxu0 %v2060_v30 }
0x15be   :  { %v4406_v27 = vpop.f32.mrb[57].mxu0  ;;  %4420 = vmatprep.subr.bf16.mxu0 %v4764_v16  ;;  %v2049_v34 = vadd.f32 %v2048_v32, %v2001_v28  ;;  %v4645_v32 = vld [vmem:[%s5685_s2 + $0x118] sm:$0xff]  }
0x15bf   :  { %v2051_v33 = vpop.f32.mrb[58].mxu0 }
0x15c0   :  { %v2052_v35 = vadd.f32 %v2051_v33, %v2001_v28  ;;  %v4407_v36 = vpop.f32.mrb[59].mxu0  ;;  %v4644_v28 = vld [vmem:[%s5685_s2 + $0x110] sm:$0xff]  }
0x15c1   :  { %v3926_v33 = vld [vmem:[%s5687_s3 + $0x11] sm:$0x1] }
0x15c2   :  { %v2055_v45 = vpack.c.bf16 %v2052_v35, %v2049_v34 }
0x15c4   :  { %4411 = vmatmul.mubr.msk.bf16.vlgmr.msra.gmra.mrb[60].mxu0 %vm298_vm2, %v1923_v42  ;;  %4415 = vmatpush3.bf16.msra.mxu1 %v2055_v45  ;;  %v2246_v45 = vunpack.c.l.bf16 %v3926_v33  ;;  %v4650_v33 = vld [vmem:[%s5685_s2 + $0x160] sm:$0xff]  }
0x15c5   :  { %4421 = vmatpush3.bf16.msra.mxu0 %v4640_v38  ;;  %4424 = vmatprep.mubr.msk.bf16.mxu0 %vm4765_vm1, %v4764_v16 }
0x15c6   :  { %4422 = vmatprep.subr.bf16.mxu0 %v4764_v16  ;;  %4428 = vmatprep.subr.bf16.mxu1 %v4764_v16 }
0x15c9   :  { %4423 = vmatpush3.bf16.msra.mxu0 %v4641_v39  ;;  %v2250_v39 = vrot.slane %v2246_v45, %v4844_v29 }
0x15ca   :  { %4436 = vmatprep.subr.bf16.mxu0 %v4764_v16 }
0x15cc   :  { %4425 = vmatmul.mubr.msk.bf16.vlgmr.msra.gmra.mrb[64].mxu0 %vm58_vm0, %v5270_v44 }
0x15cd   :  { %4437 = vmatpush3.bf16.msra.mxu0 %v4642_v43  ;;  %4440 = vmatprep.mubr.msk.bf16.mxu0 %vm4765_vm1, %v4764_v16 }
0x15ce   :  { %4438 = vmatprep.subr.bf16.mxu0 %v4764_v16 }
0x15d1   :  { %4439 = vmatpush3.bf16.msra.mxu0 %v4643_v46 }
0x15d2   :  { %4450 = vmatprep.subr.bf16.mxu0 %v4764_v16 }
0x15d4   :  { %4441 = vmatmul.mubr.msk.bf16.vlgmr.msra.gmra.mrb[68].mxu0 %vm58_vm0, %v5270_v44 }
0x15d5   :  { %4452 = vmatprep.mubr.msk.bf16.mxu0 %vm4765_vm1, %v4764_v16 }
0x1697   :  { %v2096_v47 = vpop.f32.mrb[60].mxu0 }
0x1698   :  { %v2097_v49 = vadd.f32 %v2096_v47, %v4928_v31  ;;  %v4412_v50 = vpop.f32.mrb[61].mxu0 }
0x1699   :  { %v2099_v51 = vpop.f32.mrb[62].mxu0 }
0x169a   :  { %v2100_v52 = vadd.f32 %v2099_v51, %v4930_v23  ;;  %v4413_v53 = vpop.f32.mrb[63].mxu0  ;;  %v2103_v54 = vsel %vm346_vm9, %v2097_v49, -inf }
0x169b   :  { %2104 = vmax.xlane.f32.xlu0 %v2103_v54 }
0x169c   :  { %v2106_v56 = vsel %vm346_vm9, %v2100_v52, -inf }
0x169d   :  { %2107 = vmax.xlane.f32.xlu1 %v2106_v56 }
0x169f   :  { %v2231_v58 = vpop.f32.mrb[64].mxu0 }
0x16a0   :  { %v4426_v60 = vpop.f32.mrb[65].mxu0  ;;  %v5350_v62 = vadd.f32 %v2231_v58, %v2184_v57 }
0x16a1   :  { %v2234_v61 = vpop.f32.mrb[66].mxu0 }
0x16a2   :  { %v5352_v63 = vadd.f32 %v2234_v61, %v2184_v57  ;;  %v4427_v0 = vpop.f32.mrb[67].mxu0 }
0x16a4   :  { %v2238_v5 = vpack.c.bf16 %v5352_v63, %v5350_v62 }
0x16a7   :  { %v2363_v8 = vpop.f32.mrb[68].mxu0 }
0x16a8   :  { %v4442_v9 = vpop.f32.mrb[69].mxu0  ;;  %v2364_v11 = vadd.f32 %v2363_v8, %v2316_v6 }
0x16a9   :  { %v2366_v10 = vpop.f32.mrb[70].mxu0 }
0x16aa   :  { %v2367_v4 = vadd.f32 %v2366_v10, %v2316_v6  ;;  %v4443_v12 = vpop.f32.mrb[71].mxu0 }
0x16ac   :  { %v2370_v13 = vpack.c.bf16 %v2367_v4, %v2364_v11  ;;  %v3940_v11 = vld [vmem:[%s5689_s4 + $0x14] sm:$0xf] }
0x16ad   :  { %v2492_v4 = vsel %vm734_vm10, %v3940_v11, 0 }
0x16ae   :  { %4451 = vmatpush3.bf16.msra.mxu0 %v2370_v13 }
0x16af   :  { %4462 = vmatprep.subr.bf16.mxu0 %v4764_v16 }
0x1728   :  { %v2105_v14 = vpop.xlane.xlu0 %2104 }
0x1729   :  { %v2109_v15 = vsub.f32 %v2097_v49, %v2105_v14 }
0x172a   :  { %v2108_v7 = vpop.xlane.xlu1 %2107 }
0x172b   :  { %v2111_v17 = vmul.f32 1.442695, %v2109_v15  ;;  %v2110_v41 = vsub.f32 %v2100_v52, %v2108_v7  ;;  %v3913_v7 = vld [vmem:[%s5689_s4 + $0x10] sm:$0xf] }
0x172d   :  { %4720 = vpow2.f32 %v2111_v17  ;;  %v2113_v42 = vmul.f32 1.442695, %v2110_v41 }
0x172f   :  { %4722 = vpow2.f32 %v2113_v42 }
0x1737   :  { %v4721_v18 = vpop.eup %4720 }
0x1738   :  { %v2115_v19 = vsel %vm346_vm9, %v4721_v18, 0.0 }
0x1739   :  { %v4723_v37 = vpop.eup %4722  ;;  %2116 = vadd.xlane.f32.xlu0 %v2115_v19  ;;  %v4646_v19 = vld [vmem:[%s5685_s2 + $0x120] sm:$0xff]  }
0x173a   :  { %v2118_v40 = vsel %vm346_vm9, %v4723_v37, 0.0 }
0x173b   :  { %2119 = vadd.xlane.f32.xlu1 %v2118_v40 }
0x17c6   :  { %v2117_v20 = vpop.xlane.xlu0 %2116 }
0x17c7   :  { %4724 = vrcp.f32 %v2117_v20 }
0x17c8   :  { %v2120_v21 = vpop.xlane.xlu1 %2119 }
0x17c9   :  { %4726 = vrcp.f32 %v2120_v21 }
0x17d1   :  { %v4725_v22 = vpop.eup %4724 }
0x17d2   :  { %v2123_v25 = vmul.f32 %v4725_v22, %v4721_v18  ;;  %v2539_v18 = vsel %vm734_vm10, %v3913_v7, 0  ;;  %v4648_v22 = vld [vmem:[%s5685_s2 + $0xe0] sm:$0xff]  }
0x17d3   :  { %v4727_v24 = vpop.eup %4726 }
0x17d4   :  { %v2124_v26 = vmul.f32 %v4727_v24, %v4723_v37  ;;  %v4647_v37 = vld [vmem:[%s5685_s2 + $0x128] sm:$0xff]  }
0x17d6   :  { %v2125_v30 = vpack.c.bf16 %v2124_v26, %v2123_v25  ;;  %v4649_v26 = vld [vmem:[%s5685_s2 + $0xe8] sm:$0xff]  }
0x17d8   :  { %4417 = vmatmul.mubr.msk.bf16.vlgmr.msra.gmra.mrb[56].mxu1 %vm346_vm9, %v2125_v30  ;;  %v3955_v30 = vld [vmem:[%s5687_s3 + $0x12] sm:$0x1] }
0x17d9   :  { %4429 = vmatpush3.bf16.msra.mxu1 %v4644_v28  ;;  %4432 = vmatprep.mubr.msk.bf16.mxu1 %vm4765_vm1, %v4764_v16 }
0x17da   :  { %4430 = vmatprep.subr.bf16.mxu1 %v4764_v16 }
0x17dd   :  { %4431 = vmatpush3.bf16.msra.mxu1 %v4645_v32 }
0x17de   :  { %4444 = vmatprep.subr.bf16.mxu1 %v4764_v16 }
0x17e0   :  { %4433 = vmatmul.mubr.msk.bf16.vlgmr.msra.gmra.mrb[60].mxu1 %vm58_vm0, %v5270_v44 }
0x17e1   :  { %4446 = vmatprep.mubr.msk.bf16.mxu1 %vm4765_vm1, %v4764_v16 }
0x18ab   :  { %v5375_v27 = vpop.f32.mrb[56].mxu1 }
0x18ac   :  { %v4418_v34 = vpop.f32.mrb[57].mxu1 }
0x18ad   :  { %v2166_v35 = vpop.f32.mrb[58].mxu1 }
0x18ae   :  { %v2170_v36 = vpack.c.bf16 %v2166_v35, %v5375_v27  ;;  %v4419_v38 = vpop.f32.mrb[59].mxu1  ;;  %v2655_v35 = vunpack.c.l.bf16 %v3955_v30 }
0x18b0   :  { %v2659_v38 = vrot.slane %v2655_v35, %v4844_v29 }
0x18b3   :  { %v2297_v43 = vpop.f32.mrb[60].mxu1 }
0x18b4   :  { %v4434_v46 = vpop.f32.mrb[61].mxu1  ;;  %v2298_v48 = vadd.f32 %v2297_v43, %v2250_v39 }
0x18b5   :  { %v2300_v47 = vpop.f32.mrb[62].mxu1 }
0x18b6   :  { %v2301_v49 = vadd.f32 %v2300_v47, %v2250_v39  ;;  %v4435_v50 = vpop.f32.mrb[63].mxu1 }
0x18b8   :  { %v2304_v51 = vpack.c.bf16 %v2301_v49, %v2298_v48 }
0x18ba   :  { %v2375_v52 = vsel %vm298_vm2, %v2304_v51, 0 }
0x18bb   :  { %4445 = vmatpush3.bf16.xpose.msra.mxu1 %v2375_v52  ;;  %v3947_v52 = vld [vmem:[%s5687_s3 + $0xe] sm:$0x1] }
0x18bc   :  { %4456 = vmatprep.subr.bf16.mxu1 %v4764_v16 }
0x18c2   :  { %4447 = vmatmul.mubr.msk.bf16.vlgmr.msra.gmra.mrb[64].mxu1 %vm298_vm2, %v2238_v5 }
0x18c3   :  { %4458 = vmatprep.mubr.msk.bf16.mxu1 %vm4765_vm1, %v4764_v16  ;;  %4457 = vmatpush3.bf16.msra.mxu1 %v2492_v4 }
0x18c4   :  { %4468 = vmatprep.subr.bf16.mxu1 %v4764_v16 }
0x1995   :  { %v2411_v53 = vpop.f32.mrb[64].mxu1 }
0x1996   :  { %v2412_v54 = vadd.f32 %v2411_v53, %v4928_v31  ;;  %v4448_v55 = vpop.f32.mrb[65].mxu1 }
0x1997   :  { %v2414_v56 = vpop.f32.mrb[66].mxu1 }
0x1998   :  { %v2415_v57 = vadd.f32 %v2414_v56, %v4930_v23  ;;  %v4449_v58 = vpop.f32.mrb[67].mxu1  ;;  %v2418_v59 = vsel %vm346_vm9, %v2412_v54, -inf }
0x1999   :  { %2419 = vmax.xlane.f32.xlu0 %v2418_v59  ;;  %v2589_v58 = vunpack.c.l.bf16 %v3947_v52  ;;  %v3975_v52 = vld [vmem:[%s5687_s3 + $0xf] sm:$0x1] }
0x199a   :  { %v2421_v60 = vsel %vm346_vm9, %v2415_v57, -inf }
0x199b   :  { %2422 = vmax.xlane.f32.xlu1 %v2421_v60  ;;  %v2593_v59 = vrot.slane %v2589_v58, %v4844_v29 }
0x1a26   :  { %v2420_v61 = vpop.xlane.xlu0 %2419 }
0x1a27   :  { %v2424_v62 = vsub.f32 %v2412_v54, %v2420_v61  ;;  %v3963_v61 = vld [vmem:[%s5687_s3 + $0x16] sm:$0x1] }
0x1a28   :  { %v2423_v63 = vpop.xlane.xlu1 %2422 }
0x1a29   :  { %v2426_v0 = vmul.f32 1.442695, %v2424_v62  ;;  %v2425_v3 = vsub.f32 %v2415_v57, %v2423_v63 }
0x1a2b   :  { %4728 = vpow2.f32 %v2426_v0  ;;  %v2428_v5 = vmul.f32 1.442695, %v2425_v3 }
0x1a2d   :  { %4730 = vpow2.f32 %v2428_v5 }
0x1a35   :  { %v4729_v6 = vpop.eup %4728 }
0x1a36   :  { %v2430_v8 = vsel %vm346_vm9, %v4729_v6, 0.0 }
0x1a37   :  { %v4731_v9 = vpop.eup %4730  ;;  %2431 = vadd.xlane.f32.xlu0 %v2430_v8 }
0x1a38   :  { %v2433_v10 = vsel %vm346_vm9, %v4731_v9, 0.0 }
0x1a39   :  { %2434 = vadd.xlane.f32.xlu1 %v2433_v10 }
0x1ac4   :  { %v2432_v12 = vpop.xlane.xlu0 %2431 }
0x1ac5   :  { %4732 = vrcp.f32 %v2432_v12 }
0x1ac6   :  { %v2435_v13 = vpop.xlane.xlu1 %2434 }
0x1ac7   :  { %4734 = vrcp.f32 %v2435_v13 }
0x1acf   :  { %v4733_v14 = vpop.eup %4732 }
0x1ad0   :  { %v2438_v17 = vmul.f32 %v4733_v14, %v4729_v6  ;;  %v2721_v6 = vunpack.c.l.bf16 %v3963_v61  ;;  %v4657_v61 = vld [vmem:[%s5685_s2 + $0x138] sm:$0xff]  }
0x1ad1   :  { %v4735_v15 = vpop.eup %4734 }
0x1ad2   :  { %v2439_v41 = vmul.f32 %v4735_v15, %v4731_v9  ;;  %v2725_v9 = vrot.slane %v2721_v6, %v4844_v29 }
0x1ad4   :  { %v2440_v42 = vpack.c.bf16 %v2439_v41, %v2438_v17 }
0x1ad6   :  { %4453 = vmatmul.mubr.msk.bf16.vlgmr.msra.gmra.mrb[72].mxu0 %vm346_vm9, %v2440_v42 }
0x1ad7   :  { %4463 = vmatpush3.bf16.msra.mxu0 %v2539_v18  ;;  %4464 = vmatprep.mubr.msk.bf16.mxu0 %vm4765_vm1, %v4764_v16 }
0x1ad8   :  { %4476 = vmatprep.subr.bf16.mxu0 %v4764_v16 }
0x1ade   :  { %4465 = vmatmul.mubr.msk.bf16.vlgmr.msra.gmra.mrb[76].mxu0 %vm298_vm2, %v2170_v36  ;;  %v4651_v36 = vld [vmem:[%s5685_s2 + $0x168] sm:$0xff]  }
0x1adf   :  { %4477 = vmatpush3.bf16.msra.mxu0 %v4646_v19  ;;  %4480 = vmatprep.mubr.msk.bf16.mxu0 %vm4765_vm1, %v4764_v16 }
0x1ae0   :  { %4478 = vmatprep.subr.bf16.mxu0 %v4764_v16 }
0x1ae3   :  { %4479 = vmatpush3.bf16.msra.mxu0 %v4647_v37 }
0x1ae4   :  { %4492 = vmatprep.subr.bf16.mxu0 %v4764_v16 }
0x1ae6   :  { %4481 = vmatmul.mubr.msk.bf16.vlgmr.msra.gmra.mrb[80].mxu0 %vm58_vm0, %v5270_v44 }
0x1ae7   :  { %4494 = vmatprep.mubr.msk.bf16.mxu0 %vm4765_vm1, %v4764_v16 }
0x1ba9   :  { %v2478_v40 = vpop.f32.mrb[72].mxu0 }
0x1baa   :  { %v4454_v20 = vpop.f32.mrb[73].mxu0 }
0x1bab   :  { %v2481_v21 = vpop.f32.mrb[74].mxu0 }
0x1bac   :  { %v2485_v24 = vpack.c.bf16 %v2481_v21, %v2478_v40  ;;  %v4455_v25 = vpop.f32.mrb[75].mxu0 }
0x1bae   :  { %4459 = vmatmul.mubr.msk.bf16.vlgmr.msra.gmra.mrb[68].mxu1 %vm298_vm2, %v2485_v24 }
0x1baf   :  { %4469 = vmatpush3.bf16.msra.mxu1 %v4648_v22  ;;  %4472 = vmatprep.mubr.msk.bf16.mxu1 %vm4765_vm1, %v4764_v16 }
0x1bb0   :  { %4470 = vmatprep.subr.bf16.mxu1 %v4764_v16 }
0x1bb1   :  { %v2575_v28 = vpop.f32.mrb[76].mxu0 }
0x1bb2   :  { %v4466_v32 = vpop.f32.mrb[77].mxu0 }
0x1bb3   :  { %v2578_v27 = vpop.f32.mrb[78].mxu0  ;;  %4471 = vmatpush3.bf16.msra.mxu1 %v4649_v26 }
0x1bb4   :  { %v4467_v34 = vpop.f32.mrb[79].mxu0  ;;  %4484 = vmatprep.subr.bf16.mxu1 %v4764_v16 }
0x1bb6   :  { %4473 = vmatmul.mubr.msk.bf16.vlgmr.msra.gmra.mrb[72].mxu1 %vm58_vm0, %v5270_v44 }
0x1bb7   :  { %4485 = vmatpush3.bf16.msra.mxu1 %v4650_v33  ;;  %4488 = vmatprep.mubr.msk.bf16.mxu1 %vm4765_vm1, %v4764_v16  ;;  %v3969_v33 = vld [vmem:[%s5689_s4 + $0x18] sm:$0xf] }
0x1bb8   :  { %4486 = vmatprep.subr.bf16.mxu1 %v4764_v16  ;;  %v2901_v34 = vsel %vm734_vm10, %v3969_v33, 0 }
0x1bb9   :  { %v2706_v45 = vpop.f32.mrb[80].mxu0 }
0x1bba   :  { %v4482_v39 = vpop.f32.mrb[81].mxu0  ;;  %v2707_v46 = vadd.f32 %v2706_v45, %v2659_v38 }
0x1bbb   :  { %v2709_v43 = vpop.f32.mrb[82].mxu0  ;;  %4487 = vmatpush3.bf16.msra.mxu1 %v4651_v36 }
0x1bbc   :  { %v2710_v47 = vadd.f32 %v2709_v43, %v2659_v38  ;;  %v4483_v48 = vpop.f32.mrb[83].mxu0  ;;  %4498 = vmatprep.subr.bf16.mxu1 %v4764_v16 }
0x1bbd   :  { %v4653_v48 = vld [vmem:[%s5685_s2 + $0xf8] sm:$0xff]  }
0x1bbe   :  { %v2713_v49 = vpack.c.bf16 %v2710_v47, %v2707_v46  ;;  %4489 = vmatmul.mubr.msk.bf16.vlgmr.msra.gmra.mrb[76].mxu1 %vm58_vm0, %v5270_v44  ;;  %v4652_v46 = vld [vmem:[%s5685_s2 + $0xf0] sm:$0xff]  }
0x1bbf   :  { %4500 = vmatprep.mubr.msk.bf16.mxu1 %vm4765_vm1, %v4764_v16 }
0x1bc0   :  { %v2784_v50 = vsel %vm298_vm2, %v2713_v49, 0  ;;  %v4654_v49 = vld [vmem:[%s5685_s2 + $0x170] sm:$0xff]  }
0x1bc1   :  { %4493 = vmatpush3.bf16.xpose.msra.mxu0 %v2784_v50  ;;  %v4655_v50 = vld [vmem:[%s5685_s2 + $0x178] sm:$0xff]  }
0x1bc2   :  { %4504 = vmatprep.subr.bf16.mxu0 %v4764_v16 }
0x1c81   :  { %v2528_v51 = vpop.f32.mrb[68].mxu1 }
0x1c82   :  { %v5457_v53 = vadd.f32 %v2575_v28, %v2528_v51  ;;  %v4460_v54 = vpop.f32.mrb[69].mxu1 }
0x1c83   :  { %v2531_v55 = vpop.f32.mrb[70].mxu1 }
0x1c84   :  { %v5459_v56 = vadd.f32 %v2578_v27, %v2531_v55  ;;  %v4461_v57 = vpop.f32.mrb[71].mxu1 }
0x1c85   :  { %v4656_v57 = vld [vmem:[%s5685_s2 + $0x130] sm:$0xff]  }
0x1c89   :  { %v2640_v60 = vpop.f32.mrb[72].mxu1 }
0x1c8a   :  { %v4474_v62 = vpop.f32.mrb[73].mxu1  ;;  %v2641_v0 = vadd.f32 %v2640_v60, %v2593_v59  ;;  %v2953_v60 = vunpack.c.l.bf16 %v3975_v52 }
0x1c8b   :  { %v2643_v63 = vpop.f32.mrb[74].mxu1 }
0x1c8c   :  { %v2644_v3 = vadd.f32 %v2643_v63, %v2593_v59  ;;  %v4475_v5 = vpop.f32.mrb[75].mxu1  ;;  %v2957_v62 = vrot.slane %v2953_v60, %v4844_v29 }
0x1c8e   :  { %v2647_v8 = vpack.c.bf16 %v2644_v3, %v2641_v0  ;;  %v3991_v0 = vld [vmem:[%s5687_s3 + $0x17] sm:$0x1] }
0x1c90   :  { %4495 = vmatmul.mubr.msk.bf16.vlgmr.msra.gmra.mrb[84].mxu0 %vm298_vm2, %v2647_v8 }
0x1c91   :  { %v2772_v10 = vpop.f32.mrb[76].mxu1  ;;  %4506 = vmatprep.mubr.msk.bf16.mxu0 %vm4765_vm1, %v4764_v16  ;;  %4505 = vmatpush3.bf16.msra.mxu0 %v2901_v34 }
0x1c92   :  { %v4490_v11 = vpop.f32.mrb[77].mxu1  ;;  %v2773_v12 = vadd.f32 %v2772_v10, %v2725_v9  ;;  %4518 = vmatprep.subr.bf16.mxu0 %v4764_v16  ;;  %v3085_v10 = vunpack.c.l.bf16 %v3991_v0 }
0x1c93   :  { %v2775_v4 = vpop.f32.mrb[78].mxu1 }
0x1c94   :  { %v2776_v13 = vadd.f32 %v2775_v4, %v2725_v9  ;;  %v4491_v14 = vpop.f32.mrb[79].mxu1  ;;  %v3089_v4 = vrot.slane %v3085_v10, %v4844_v29 }
0x1c96   :  { %v2779_v15 = vpack.c.bf16 %v2776_v13, %v2773_v12 }
0x1c98   :  { %4499 = vmatpush3.bf16.msra.mxu1 %v2779_v15 }
0x1c99   :  { %4510 = vmatprep.subr.bf16.mxu1 %v4764_v16 }
0x1d63   :  { %v2820_v7 = vpop.f32.mrb[84].mxu0 }
0x1d64   :  { %v2821_v17 = vadd.f32 %v2820_v7, %v4928_v31  ;;  %v4496_v41 = vpop.f32.mrb[85].mxu0 }
0x1d65   :  { %v2823_v42 = vpop.f32.mrb[86].mxu0 }
0x1d66   :  { %v2824_v18 = vadd.f32 %v2823_v42, %v4930_v23  ;;  %v4497_v19 = vpop.f32.mrb[87].mxu0  ;;  %v2827_v37 = vsel %vm346_vm9, %v2821_v17, -inf }
0x1d67   :  { %2828 = vmax.xlane.f32.xlu0 %v2827_v37 }
0x1d68   :  { %v2830_v40 = vsel %vm346_vm9, %v2824_v18, -inf }
0x1d69   :  { %2831 = vmax.xlane.f32.xlu1 %v2830_v40 }
0x1df4   :  { %v2829_v20 = vpop.xlane.xlu0 %2828 }
0x1df5   :  { %v2833_v21 = vsub.f32 %v2821_v17, %v2829_v20 }
0x1df6   :  { %v2832_v22 = vpop.xlane.xlu1 %2831 }
0x1df7   :  { %v2835_v24 = vmul.f32 1.442695, %v2833_v21  ;;  %v2834_v25 = vsub.f32 %v2824_v18, %v2832_v22 }
0x1df9   :  { %4736 = vpow2.f32 %v2835_v24  ;;  %v2837_v26 = vmul.f32 1.442695, %v2834_v25 }
0x1dfb   :  { %4738 = vpow2.f32 %v2837_v26 }
0x1e03   :  { %v4737_v28 = vpop.eup %4736 }
0x1e04   :  { %v2839_v30 = vsel %vm346_vm9, %v4737_v28, 0.0 }
0x1e05   :  { %v4739_v32 = vpop.eup %4738  ;;  %2840 = vadd.xlane.f32.xlu0 %v2839_v30 }
0x1e06   :  { %v2842_v27 = vsel %vm346_vm9, %v4739_v32, 0.0 }
0x1e07   :  { %2843 = vadd.xlane.f32.xlu1 %v2842_v27 }
0x1e92   :  { %v2841_v35 = vpop.xlane.xlu0 %2840 }
0x1e93   :  { %4740 = vrcp.f32 %v2841_v35 }
0x1e94   :  { %v2844_v36 = vpop.xlane.xlu1 %2843 }
0x1e95   :  { %4742 = vrcp.f32 %v2844_v36 }
0x1e9d   :  { %v4741_v38 = vpop.eup %4740 }
0x1e9e   :  { %v2847_v39 = vmul.f32 %v4741_v38, %v4737_v28 }
0x1e9f   :  { %v4743_v45 = vpop.eup %4742 }
0x1ea0   :  { %v2848_v43 = vmul.f32 %v4743_v45, %v4739_v32 }
0x1ea2   :  { %v2849_v47 = vpack.c.bf16 %v2848_v43, %v2847_v39 }
0x1ea4   :  { %4501 = vmatmul.mubr.msk.bf16.vlgmr.msra.gmra.mrb[80].mxu1 %vm346_vm9, %v2849_v47 }
0x1ea5   :  { %4511 = vmatpush3.bf16.msra.mxu1 %v4652_v46  ;;  %4514 = vmatprep.mubr.msk.bf16.mxu1 %vm4765_vm1, %v4764_v16 }
0x1ea6   :  { %4512 = vmatprep.subr.bf16.mxu1 %v4764_v16 }
0x1ea9   :  { %4513 = vmatpush3.bf16.msra.mxu1 %v4653_v48 }
0x1eaa   :  { %4526 = vmatprep.subr.bf16.mxu1 %v4764_v16 }
0x1eac   :  { %4515 = vmatmul.mubr.msk.bf16.vlgmr.msra.gmra.mrb[84].mxu1 %vm58_vm0, %v5270_v44 }
0x1ead   :  { %4527 = vmatpush3.bf16.msra.mxu1 %v4654_v49  ;;  %4530 = vmatprep.mubr.msk.bf16.mxu1 %vm4765_vm1, %v4764_v16 }
0x1eae   :  { %4528 = vmatprep.subr.bf16.mxu1 %v4764_v16 }
0x1eb1   :  { %4529 = vmatpush3.bf16.msra.mxu1 %v4655_v50 }
0x1eb2   :  { %4540 = vmatprep.subr.bf16.mxu1 %v4764_v16 }
0x1eb4   :  { %4531 = vmatmul.mubr.msk.bf16.vlgmr.msra.gmra.mrb[88].mxu1 %vm58_vm0, %v5270_v44 }
0x1eb5   :  { %4542 = vmatprep.mubr.msk.bf16.mxu1 %vm4765_vm1, %v4764_v16 }
0x1f77   :  { %v2887_v51 = vpop.f32.mrb[80].mxu1 }
0x1f78   :  { %v4502_v54 = vpop.f32.mrb[81].mxu1 }
0x1f79   :  { %v2890_v55 = vpop.f32.mrb[82].mxu1  ;;  %v3997_v54 = vld [vmem:[%s5689_s4 + $0x1c] sm:$0xf] }
0x1f7a   :  { %v2894_v58 = vpack.c.bf16 %v2890_v55, %v2887_v51  ;;  %v4503_v59 = vpop.f32.mrb[83].mxu1  ;;  %v3265_v55 = vsel %vm734_vm10, %v3997_v54, 0  ;;  %v4660_v54 = vld [vmem:[%s5690_s5 + $0x60] sm:$0xff]  }
0x1f7c   :  { %4507 = vmatmul.mubr.msk.bf16.vlgmr.msra.gmra.mrb[88].mxu0 %vm298_vm2, %v2894_v58 }
0x1f7d   :  { %4519 = vmatpush3.bf16.msra.mxu0 %v4656_v57  ;;  %4522 = vmatprep.mubr.msk.bf16.mxu0 %vm4765_vm1, %v4764_v16 }
0x1f7e   :  { %4520 = vmatprep.subr.bf16.mxu0 %v4764_v16 }
0x1f7f   :  { %v3004_v63 = vpop.f32.mrb[84].mxu1 }
0x1f80   :  { %v4516_v3 = vpop.f32.mrb[85].mxu1  ;;  %v3005_v6 = vadd.f32 %v3004_v63, %v2957_v62 }
0x1f81   :  { %v3007_v5 = vpop.f32.mrb[86].mxu1  ;;  %4521 = vmatpush3.bf16.msra.mxu0 %v4657_v61 }
0x1f82   :  { %v3008_v8 = vadd.f32 %v3007_v5, %v2957_v62  ;;  %v4517_v9 = vpop.f32.mrb[87].mxu1  ;;  %4534 = vmatprep.subr.bf16.mxu0 %v4764_v16 }
0x1f83   :  { %v3999_v9 = vld [vmem:[%s5686_s6 + $0x9] sm:$0x1] }
0x1f84   :  { %v3011_v11 = vpack.c.bf16 %v3008_v8, %v3005_v6  ;;  %4523 = vmatmul.mubr.msk.bf16.vlgmr.msra.gmra.mrb[92].mxu0 %vm58_vm0, %v5270_v44  ;;  %v3983_v44 = vld [vmem:[%s5687_s3 + $0x13] sm:$0x1]  ;;  %v3312_v10 = vunpack.c.l.bf16 %v3999_v9 }
0x1f85   :  { %4536 = vmatprep.mubr.msk.bf16.mxu0 %vm4765_vm1, %v4764_v16  ;;  %v3019_v21 = vunpack.c.l.bf16 %v3983_v44 }
0x1f87   :  { %v3136_v12 = vpop.f32.mrb[88].mxu1  ;;  %v3023_v22 = vrot.slane %v3019_v21, %v4844_v29 }
0x1f88   :  { %v4532_v13 = vpop.f32.mrb[89].mxu1  ;;  %v3137_v15 = vadd.f32 %v3136_v12, %v3089_v4 }
0x1f89   :  { %v3139_v14 = vpop.f32.mrb[90].mxu1 }
0x1f8a   :  { %v3140_v7 = vadd.f32 %v3139_v14, %v3089_v4  ;;  %v4533_v17 = vpop.f32.mrb[91].mxu1 }
0x1f8c   :  { %v3143_v41 = vpack.c.bf16 %v3140_v7, %v3137_v15 }
0x1f8e   :  { %4541 = vmatpush3.bf16.msra.mxu1 %v3143_v41 }
0x1f8f   :  { %4552 = vmatprep.subr.bf16.mxu1 %v4764_v16 }
0x204f   :  { %v2937_v42 = vpop.f32.mrb[88].mxu0 }
0x2050   :  { %v5536_v18 = vadd.f32 %v2937_v42, %v5457_v53  ;;  %v4508_v19 = vpop.f32.mrb[89].mxu0 }
0x2051   :  { %v2940_v37 = vpop.f32.mrb[90].mxu0 }
0x2052   :  { %v5539_v40 = vadd.f32 %v2940_v37, %v5459_v56  ;;  %v4509_v20 = vpop.f32.mrb[91].mxu0 }
0x2057   :  { %v3070_v24 = vpop.f32.mrb[92].mxu0 }
0x2058   :  { %v4524_v25 = vpop.f32.mrb[93].mxu0  ;;  %v3071_v28 = vadd.f32 %v3070_v24, %v3023_v22 }
0x2059   :  { %v3073_v26 = vpop.f32.mrb[94].mxu0 }
0x205a   :  { %v3074_v30 = vadd.f32 %v3073_v26, %v3023_v22  ;;  %v4525_v32 = vpop.f32.mrb[95].mxu0 }
0x205c   :  { %v3077_v27 = vpack.c.bf16 %v3074_v30, %v3071_v28  ;;  %v4659_v30 = vld [vmem:[%s5690_s5 + $0x58] sm:$0xff]  }
0x205e   :  { %v3148_v33 = vsel %vm298_vm2, %v3077_v27, 0 }
0x205f   :  { %4535 = vmatpush3.bf16.xpose.msra.mxu0 %v3148_v33 }
0x2060   :  { %4546 = vmatprep.subr.bf16.mxu0 %v4764_v16 }
0x2066   :  { %4537 = vmatmul.mubr.msk.bf16.vlgmr.msra.gmra.mrb[96].mxu0 %vm298_vm2, %v3011_v11  ;;  %v3316_v11 = vrot.slane %v3312_v10, %v4844_v29 }
0x2067   :  { %4548 = vmatprep.mubr.msk.bf16.mxu0 %vm4765_vm1, %v4764_v16  ;;  %4547 = vmatpush3.bf16.msra.mxu0 %v3265_v55  ;;  %v4661_v55 = vld [vmem:[%s5690_s5 + $0x68] sm:$0xff]  }
0x2068   :  { %4560 = vmatprep.subr.bf16.mxu0 %v4764_v16 }
0x2139   :  { %v3184_v53 = vpop.f32.mrb[96].mxu0 }
0x213a   :  { %v3185_v56 = vadd.f32 %v3184_v53, %v4928_v31  ;;  %v4538_v34 = vpop.f32.mrb[97].mxu0 }
0x213b   :  { %v3187_v35 = vpop.f32.mrb[98].mxu0 }
0x213c   :  { %v3188_v36 = vadd.f32 %v3187_v35, %v4930_v23  ;;  %v4539_v38 = vpop.f32.mrb[99].mxu0  ;;  %v3191_v45 = vsel %vm346_vm9, %v3185_v56, -inf  ;;  %v4000_v35 = vld [vmem:[%s5686_s6 + $0xa] sm:$0x1] }
0x213d   :  { %3192 = vmax.xlane.f32.xlu0 %v3191_v45  ;;  %v4001_v38 = vld [vmem:[%s5686_s6 + $0xb] sm:$0x1] }
0x213e   :  { %v3194_v39 = vsel %vm346_vm9, %v3188_v36, -inf }
0x213f   :  { %3195 = vmax.xlane.f32.xlu1 %v3194_v39  ;;  %v3326_v39 = vunpack.c.l.bf16 %v4001_v38 }
0x21ca   :  { %v3193_v43 = vpop.xlane.xlu0 %3192 }
0x21cb   :  { %v3197_v46 = vsub.f32 %v3185_v56, %v3193_v43 }
0x21cc   :  { %v3196_v47 = vpop.xlane.xlu1 %3195 }
0x21cd   :  { %v3199_v48 = vmul.f32 1.442695, %v3197_v46  ;;  %v3198_v49 = vsub.f32 %v3188_v36, %v3196_v47  ;;  %v3323_v36 = vunpack.c.l.bf16 %v4000_v35 }
0x21cf   :  { %4744 = vpow2.f32 %v3199_v48  ;;  %v3201_v50 = vmul.f32 1.442695, %v3198_v49  ;;  %v3356_v45 = vrot.slane %v3323_v36, %v4844_v29 }
0x21d1   :  { %4746 = vpow2.f32 %v3201_v50  ;;  %v3362_v50 = vrot.slane %v3326_v39, %v4844_v29 }
0x21d9   :  { %v4745_v31 = vpop.eup %4744 }
0x21da   :  { %v3203_v51 = vsel %vm346_vm9, %v4745_v31, 0.0 }
0x21db   :  { %v4747_v52 = vpop.eup %4746  ;;  %3204 = vadd.xlane.f32.xlu0 %v3203_v51 }
0x21dc   :  { %v3206_v23 = vsel %vm346_vm9, %v4747_v52, 0.0 }
0x21dd   :  { %3207 = vadd.xlane.f32.xlu1 %v3206_v23 }
0x2268   :  { %v3205_v57 = vpop.xlane.xlu0 %3204 }
0x2269   :  { %4748 = vrcp.f32 %v3205_v57  ;;  %v4662_v57 = vld [vmem:[%s5690_s5 + $0x70] sm:$0xff]  }
0x226a   :  { %v3208_v58 = vpop.xlane.xlu1 %3207 }
0x226b   :  { %4750 = vrcp.f32 %v3208_v58  ;;  %v4663_v58 = vld [vmem:[%s5690_s5 + $0x78] sm:$0xff]  }
0x2273   :  { %v4749_v59 = vpop.eup %4748 }
0x2274   :  { %v3211_v61 = vmul.f32 %v4749_v59, %v4745_v31  ;;  %v4664_v59 = vld [vmem:[%s5690_s5 + $0x80] sm:$0xff]  }
0x2275   :  { %v4751_v60 = vpop.eup %4750 }
0x2276   :  { %v3212_v62 = vmul.f32 %v4751_v60, %v4747_v52  ;;  %v4665_v60 = vld [vmem:[%s5690_s5 + $0x88] sm:$0xff]  }
0x2278   :  { %v3213_v63 = vpack.c.bf16 %v3212_v62, %v3211_v61  ;;  %v4666_v61 = vld [vmem:[%s5690_s5 + $0x90] sm:$0xff]   ;;  %v4667_v62 = vld [vmem:[%s5690_s5 + $0x98] sm:$0xff]  }
0x227a   :  { %4543 = vmatmul.mubr.msk.bf16.vlgmr.msra.gmra.mrb[92].mxu1 %vm346_vm9, %v3213_v63  ;;  %v4002_v63 = vld [vmem:[%s5686_s6 + $0xc] sm:$0x1] }
0x227b   :  { %4556 = vmatprep.mubr.msk.bf16.mxu1 %vm4765_vm1, %v4764_v16 }
0x234d   :  { %v3251_v0 = vpop.f32.mrb[92].mxu1 }
0x234e   :  { %v4544_v3 = vpop.f32.mrb[93].mxu1 }
0x234f   :  { %v3254_v5 = vpop.f32.mrb[94].mxu1 }
0x2350   :  { %v3258_v6 = vpack.c.bf16 %v3254_v5, %v3251_v0  ;;  %v4545_v8 = vpop.f32.mrb[95].mxu1  ;;  %v3372_v0 = vunpack.c.l.bf16 %v4002_v63 }
0x2352   :  { %4549 = vmatmul.mubr.msk.bf16.vlgmr.msra.gmra.mrb[100].mxu0 %vm298_vm2, %v3258_v6  ;;  %v3376_v3 = vrot.slane %v3372_v0, %v4844_v29 }
0x2353   :  { %4576 = vmatprep.mubr.msk.bf16.mxu0 %vm4765_vm1, %v4764_v16  ;;  %4561 = vmatpush3.bf16.msra.mxu0 %v4660_v54 }
0x2354   :  { %4562 = vmatprep.subr.bf16.mxu0 %v4764_v16 }
0x2357   :  { %4563 = vmatpush3.bf16.msra.mxu0 %v4661_v55 }
0x2358   :  { %4564 = vmatprep.subr.bf16.mxu0 %v4764_v16 }
0x235b   :  { %4565 = vmatpush3.bf16.msra.mxu0 %v4662_v57 }
0x235c   :  { %4566 = vmatprep.subr.bf16.mxu0 %v4764_v16 }
0x235f   :  { %4567 = vmatpush3.bf16.msra.mxu0 %v4663_v58 }
0x2360   :  { %4568 = vmatprep.subr.bf16.mxu0 %v4764_v16 }
0x2363   :  { %4569 = vmatpush3.bf16.msra.mxu0 %v4664_v59 }
0x2364   :  { %4570 = vmatprep.subr.bf16.mxu0 %v4764_v16 }
0x2367   :  { %4571 = vmatpush3.bf16.msra.mxu0 %v4665_v60  ;;  %v4015_v60 = vld [vmem:[%s5686_s6 + $0xe] sm:$0x1] }
0x2368   :  { %4572 = vmatprep.subr.bf16.mxu0 %v4764_v16 }
0x236b   :  { %4573 = vmatpush3.bf16.msra.mxu0 %v4666_v61  ;;  %v3568_v61 = vunpack.c.l.bf16 %v4015_v60 }
0x236c   :  { %4574 = vmatprep.subr.bf16.mxu0 %v4764_v16 }
0x236d   :  { %v3601_v63 = vrot.slane %v3568_v61, %v4844_v29 }
0x236f   :  { %4575 = vmatpush3.bf16.msra.mxu0 %v4667_v62  ;;  %v4016_v62 = vld [vmem:[%s5686_s6 + $0xf] sm:$0x1] }
0x2370   :  { %v3571_v0 = vunpack.c.l.bf16 %v4016_v62 }
0x2425   :  { %v3301_v4 = vpop.f32.mrb[100].mxu0 }
0x2426   :  { %v3308_v12 = vadd.f32 %v3301_v4, %v5536_v18  ;;  %v4550_v13 = vpop.f32.mrb[101].mxu0 }
0x2427   :  { %v3304_v14 = vpop.f32.mrb[102].mxu0 }
0x2428   :  { %v3317_v15 = vadd.f32 %v3316_v11, %v3308_v12  ;;  %v3309_v7 = vadd.f32 %v3304_v14, %v5539_v40  ;;  %v4551_v17 = vpop.f32.mrb[103].mxu0 }
0x242a   :  { %v3318_v41 = vadd.f32 %v3316_v11, %v3309_v7  ;;  %v3319_v42 = vadd.f32 %v3317_v15, %v5261_v1 }
0x242c   :  { %v3327_v44 = vsel %vm58_vm0, %v3319_v42, 0.0  ;;  %v3320_v19 = vadd.f32 %v3318_v41, %v5263_v2  ;;  %v4658_v2 = vld [vmem:[%s5690_s5 + $0x50] sm:$0xff]  }
0x242d   :  { %3328 = vadd.xlane.f32.xlu0 %v3327_v44  ;;  %4553 = vmatpush3.bf16.msra.mxu1 %v4658_v2 }
0x242e   :  { %v3330_v37 = vsel %vm58_vm0, %v3320_v19, 0.0  ;;  %4554 = vmatprep.subr.bf16.mxu1 %v4764_v16 }
0x242f   :  { %3331 = vadd.xlane.f32.xlu1 %v3330_v37 }
0x2431   :  { %4555 = vmatpush3.bf16.msra.mxu1 %v4659_v30 }
0x2432   :  { %4580 = vmatprep.subr.bf16.mxu1 %v4764_v16 }
0x24ba   :  { %v3329_v20 = vpop.xlane.xlu0 %3328 }
0x24bb   :  { %v3333_v21 = vmul.f32 0.03125, %v3329_v20 }
0x24bc   :  { %v3332_v18 = vpop.xlane.xlu1 %3331 }
0x24bd   :  { %v3335_v22 = vsub.f32 %v3319_v42, %v3333_v21  ;;  %v3334_v24 = vmul.f32 0.03125, %v3332_v18 }
0x24bf   :  { %v3336_v25 = vsub.f32 %v3320_v19, %v3334_v24  ;;  %v3337_v26 = vmul.f32 %v3335_v22, %v3335_v22 }
0x24c1   :  { %v3339_v40 = vsel %vm58_vm0, %v3337_v26, 0.0  ;;  %v3338_v28 = vmul.f32 %v3336_v25, %v3336_v25 }
0x24c2   :  { %3340 = vadd.xlane.f32.xlu0 %v3339_v40  ;;  %v4006_v40 = vld [vmem:[%s5686_s6 + $0xd] sm:$0x1] }
0x24c3   :  { %v3342_v1 = vsel %vm58_vm0, %v3338_v28, 0.0  ;;  %v3470_v28 = vunpack.c.l.bf16 %v4006_v40 }
0x24c4   :  { %3343 = vadd.xlane.f32.xlu1 %v3342_v1 }
0x24c5   :  { %v3474_v1 = vrot.slane %v3470_v28, %v4844_v29 }
0x254f   :  { %v3341_v32 = vpop.xlane.xlu0 %3340 }
0x2550   :  { %v3345_v27 = vmul.f32 0.03125, %v3341_v32 }
0x2551   :  { %v3344_v33 = vpop.xlane.xlu1 %3343 }
0x2552   :  { %v3347_v53 = vadd.f32 1e-12, %v3345_v27  ;;  %v3346_v56 = vmul.f32 0.03125, %v3344_v33 }
0x2554   :  { %4752 = vrsqrt.f32 %v3347_v53  ;;  %v3348_v34 = vadd.f32 1e-12, %v3346_v56 }
0x2556   :  { %4754 = vrsqrt.f32 %v3348_v34 }
0x255e   :  { %v4753_v43 = vpop.eup %4752 }
0x255f   :  { %v3351_v46 = vmul.f32 %v4753_v43, %v3335_v22 }
0x2560   :  { %v4755_v47 = vpop.eup %4754 }
0x2561   :  { %v3357_v48 = vmul.f32 %v3356_v45, %v3351_v46  ;;  %v3352_v49 = vmul.f32 %v4755_v47, %v3336_v25 }
0x2563   :  { %v3358_v31 = vmul.f32 %v3356_v45, %v3352_v49  ;;  %v5592_v51 = vadd.f32 %v3362_v50, %v3357_v48 }
0x2565   :  { %v5594_v52 = vadd.f32 %v3362_v50, %v3358_v31 }
0x2567   :  { %v3369_v23 = vpack.c.bf16 %v5594_v52, %v5592_v51 }
0x2569   :  { %4557 = vmatmul.mubr.msk.bf16.vlgmr.msra.gmra.mrb[96].mxu1 %vm58_vm0, %v3369_v23 }
0x256a   :  { %4584 = vmatprep.mubr.msk.bf16.mxu1 %vm4765_vm1, %v4764_v16 }
0x263c   :  { %v3426_v5 = vpop.f32.mrb[96].mxu1 }
0x263d   :  { %v3427_v6 = vadd.f32 %v3426_v5, %v3376_v3  ;;  %v4558_v8 = vpop.f32.mrb[97].mxu1 }
0x263e   :  { %v3429_v9 = vpop.f32.mrb[98].mxu1 }
0x263f   :  { %v3435_v10 = vmul.f32 0.044715, %v3427_v6  ;;  %v3430_v11 = vadd.f32 %v3429_v9, %v3376_v3  ;;  %v4559_v4 = vpop.f32.mrb[99].mxu1  ;;  %v3433_v21 = vmul.f32 0.5, %v3427_v6 }
0x2641   :  { %v3437_v12 = vmul.f32 %v3435_v10, %v3427_v6  ;;  %v3436_v13 = vmul.f32 0.044715, %v3430_v11  ;;  %v3434_v18 = vmul.f32 0.5, %v3430_v11  ;;  %v3607_v10 = vrot.slane %v3571_v0, %v4844_v29 }
0x2643   :  { %v3439_v14 = vmul.f32 %v3437_v12, %v3427_v6  ;;  %v3438_v15 = vmul.f32 %v3436_v13, %v3430_v11 }
0x2645   :  { %v3441_v7 = vadd.f32 %v3439_v14, %v3427_v6  ;;  %v3440_v17 = vmul.f32 %v3438_v15, %v3430_v11  ;;  %v4670_v14 = vld [vmem:[%s5690_s5 + $0xa0] sm:$0xff]   ;;  %v4671_v15 = vld [vmem:[%s5690_s5 + $0xa8] sm:$0xff]  }
0x2647   :  { %v3443_v41 = vmul.f32 0.7978846, %v3441_v7  ;;  %v3442_v42 = vadd.f32 %v3440_v17, %v3430_v11  ;;  %v4017_v7 = vld [vmem:[%s5686_s6 + $0x10] sm:$0x1] }
0x2648   :  { %v3617_v17 = vunpack.c.l.bf16 %v4017_v7 }
0x2649   :  { %4756 = vtanh.f32 %v3443_v41  ;;  %v3444_v44 = vmul.f32 0.7978846, %v3442_v42 }
0x264a   :  { %v3621_v41 = vrot.slane %v3617_v17, %v4844_v29 }
0x264b   :  { %4758 = vtanh.f32 %v3444_v44 }
0x2653   :  { %v4757_v19 = vpop.eup %4756 }
0x2654   :  { %v3447_v37 = vadd.f32 1.0, %v4757_v19 }
0x2655   :  { %v4759_v20 = vpop.eup %4758 }
0x2656   :  { %v3448_v22 = vadd.f32 1.0, %v4759_v20  ;;  %v3449_v24 = vmul.f32 %v3447_v37, %v3433_v21 }
0x2658   :  { %v3450_v25 = vmul.f32 %v3448_v22, %v3434_v18 }
0x265a   :  { %v3467_v26 = vpack.c.bf16 %v3450_v25, %v3449_v24  ;;  %v4021_v24 = vld [vmem:[%s5686_s6 + $0x11] sm:$0x1] }
0x265b   :  { %v3687_v25 = vunpack.c.l.bf16 %v4021_v24 }
0x265c   :  { %4577 = vmatmul.mubr.bf16.vlgmr.msra.gmra.mrb[104].mxu0 %v3467_v26 }
0x265d   :  { %v3691_v26 = vrot.slane %v3687_v25, %v4844_v29 }
0x272f   :  { %v3557_v2 = vpop.f32.mrb[104].mxu0 }
0x2730   :  { %v3558_v30 = vadd.f32 %v3557_v2, %v3474_v1  ;;  %v4578_v32 = vpop.f32.mrb[105].mxu0 }
0x2731   :  { %v3560_v27 = vpop.f32.mrb[106].mxu0 }
0x2732   :  { %v3561_v33 = vadd.f32 %v3560_v27, %v3474_v1  ;;  %v4579_v53 = vpop.f32.mrb[107].mxu0  ;;  %v3564_v56 = vadd.f32 %v3558_v30, %v5592_v51  ;;  %v4668_v51 = vld [vmem:[%s5690_s5 + $0xb0] sm:$0xff]  }
0x2733   :  { %4581 = vmatpush3.bf16.msra.mxu1 %v4668_v51 }
0x2734   :  { %v3572_v34 = vsel %vm58_vm0, %v3564_v56, 0.0  ;;  %v3565_v35 = vadd.f32 %v3561_v33, %v5594_v52  ;;  %4582 = vmatprep.subr.bf16.mxu1 %v4764_v16  ;;  %v4669_v52 = vld [vmem:[%s5690_s5 + $0xb8] sm:$0xff]  }
0x2735   :  { %3573 = vadd.xlane.f32.xlu0 %v3572_v34 }
0x2736   :  { %v3575_v36 = vsel %vm58_vm0, %v3565_v35, 0.0 }
0x2737   :  { %3576 = vadd.xlane.f32.xlu1 %v3575_v36  ;;  %4583 = vmatpush3.bf16.msra.mxu1 %v4669_v52 }
0x2738   :  { %4588 = vmatprep.subr.bf16.mxu1 %v4764_v16 }
0x27c2   :  { %v3574_v38 = vpop.xlane.xlu0 %3573 }
0x27c3   :  { %v3578_v45 = vmul.f32 0.03125, %v3574_v38 }
0x27c4   :  { %v3577_v39 = vpop.xlane.xlu1 %3576 }
0x27c5   :  { %v3580_v43 = vsub.f32 %v3564_v56, %v3578_v45  ;;  %v3579_v46 = vmul.f32 0.03125, %v3577_v39 }
0x27c7   :  { %v3581_v47 = vsub.f32 %v3565_v35, %v3579_v46  ;;  %v3582_v48 = vmul.f32 %v3580_v43, %v3580_v43 }
0x27c9   :  { %v3584_v49 = vsel %vm58_vm0, %v3582_v48, 0.0  ;;  %v3583_v50 = vmul.f32 %v3581_v47, %v3581_v47 }
0x27ca   :  { %3585 = vadd.xlane.f32.xlu0 %v3584_v49 }
0x27cb   :  { %v3587_v31 = vsel %vm58_vm0, %v3583_v50, 0.0 }
0x27cc   :  { %3588 = vadd.xlane.f32.xlu1 %v3587_v31 }
0x2857   :  { %v3586_v23 = vpop.xlane.xlu0 %3585 }
0x2858   :  { %v3590_v54 = vmul.f32 0.03125, %v3586_v23 }
0x2859   :  { %v3589_v55 = vpop.xlane.xlu1 %3588 }
0x285a   :  { %v3592_v57 = vadd.f32 1e-12, %v3590_v54  ;;  %v3591_v58 = vmul.f32 0.03125, %v3589_v55 }
0x285c   :  { %4760 = vrsqrt.f32 %v3592_v57  ;;  %v3593_v59 = vadd.f32 1e-12, %v3591_v58 }
0x285e   :  { %4762 = vrsqrt.f32 %v3593_v59 }
0x2866   :  { %v4761_v3 = vpop.eup %4760 }
0x2867   :  { %v3596_v5 = vmul.f32 %v4761_v3, %v3580_v43 }
0x2868   :  { %v4763_v6 = vpop.eup %4762 }
0x2869   :  { %v3602_v8 = vmul.f32 %v3601_v63, %v3596_v5  ;;  %v3597_v9 = vmul.f32 %v4763_v6, %v3581_v47 }
0x286b   :  { %v3603_v11 = vmul.f32 %v3601_v63, %v3597_v9  ;;  %v3608_v4 = vadd.f32 %v3607_v10, %v3602_v8 }
0x286d   :  { %v3609_v12 = vadd.f32 %v3607_v10, %v3603_v11 }
0x286f   :  { %v3614_v13 = vpack.c.bf16 %v3609_v12, %v3608_v4 }
0x2871   :  { %4585 = vmatmul.mubr.msk.bf16.vlgmr.msra.gmra.mrb[100].mxu1 %vm58_vm0, %v3614_v13 }
0x2872   :  { %4592 = vmatprep.mubr.msk.bf16.mxu1 %vm4765_vm1, %v4764_v16  ;;  %4589 = vmatpush3.bf16.msra.mxu1 %v4670_v14 }
0x2873   :  { %4590 = vmatprep.subr.bf16.mxu1 %v4764_v16 }
0x2876   :  { %4591 = vmatpush3.bf16.msra.mxu1 %v4671_v15 }
0x2944   :  { %v3671_v42 = vpop.f32.mrb[100].mxu1 }
0x2945   :  { %v3672_v44 = vadd.f32 %v3671_v42, %v3621_v41  ;;  %v4586_v19 = vpop.f32.mrb[101].mxu1 }
0x2946   :  { %v3674_v37 = vpop.f32.mrb[102].mxu1 }
0x2947   :  { %v3675_v20 = vadd.f32 %v3674_v37, %v3621_v41  ;;  %v4587_v21 = vpop.f32.mrb[103].mxu1  ;;  %v3678_v18 = vmax.f32 %v3672_v44, 0.0 }
0x2949   :  { %v3679_v16 = vmax.f32 %v3675_v20, 0.0 }
0x294b   :  { %v3684_v22 = vpack.c.bf16 %v3679_v16, %v3678_v18 }
0x294d   :  { %4593 = vmatmul.mubr.msk.bf16.vlgmr.msra.gmra.mrb[104].mxu1 %vm58_vm0, %v3684_v22 }
0x2a20   :  { %v3741_v40 = vpop.f32.mrb[104].mxu1 }
0x2a21   :  { %v4594_v28 = vpop.f32.mrb[105].mxu1  ;;  %v3742_v2 = vadd.f32 %v3741_v40, %v3691_v26 }
0x2a22   :  { %v3744_v1 = vpop.f32.mrb[106].mxu1 }
0x2a23   :  { %v3745_v30 = vadd.f32 %v3744_v1, %v3691_v26  ;;  %v4595_v32 = vpop.f32.mrb[107].mxu1 }
0x2a25   :  { %v4036_v27 = vpack.c.bf16 %v3745_v30, %v3742_v2 }
0x2a27   :  { %4037 = vst [vmem:[%s5691_s7] sm:$0xff] %v4036_v27  }

</bundles_post_ra>
